<compile_context>
chip_gen: v5e
topology: v5e:2x2
jax: 0.10.0
libtpu: 0.0.40
codegen_flags: <defaults>
</compile_context>

<pallas_src>
import numpy as np
import jax
import jax.numpy as jnp
from jax import lax
from jax.experimental import pallas as pl
from jax.experimental.pallas import tpu as pltpu

# ---- small, self-consistent configuration (heads * KQ_len == in_features) ----
IN_FEATURES = 32
POINT_NUM = 8      # N
OBS_NUM = 5        # obs_num
KQ_LEN = 8
NUM_HEADS = 4
DFF = 64
LN_EPS = 1e-5
BATCH = 2


# --------------------------------- kernel ------------------------------------
def _instance_attention_kernel(
    x_ref, wqkv_ref, bqkv_ref, wf3_ref, bf_ref,
    g1_ref, be1_ref, w1_ref, b1_ref, w2_ref, b2_ref,
    g2_ref, be2_ref, out_ref,
):
    f32 = jnp.float32
    x = x_ref[0]                                   # [RB, F], RB = B_TILE*N*obs
    RB = x.shape[0]
    P = out_ref.shape[1]                           # B_TILE * N
    H, D = NUM_HEADS, KQ_LEN
    inv_obs = 1.0 / float(OBS_NUM)
    rows_per_batch = float(POINT_NUM * OBS_NUM)

    # ---- index helpers from iota (no constant-tensor DMAs): block-diagonal
    #      attention mask, per-batch LayerNorm pooling, mean-over-obs pooling.
    #      group id = row // obs_num, batch id = row // (N*obs_num); the
    #      floor-division is done as (float multiply, truncate), which is exact
    #      for these magnitudes and avoids vector integer division.
    ri = lax.broadcasted_iota(jnp.int32, (RB, RB), 0).astype(f32)
    ci = lax.broadcasted_iota(jnp.int32, (RB, RB), 1).astype(f32)
    grp_r = (ri * inv_obs).astype(jnp.int32)       # (batch, point) group id
    grp_c = (ci * inv_obs).astype(jnp.int32)
    attn_bias = jnp.where(grp_r == grp_c, 0.0, -1e30)                # [RB, RB]
    bat_r = (ri * (1.0 / rows_per_batch)).astype(jnp.int32)
    bat_c = (ci * (1.0 / rows_per_batch)).astype(jnp.int32)
    ln_pool = jnp.where(bat_r == bat_c,
                        1.0 / (rows_per_batch * IN_FEATURES), 0.0)   # [RB, RB]
    pi = lax.broadcasted_iota(jnp.int32, (P, RB), 0)
    pj = lax.broadcasted_iota(jnp.int32, (P, RB), 1).astype(f32)
    obs_pool = jnp.where(pi == (pj * inv_obs).astype(jnp.int32),
                         inv_obs, 0.0)                               # [P, RB]

    # ---- fused K|Q|V projection (Q columns pre-scaled by 1/sqrt(D)) ----
    kqv = jnp.dot(x, wqkv_ref[...], preferred_element_type=f32) + bqkv_ref[...]
    heads = jnp.stack(
        [kqv[:, c * D:(c + 1) * D] for c in range(3 * H)], axis=0)   # [3H,RB,D]
    k3 = heads[:H]
    q3 = heads[H:2 * H]
    v3 = heads[2 * H:]

    # ---- per-(batch, point) attention, all heads batched ----
    sc = jnp.einsum('hrd,hsd->hrs', k3, q3, preferred_element_type=f32)
    sc = sc + attn_bias[None]
    sc = sc - jnp.max(sc, axis=-1, keepdims=True)
    e = jnp.exp(sc)
    denom = jnp.sum(e, axis=-1, keepdims=True)
    rcp = pl.reciprocal(denom, approx=True)
    rcp = rcp * (2.0 - denom * rcp)            # one Newton step -> f32 accuracy
    attn = e * rcp
    ctx = jnp.einsum('hrs,hsd->hrd', attn, v3, preferred_element_type=f32)

    # ---- feat_linear applied per head & summed (no lane concat of heads) ----
    mfl3 = jnp.einsum('hrd,hdg->hrg', ctx, wf3_ref[...],
                      preferred_element_type=f32)                    # [H,RB,F]
    mfl = mfl3[0]
    for h in range(1, H):
        mfl = mfl + mfl3[h]
    mfl = mfl + bf_ref[...]
    # TODO(synk): nn.Dropout(p=0.01) treated as identity (inference mode).

    def layer_norm(y, g_ref, b_ref):
        # LayerNorm over [N, obs, F] jointly, one (mean, var) per batch
        # element, realised with a per-batch pooling matmul so several batch
        # elements can share one grid step.
        t = jnp.dot(ln_pool, y, preferred_element_type=f32)
        mu = jnp.sum(t, axis=-1, keepdims=True)                      # [RB, 1]
        c = y - mu
        v = jnp.dot(ln_pool, c * c, preferred_element_type=f32)
        var = jnp.sum(v, axis=-1, keepdims=True) + LN_EPS
        rs = lax.rsqrt(var)
        rs = rs * (1.5 - 0.5 * var * rs * rs)  # Newton step -> f32 accuracy
        return c * rs * g_ref[...] + b_ref[...]

    o1 = layer_norm(mfl + x, g1_ref, be1_ref)

    # TODO(synk): FFN.PointWiseFeedForwardNet source unavailable; standard
    #             Linear(in, dff) -> ReLU -> Linear(dff, out).
    h1 = jnp.maximum(
        jnp.dot(o1, w1_ref[...], preferred_element_type=f32) + b1_ref[...], 0.0)
    ffn = jnp.dot(h1, w2_ref[...], preferred_element_type=f32) + b2_ref[...]
    o2 = layer_norm(o1 + ffn, g2_ref, be2_ref)

    # ---- mean over obs within each (batch, point), as a pooling matmul ----
    out_ref[0] = jnp.dot(obs_pool, o2, preferred_element_type=f32)


# -------------------------------- wrapper -------------------------------------
def _rep_spec(shape):
    n = len(shape)
    return pl.BlockSpec(shape, lambda t, _n=n: (0,) * _n)


def instance_attention_forward(x, params, b_tile=None):
    B, N, OBS, F = x.shape
    assert (N, OBS, F) == (POINT_NUM, OBS_NUM, IN_FEATURES)
    R = N * OBS
    if b_tile is None:
        # Fold as many batch elements as possible into one grid step (per-step
        # overhead dominates at this size); VMEM use stays far below the limit
        # even at b_tile=32, so only divisibility constrains the choice.
        b_tile = min(B, 32)
        while B % b_tile:
            b_tile -= 1
    T = B // b_tile
    RB = b_tile * R

    H, D = NUM_HEADS, KQ_LEN
    scale = 1.0 / np.sqrt(float(D))

    # Host-side weight packing: fused K|Q|V projection (Q pre-scaled), per-head
    # feat_linear tensor, and [in, out]-oriented weights so every kernel matmul
    # is a plain jnp.dot.
    w_qkv = jnp.concatenate(
        [params['Wk'].T, (params['Wq'] * scale).T, params['Wv'].T], axis=1)
    b_qkv = jnp.concatenate(
        [params['bk'], params['bq'] * scale, params['bv']], axis=1)
    wf3 = params['Wf'].T.reshape(H, D, F)
    tile_ln = lambda a: jnp.tile(a.reshape(R, F), (b_tile, 1))

    args = [
        x.reshape(T, RB, F),
        w_qkv, b_qkv, wf3, params['bf'],
        tile_ln(params['g1']), tile_ln(params['be1']),
        params['W1'].T, params['b1'], params['W2'].T, params['b2'],
        tile_ln(params['g2']), tile_ln(params['be2']),
    ]
    in_specs = [pl.BlockSpec((1, RB, F), lambda t: (t, 0, 0))]
    in_specs += [_rep_spec(a.shape) for a in args[1:]]

    out = pl.pallas_call(
        _instance_attention_kernel,
        grid=(T,),
        in_specs=in_specs,
        out_specs=pl.BlockSpec((1, b_tile * N, F), lambda t: (t, 0, 0)),
        out_shape=jax.ShapeDtypeStruct((T, b_tile * N, F), jnp.float32),
        compiler_params=pltpu.CompilerParams(
            dimension_semantics=("parallel",)),
    )(*args)
    return out.reshape(B, N, F)


# ----------------------- pure-JAX reference (PyTorch semantics) ---------------
def ref_forward(x, p):
    B, N, OBS, F = x.shape
    H, D = NUM_HEADS, KQ_LEN

    def lin(y, W, b):
        return jnp.einsum('...f,gf->...g', y, W) + b

    V = lin(x, p['Wv'], p['bv']).reshape(B, N, OBS, H, D)
    K = lin(x, p['Wk'], p['bk']).reshape(B, N, OBS, H, D)
    Q = lin(x, p['Wq'], p['bq']).reshape(B, N, OBS, H, D)

    QK = jnp.einsum('bnihd,bnjhd->bnhij', K, Q) / np.sqrt(float(D))
    A = jax.nn.softmax(QK, axis=-1)
    merged = jnp.einsum('bnhij,bnjhd->bnihd', A, V).reshape(B, N, OBS, F)

    mfl = lin(merged, p['Wf'], p['bf'])
    y1 = mfl + x
    mu = jnp.mean(y1, axis=(1, 2, 3), keepdims=True)
    var = jnp.mean((y1 - mu) ** 2, axis=(1, 2, 3), keepdims=True)
    o1 = (y1 - mu) / jnp.sqrt(var + LN_EPS) * p['g1'] + p['be1']

    h = jnp.maximum(lin(o1, p['W1'], p['b1']), 0.0)
    ffn = lin(h, p['W2'], p['b2'])
    y2 = o1 + ffn
    mu2 = jnp.mean(y2, axis=(1, 2, 3), keepdims=True)
    var2 = jnp.mean((y2 - mu2) ** 2, axis=(1, 2, 3), keepdims=True)
    o2 = (y2 - mu2) / jnp.sqrt(var2 + LN_EPS) * p['g2'] + p['be2']
    return jnp.mean(o2, axis=2)


def init_params(key):
    ks = jax.random.split(key, 6)

    def lin_init(k, out_f, in_f):
        k1, k2 = jax.random.split(k)
        bound = 1.0 / np.sqrt(in_f)
        W = jax.random.uniform(k1, (out_f, in_f), jnp.float32, -bound, bound)
        b = jax.random.uniform(k2, (1, out_f), jnp.float32, -bound, bound)
        return W, b

    G = NUM_HEADS * KQ_LEN
    Wk, bk = lin_init(ks[0], G, IN_FEATURES)
    Wq, bq = lin_init(ks[1], G, IN_FEATURES)
    Wv, bv = lin_init(ks[2], G, IN_FEATURES)
    Wf, bf = lin_init(ks[3], IN_FEATURES, IN_FEATURES)
    W1, b1 = lin_init(ks[4], DFF, IN_FEATURES)
    W2, b2 = lin_init(ks[5], IN_FEATURES, DFF)
    ln_shape = (POINT_NUM, OBS_NUM, IN_FEATURES)
    return dict(
        Wk=Wk, bk=bk, Wq=Wq, bq=bq, Wv=Wv, bv=bv, Wf=Wf, bf=bf,
        W1=W1, b1=b1, W2=W2, b2=b2,
        g1=jnp.ones(ln_shape, jnp.float32), be1=jnp.zeros(ln_shape, jnp.float32),
        g2=jnp.ones(ln_shape, jnp.float32), be2=jnp.zeros(ln_shape, jnp.float32),
    )


if __name__ == "__main__":
    key = jax.random.PRNGKey(0)
    kx, kp = jax.random.split(key)
    x = jax.random.normal(kx, (BATCH, POINT_NUM, OBS_NUM, IN_FEATURES), jnp.float32)
    params = init_params(kp)

    fwd = jax.jit(lambda xx: instance_attention_forward(xx, params))
    out = jax.block_until_ready(fwd(x))
    ref = jax.block_until_ready(ref_forward(x, params))
    # Tolerance covers f32 reassociation (fused projections, MXU pooling for
    # the LN statistics) and the EUP fast reciprocal/rsqrt paths; any
    # structural error (mask / pooling / attention transpose) would be O(0.1).
    np.testing.assert_allclose(np.asarray(out), np.asarray(ref), rtol=1e-3, atol=1e-3)
    print("KERNEL_OK")
</pallas_src>

<mosaic_0001>
module attributes {stable_mosaic.version = 11 : i64} {
  func.func @_instance_attention_kernel(%arg0: i32, %arg1: memref<1x80x32xf32, #tpu.memory_space<vmem>>, %arg2: memref<32x96xf32, #tpu.memory_space<vmem>>, %arg3: memref<1x96xf32, #tpu.memory_space<vmem>>, %arg4: memref<4x8x32xf32, #tpu.memory_space<vmem>>, %arg5: memref<1x32xf32, #tpu.memory_space<vmem>>, %arg6: memref<80x32xf32, #tpu.memory_space<vmem>>, %arg7: memref<80x32xf32, #tpu.memory_space<vmem>>, %arg8: memref<32x64xf32, #tpu.memory_space<vmem>>, %arg9: memref<1x64xf32, #tpu.memory_space<vmem>>, %arg10: memref<64x32xf32, #tpu.memory_space<vmem>>, %arg11: memref<1x32xf32, #tpu.memory_space<vmem>>, %arg12: memref<80x32xf32, #tpu.memory_space<vmem>>, %arg13: memref<80x32xf32, #tpu.memory_space<vmem>>, %arg14: memref<1x16x32xf32, #tpu.memory_space<vmem>>) attributes {dimension_semantics = [#tpu.dimension_semantics<parallel>], iteration_bounds = array<i64: 1>, scalar_prefetch = 0 : i64, scratch_operands = 0 : i64, tpu.core_type = #tpu.core_type<tc>, window_params = [{transform_indices = @transform_0, window_bounds = array<i64: 1, 80, 32>}, {pipeline_mode = #tpu.pipeline_mode<synchronous>, transform_indices = @transform_1, window_bounds = array<i64: 32, 96>}, {pipeline_mode = #tpu.pipeline_mode<synchronous>, transform_indices = @transform_2, window_bounds = array<i64: 1, 96>}, {pipeline_mode = #tpu.pipeline_mode<synchronous>, transform_indices = @transform_3, window_bounds = array<i64: 4, 8, 32>}, {pipeline_mode = #tpu.pipeline_mode<synchronous>, transform_indices = @transform_4, window_bounds = array<i64: 1, 32>}, {pipeline_mode = #tpu.pipeline_mode<synchronous>, transform_indices = @transform_5, window_bounds = array<i64: 80, 32>}, {pipeline_mode = #tpu.pipeline_mode<synchronous>, transform_indices = @transform_6, window_bounds = array<i64: 80, 32>}, {pipeline_mode = #tpu.pipeline_mode<synchronous>, transform_indices = @transform_7, window_bounds = array<i64: 32, 64>}, {pipeline_mode = #tpu.pipeline_mode<synchronous>, transform_indices = @transform_8, window_bounds = array<i64: 1, 64>}, {pipeline_mode = #tpu.pipeline_mode<synchronous>, transform_indices = @transform_9, window_bounds = array<i64: 64, 32>}, {pipeline_mode = #tpu.pipeline_mode<synchronous>, transform_indices = @transform_10, window_bounds = array<i64: 1, 32>}, {pipeline_mode = #tpu.pipeline_mode<synchronous>, transform_indices = @transform_11, window_bounds = array<i64: 80, 32>}, {pipeline_mode = #tpu.pipeline_mode<synchronous>, transform_indices = @transform_12, window_bounds = array<i64: 80, 32>}, {transform_indices = @transform_13, window_bounds = array<i64: 1, 16, 32>}]} {
    %c0 = arith.constant 0 : index
    %c0_0 = arith.constant 0 : index
    %c0_1 = arith.constant 0 : index
    %0 = vector.load %arg1[%c0, %c0_0, %c0_1] : memref<1x80x32xf32, #tpu.memory_space<vmem>>, vector<1x80x32xf32>
    %1 = vector.shape_cast %0 : vector<1x80x32xf32> to vector<80x32xf32>
    %2 = tpu.iota {dimensions = array<i32: 0>} : vector<80x80xi32>
    %3 = arith.sitofp %2 : vector<80x80xi32> to vector<80x80xf32>
    %4 = tpu.iota {dimensions = array<i32: 1>} : vector<80x80xi32>
    %5 = arith.sitofp %4 : vector<80x80xi32> to vector<80x80xf32>
    %cst = arith.constant 2.000000e-01 : f32
    %6 = vector.broadcast %cst : f32 to vector<80x80xf32>
    %7 = arith.mulf %3, %6 : vector<80x80xf32>
    %8 = arith.fptosi %7 : vector<80x80xf32> to vector<80x80xi32>
    %cst_2 = arith.constant 2.000000e-01 : f32
    %9 = vector.broadcast %cst_2 : f32 to vector<80x80xf32>
    %10 = arith.mulf %5, %9 : vector<80x80xf32>
    %11 = arith.fptosi %10 : vector<80x80xf32> to vector<80x80xi32>
    %12 = arith.cmpi eq, %8, %11 : vector<80x80xi32>
    %cst_3 = arith.constant 0.000000e+00 : f32
    %cst_4 = arith.constant -1.000000e+30 : f32
    %13 = vector.broadcast %cst_3 : f32 to vector<80x80xf32>
    %14 = vector.broadcast %cst_4 : f32 to vector<80x80xf32>
    %15 = arith.select %12, %13, %14 : vector<80x80xi1>, vector<80x80xf32>
    %cst_5 = arith.constant 2.500000e-02 : f32
    %16 = vector.broadcast %cst_5 : f32 to vector<80x80xf32>
    %17 = arith.mulf %3, %16 : vector<80x80xf32>
    %18 = arith.fptosi %17 : vector<80x80xf32> to vector<80x80xi32>
    %cst_6 = arith.constant 2.500000e-02 : f32
    %19 = vector.broadcast %cst_6 : f32 to vector<80x80xf32>
    %20 = arith.mulf %5, %19 : vector<80x80xf32>
    %21 = arith.fptosi %20 : vector<80x80xf32> to vector<80x80xi32>
    %22 = arith.cmpi eq, %18, %21 : vector<80x80xi32>
    %cst_7 = arith.constant 7.812500e-04 : f32
    %cst_8 = arith.constant 0.000000e+00 : f32
    %23 = vector.broadcast %cst_7 : f32 to vector<80x80xf32>
    %24 = vector.broadcast %cst_8 : f32 to vector<80x80xf32>
    %25 = arith.select %22, %23, %24 : vector<80x80xi1>, vector<80x80xf32>
    %26 = tpu.iota {dimensions = array<i32: 0>} : vector<16x80xi32>
    %27 = tpu.iota {dimensions = array<i32: 1>} : vector<16x80xi32>
    %28 = arith.sitofp %27 : vector<16x80xi32> to vector<16x80xf32>
    %cst_9 = arith.constant 2.000000e-01 : f32
    %29 = vector.broadcast %cst_9 : f32 to vector<16x80xf32>
    %30 = arith.mulf %28, %29 : vector<16x80xf32>
    %31 = arith.fptosi %30 : vector<16x80xf32> to vector<16x80xi32>
    %32 = arith.cmpi eq, %26, %31 : vector<16x80xi32>
    %cst_10 = arith.constant 2.000000e-01 : f32
    %cst_11 = arith.constant 0.000000e+00 : f32
    %33 = vector.broadcast %cst_10 : f32 to vector<16x80xf32>
    %34 = vector.broadcast %cst_11 : f32 to vector<16x80xf32>
    %35 = arith.select %32, %33, %34 : vector<16x80xi1>, vector<16x80xf32>
    %c0_12 = arith.constant 0 : index
    %c0_13 = arith.constant 0 : index
    %36 = vector.load %arg2[%c0_12, %c0_13] : memref<32x96xf32, #tpu.memory_space<vmem>>, vector<32x96xf32>
    %cst_14 = arith.constant dense<0.000000e+00> : vector<80x96xf32>
    %37 = tpu.matmul %1, %36, %cst_14 {dimension_numbers = #tpu.dot_dimension_numbers<[1], [0], [0], [1], [0, 0, 1, 1], [], []>} : vector<80x32xf32>, vector<32x96xf32>, vector<80x96xf32> -> vector<80x96xf32>
    %c0_15 = arith.constant 0 : index
    %c0_16 = arith.constant 0 : index
    %38 = vector.load %arg3[%c0_15, %c0_16] : memref<1x96xf32, #tpu.memory_space<vmem>>, vector<1x96xf32>
    %39 = vector.broadcast %38 : vector<1x96xf32> to vector<80x96xf32>
    %40 = arith.addf %37, %39 : vector<80x96xf32>
    %41 = vector.extract_strided_slice %40 {offsets = [0, 0], sizes = [80, 8], strides = [1, 1]} : vector<80x96xf32> to vector<80x8xf32>
    %42 = vector.extract_strided_slice %40 {offsets = [0, 8], sizes = [80, 8], strides = [1, 1]} : vector<80x96xf32> to vector<80x8xf32>
    %43 = vector.extract_strided_slice %40 {offsets = [0, 16], sizes = [80, 8], strides = [1, 1]} : vector<80x96xf32> to vector<80x8xf32>
    %44 = vector.extract_strided_slice %40 {offsets = [0, 24], sizes = [80, 8], strides = [1, 1]} : vector<80x96xf32> to vector<80x8xf32>
    %45 = vector.extract_strided_slice %40 {offsets = [0, 32], sizes = [80, 8], strides = [1, 1]} : vector<80x96xf32> to vector<80x8xf32>
    %46 = vector.extract_strided_slice %40 {offsets = [0, 40], sizes = [80, 8], strides = [1, 1]} : vector<80x96xf32> to vector<80x8xf32>
    %47 = vector.extract_strided_slice %40 {offsets = [0, 48], sizes = [80, 8], strides = [1, 1]} : vector<80x96xf32> to vector<80x8xf32>
    %48 = vector.extract_strided_slice %40 {offsets = [0, 56], sizes = [80, 8], strides = [1, 1]} : vector<80x96xf32> to vector<80x8xf32>
    %49 = vector.extract_strided_slice %40 {offsets = [0, 64], sizes = [80, 8], strides = [1, 1]} : vector<80x96xf32> to vector<80x8xf32>
    %50 = vector.extract_strided_slice %40 {offsets = [0, 72], sizes = [80, 8], strides = [1, 1]} : vector<80x96xf32> to vector<80x8xf32>
    %51 = vector.extract_strided_slice %40 {offsets = [0, 80], sizes = [80, 8], strides = [1, 1]} : vector<80x96xf32> to vector<80x8xf32>
    %52 = vector.extract_strided_slice %40 {offsets = [0, 88], sizes = [80, 8], strides = [1, 1]} : vector<80x96xf32> to vector<80x8xf32>
    %53 = vector.shape_cast %41 : vector<80x8xf32> to vector<1x80x8xf32>
    %54 = vector.shape_cast %42 : vector<80x8xf32> to vector<1x80x8xf32>
    %55 = vector.shape_cast %43 : vector<80x8xf32> to vector<1x80x8xf32>
    %56 = vector.shape_cast %44 : vector<80x8xf32> to vector<1x80x8xf32>
    %57 = vector.shape_cast %45 : vector<80x8xf32> to vector<1x80x8xf32>
    %58 = vector.shape_cast %46 : vector<80x8xf32> to vector<1x80x8xf32>
    %59 = vector.shape_cast %47 : vector<80x8xf32> to vector<1x80x8xf32>
    %60 = vector.shape_cast %48 : vector<80x8xf32> to vector<1x80x8xf32>
    %61 = vector.shape_cast %49 : vector<80x8xf32> to vector<1x80x8xf32>
    %62 = vector.shape_cast %50 : vector<80x8xf32> to vector<1x80x8xf32>
    %63 = vector.shape_cast %51 : vector<80x8xf32> to vector<1x80x8xf32>
    %64 = vector.shape_cast %52 : vector<80x8xf32> to vector<1x80x8xf32>
    %65 = tpu.concatenate %53, %54, %55, %56, %57, %58, %59, %60, %61, %62, %63, %64 in 0 : vector<1x80x8xf32>, vector<1x80x8xf32>, vector<1x80x8xf32>, vector<1x80x8xf32>, vector<1x80x8xf32>, vector<1x80x8xf32>, vector<1x80x8xf32>, vector<1x80x8xf32>, vector<1x80x8xf32>, vector<1x80x8xf32>, vector<1x80x8xf32>, vector<1x80x8xf32> -> vector<12x80x8xf32>
    %66 = vector.extract_strided_slice %65 {offsets = [0, 0, 0], sizes = [4, 80, 8], strides = [1, 1, 1]} : vector<12x80x8xf32> to vector<4x80x8xf32>
    %67 = vector.extract_strided_slice %65 {offsets = [4, 0, 0], sizes = [4, 80, 8], strides = [1, 1, 1]} : vector<12x80x8xf32> to vector<4x80x8xf32>
    %68 = vector.extract_strided_slice %65 {offsets = [8, 0, 0], sizes = [4, 80, 8], strides = [1, 1, 1]} : vector<12x80x8xf32> to vector<4x80x8xf32>
    "tpu.trace_start"() <{level = 10 : i32, message = "hrd,hsd->hrs"}> : () -> ()
    %cst_17 = arith.constant dense<0.000000e+00> : vector<4x80x80xf32>
    %69 = tpu.matmul %66, %67, %cst_17 {dimension_numbers = #tpu.dot_dimension_numbers<[2], [2], [1], [1], [0, 0, 0, 1, 1, 1], [0], [0]>} : vector<4x80x8xf32>, vector<4x80x8xf32>, vector<4x80x80xf32> -> vector<4x80x80xf32>
    "tpu.trace_stop"() : () -> ()
    %70 = vector.shape_cast %15 : vector<80x80xf32> to vector<1x80x80xf32>
    %71 = vector.broadcast %70 : vector<1x80x80xf32> to vector<4x80x80xf32>
    %72 = arith.addf %69, %71 : vector<4x80x80xf32>
    %cst_18 = arith.constant dense<0xFF800000> : vector<4x80xf32>
    %73 = vector.multi_reduction <maximumf>, %72, %cst_18 [2] : vector<4x80x80xf32> to vector<4x80xf32>
    %74 = vector.shape_cast %73 : vector<4x80xf32> to vector<4x80x1xf32>
    %75 = vector.broadcast %74 : vector<4x80x1xf32> to vector<4x80x80xf32>
    %76 = arith.subf %72, %75 : vector<4x80x80xf32>
    %77 = math.exp %76 : vector<4x80x80xf32>
    %cst_19 = arith.constant dense<0.000000e+00> : vector<4x80xf32>
    %78 = vector.multi_reduction <add>, %77, %cst_19 [2] : vector<4x80x80xf32> to vector<4x80xf32>
    %79 = vector.shape_cast %78 : vector<4x80xf32> to vector<4x80x1xf32>
    %80 = tpu.reciprocal %79 {approx = true} : vector<4x80x1xf32> -> vector<4x80x1xf32>
    %81 = arith.mulf %79, %80 : vector<4x80x1xf32>
    %cst_20 = arith.constant 2.000000e+00 : f32
    %82 = vector.broadcast %cst_20 : f32 to vector<4x80x1xf32>
    %83 = arith.subf %82, %81 : vector<4x80x1xf32>
    %84 = arith.mulf %80, %83 : vector<4x80x1xf32>
    %85 = vector.broadcast %84 : vector<4x80x1xf32> to vector<4x80x80xf32>
    %86 = arith.mulf %77, %85 : vector<4x80x80xf32>
    "tpu.trace_start"() <{level = 10 : i32, message = "hrs,hsd->hrd"}> : () -> ()
    %cst_21 = arith.constant dense<0.000000e+00> : vector<4x80x8xf32>
    %87 = tpu.matmul %86, %68, %cst_21 {dimension_numbers = #tpu.dot_dimension_numbers<[2], [1], [1], [2], [0, 0, 0, 1, 1, 2], [0], [0]>} : vector<4x80x80xf32>, vector<4x80x8xf32>, vector<4x80x8xf32> -> vector<4x80x8xf32>
    "tpu.trace_stop"() : () -> ()
    %c0_22 = arith.constant 0 : index
    %c0_23 = arith.constant 0 : index
    %c0_24 = arith.constant 0 : index
    %88 = vector.load %arg4[%c0_22, %c0_23, %c0_24] : memref<4x8x32xf32, #tpu.memory_space<vmem>>, vector<4x8x32xf32>
    "tpu.trace_start"() <{level = 10 : i32, message = "hrd,hdg->hrg"}> : () -> ()
    %cst_25 = arith.constant dense<0.000000e+00> : vector<4x80x32xf32>
    %89 = tpu.matmul %87, %88, %cst_25 {dimension_numbers = #tpu.dot_dimension_numbers<[2], [1], [1], [2], [0, 0, 0, 1, 1, 2], [0], [0]>} : vector<4x80x8xf32>, vector<4x8x32xf32>, vector<4x80x32xf32> -> vector<4x80x32xf32>
    "tpu.trace_stop"() : () -> ()
    %90 = vector.extract_strided_slice %89 {offsets = [0, 0, 0], sizes = [1, 80, 32], strides = [1, 1, 1]} : vector<4x80x32xf32> to vector<1x80x32xf32>
    %91 = vector.shape_cast %90 : vector<1x80x32xf32> to vector<80x32xf32>
    %92 = vector.extract_strided_slice %89 {offsets = [1, 0, 0], sizes = [1, 80, 32], strides = [1, 1, 1]} : vector<4x80x32xf32> to vector<1x80x32xf32>
    %93 = vector.shape_cast %92 : vector<1x80x32xf32> to vector<80x32xf32>
    %94 = arith.addf %91, %93 : vector<80x32xf32>
    %95 = vector.extract_strided_slice %89 {offsets = [2, 0, 0], sizes = [1, 80, 32], strides = [1, 1, 1]} : vector<4x80x32xf32> to vector<1x80x32xf32>
    %96 = vector.shape_cast %95 : vector<1x80x32xf32> to vector<80x32xf32>
    %97 = arith.addf %94, %96 : vector<80x32xf32>
    %98 = vector.extract_strided_slice %89 {offsets = [3, 0, 0], sizes = [1, 80, 32], strides = [1, 1, 1]} : vector<4x80x32xf32> to vector<1x80x32xf32>
    %99 = vector.shape_cast %98 : vector<1x80x32xf32> to vector<80x32xf32>
    %100 = arith.addf %97, %99 : vector<80x32xf32>
    %c0_26 = arith.constant 0 : index
    %c0_27 = arith.constant 0 : index
    %101 = vector.load %arg5[%c0_26, %c0_27] : memref<1x32xf32, #tpu.memory_space<vmem>>, vector<1x32xf32>
    %102 = vector.broadcast %101 : vector<1x32xf32> to vector<80x32xf32>
    %103 = arith.addf %100, %102 : vector<80x32xf32>
    %104 = arith.addf %103, %1 : vector<80x32xf32>
    %cst_28 = arith.constant dense<0.000000e+00> : vector<80x32xf32>
    %105 = tpu.matmul %25, %104, %cst_28 {dimension_numbers = #tpu.dot_dimension_numbers<[1], [0], [0], [1], [0, 0, 1, 1], [], []>} : vector<80x80xf32>, vector<80x32xf32>, vector<80x32xf32> -> vector<80x32xf32>
    %cst_29 = arith.constant dense<0.000000e+00> : vector<80xf32>
    %106 = vector.multi_reduction <add>, %105, %cst_29 [1] : vector<80x32xf32> to vector<80xf32>
    %107 = vector.shape_cast %106 : vector<80xf32> to vector<80x1xf32>
    %108 = vector.broadcast %107 : vector<80x1xf32> to vector<80x32xf32>
    %109 = arith.subf %104, %108 : vector<80x32xf32>
    %110 = arith.mulf %109, %109 : vector<80x32xf32>
    %cst_30 = arith.constant dense<0.000000e+00> : vector<80x32xf32>
    %111 = tpu.matmul %25, %110, %cst_30 {dimension_numbers = #tpu.dot_dimension_numbers<[1], [0], [0], [1], [0, 0, 1, 1], [], []>} : vector<80x80xf32>, vector<80x32xf32>, vector<80x32xf32> -> vector<80x32xf32>
    %cst_31 = arith.constant dense<0.000000e+00> : vector<80xf32>
    %112 = vector.multi_reduction <add>, %111, %cst_31 [1] : vector<80x32xf32> to vector<80xf32>
    %113 = vector.shape_cast %112 : vector<80xf32> to vector<80x1xf32>
    %cst_32 = arith.constant 9.99999974E-6 : f32
    %114 = vector.broadcast %cst_32 : f32 to vector<80x1xf32>
    %115 = arith.addf %113, %114 : vector<80x1xf32>
    %116 = math.rsqrt %115 : vector<80x1xf32>
    %cst_33 = arith.constant 5.000000e-01 : f32
    %117 = vector.broadcast %cst_33 : f32 to vector<80x1xf32>
    %118 = arith.mulf %117, %115 : vector<80x1xf32>
    %119 = arith.mulf %118, %116 : vector<80x1xf32>
    %120 = arith.mulf %119, %116 : vector<80x1xf32>
    %cst_34 = arith.constant 1.500000e+00 : f32
    %121 = vector.broadcast %cst_34 : f32 to vector<80x1xf32>
    %122 = arith.subf %121, %120 : vector<80x1xf32>
    %123 = arith.mulf %116, %122 : vector<80x1xf32>
    %124 = vector.broadcast %123 : vector<80x1xf32> to vector<80x32xf32>
    %125 = arith.mulf %109, %124 : vector<80x32xf32>
    %c0_35 = arith.constant 0 : index
    %c0_36 = arith.constant 0 : index
    %126 = vector.load %arg6[%c0_35, %c0_36] : memref<80x32xf32, #tpu.memory_space<vmem>>, vector<80x32xf32>
    %127 = arith.mulf %125, %126 : vector<80x32xf32>
    %c0_37 = arith.constant 0 : index
    %c0_38 = arith.constant 0 : index
    %128 = vector.load %arg7[%c0_37, %c0_38] : memref<80x32xf32, #tpu.memory_space<vmem>>, vector<80x32xf32>
    %129 = arith.addf %127, %128 : vector<80x32xf32>
    %c0_39 = arith.constant 0 : index
    %c0_40 = arith.constant 0 : index
    %130 = vector.load %arg8[%c0_39, %c0_40] : memref<32x64xf32, #tpu.memory_space<vmem>>, vector<32x64xf32>
    %cst_41 = arith.constant dense<0.000000e+00> : vector<80x64xf32>
    %131 = tpu.matmul %129, %130, %cst_41 {dimension_numbers = #tpu.dot_dimension_numbers<[1], [0], [0], [1], [0, 0, 1, 1], [], []>} : vector<80x32xf32>, vector<32x64xf32>, vector<80x64xf32> -> vector<80x64xf32>
    %c0_42 = arith.constant 0 : index
    %c0_43 = arith.constant 0 : index
    %132 = vector.load %arg9[%c0_42, %c0_43] : memref<1x64xf32, #tpu.memory_space<vmem>>, vector<1x64xf32>
    %133 = vector.broadcast %132 : vector<1x64xf32> to vector<80x64xf32>
    %134 = arith.addf %131, %133 : vector<80x64xf32>
    %cst_44 = arith.constant 0.000000e+00 : f32
    %135 = vector.broadcast %cst_44 : f32 to vector<80x64xf32>
    %136 = arith.maximumf %134, %135 : vector<80x64xf32>
    %c0_45 = arith.constant 0 : index
    %c0_46 = arith.constant 0 : index
    %137 = vector.load %arg10[%c0_45, %c0_46] : memref<64x32xf32, #tpu.memory_space<vmem>>, vector<64x32xf32>
    %cst_47 = arith.constant dense<0.000000e+00> : vector<80x32xf32>
    %138 = tpu.matmul %136, %137, %cst_47 {dimension_numbers = #tpu.dot_dimension_numbers<[1], [0], [0], [1], [0, 0, 1, 1], [], []>} : vector<80x64xf32>, vector<64x32xf32>, vector<80x32xf32> -> vector<80x32xf32>
    %c0_48 = arith.constant 0 : index
    %c0_49 = arith.constant 0 : index
    %139 = vector.load %arg11[%c0_48, %c0_49] : memref<1x32xf32, #tpu.memory_space<vmem>>, vector<1x32xf32>
    %140 = vector.broadcast %139 : vector<1x32xf32> to vector<80x32xf32>
    %141 = arith.addf %138, %140 : vector<80x32xf32>
    %142 = arith.addf %129, %141 : vector<80x32xf32>
    %cst_50 = arith.constant dense<0.000000e+00> : vector<80x32xf32>
    %143 = tpu.matmul %25, %142, %cst_50 {dimension_numbers = #tpu.dot_dimension_numbers<[1], [0], [0], [1], [0, 0, 1, 1], [], []>} : vector<80x80xf32>, vector<80x32xf32>, vector<80x32xf32> -> vector<80x32xf32>
    %cst_51 = arith.constant dense<0.000000e+00> : vector<80xf32>
    %144 = vector.multi_reduction <add>, %143, %cst_51 [1] : vector<80x32xf32> to vector<80xf32>
    %145 = vector.shape_cast %144 : vector<80xf32> to vector<80x1xf32>
    %146 = vector.broadcast %145 : vector<80x1xf32> to vector<80x32xf32>
    %147 = arith.subf %142, %146 : vector<80x32xf32>
    %148 = arith.mulf %147, %147 : vector<80x32xf32>
    %cst_52 = arith.constant dense<0.000000e+00> : vector<80x32xf32>
    %149 = tpu.matmul %25, %148, %cst_52 {dimension_numbers = #tpu.dot_dimension_numbers<[1], [0], [0], [1], [0, 0, 1, 1], [], []>} : vector<80x80xf32>, vector<80x32xf32>, vector<80x32xf32> -> vector<80x32xf32>
    %cst_53 = arith.constant dense<0.000000e+00> : vector<80xf32>
    %150 = vector.multi_reduction <add>, %149, %cst_53 [1] : vector<80x32xf32> to vector<80xf32>
    %151 = vector.shape_cast %150 : vector<80xf32> to vector<80x1xf32>
    %cst_54 = arith.constant 9.99999974E-6 : f32
    %152 = vector.broadcast %cst_54 : f32 to vector<80x1xf32>
    %153 = arith.addf %151, %152 : vector<80x1xf32>
    %154 = math.rsqrt %153 : vector<80x1xf32>
    %cst_55 = arith.constant 5.000000e-01 : f32
    %155 = vector.broadcast %cst_55 : f32 to vector<80x1xf32>
    %156 = arith.mulf %155, %153 : vector<80x1xf32>
    %157 = arith.mulf %156, %154 : vector<80x1xf32>
    %158 = arith.mulf %157, %154 : vector<80x1xf32>
    %cst_56 = arith.constant 1.500000e+00 : f32
    %159 = vector.broadcast %cst_56 : f32 to vector<80x1xf32>
    %160 = arith.subf %159, %158 : vector<80x1xf32>
    %161 = arith.mulf %154, %160 : vector<80x1xf32>
    %162 = vector.broadcast %161 : vector<80x1xf32> to vector<80x32xf32>
    %163 = arith.mulf %147, %162 : vector<80x32xf32>
    %c0_57 = arith.constant 0 : index
    %c0_58 = arith.constant 0 : index
    %164 = vector.load %arg12[%c0_57, %c0_58] : memref<80x32xf32, #tpu.memory_space<vmem>>, vector<80x32xf32>
    %165 = arith.mulf %163, %164 : vector<80x32xf32>
    %c0_59 = arith.constant 0 : index
    %c0_60 = arith.constant 0 : index
    %166 = vector.load %arg13[%c0_59, %c0_60] : memref<80x32xf32, #tpu.memory_space<vmem>>, vector<80x32xf32>
    %167 = arith.addf %165, %166 : vector<80x32xf32>
    %cst_61 = arith.constant dense<0.000000e+00> : vector<16x32xf32>
    %168 = tpu.matmul %35, %167, %cst_61 {dimension_numbers = #tpu.dot_dimension_numbers<[1], [0], [0], [1], [0, 0, 1, 1], [], []>} : vector<16x80xf32>, vector<80x32xf32>, vector<16x32xf32> -> vector<16x32xf32>
    %c0_62 = arith.constant 0 : index
    %c0_63 = arith.constant 0 : index
    %c0_64 = arith.constant 0 : index
    %169 = vector.load %arg14[%c0_62, %c0_63, %c0_64] : memref<1x16x32xf32, #tpu.memory_space<vmem>>, vector<1x16x32xf32>
    %170 = vector.shape_cast %169 : vector<1x16x32xf32> to vector<16x32xf32>
    %171 = vector.shape_cast %168 : vector<16x32xf32> to vector<1x16x32xf32>
    tpu.vector_store %arg14[%c0_62, %c0_63, %c0_64], %171 {strides = array<i32>} : memref<1x16x32xf32, #tpu.memory_space<vmem>>, vector<1x16x32xf32>,
    return
  }
  func.func @transform_0(%arg0: i32) -> (i32, i32, i32) {
    %c0_i32 = arith.constant 0 : i32
    %c0_i32_0 = arith.constant 0 : i32
    %c0_i32_1 = arith.constant 0 : i32
    return %arg0, %c0_i32, %c0_i32_0 : i32, i32, i32
  }
  func.func @transform_1(%arg0: i32) -> (i32, i32) {
    %c0_i32 = arith.constant 0 : i32
    %c0_i32_0 = arith.constant 0 : i32
    %c0_i32_1 = arith.constant 0 : i32
    return %c0_i32, %c0_i32_0 : i32, i32
  }
  func.func @transform_2(%arg0: i32) -> (i32, i32) {
    %c0_i32 = arith.constant 0 : i32
    %c0_i32_0 = arith.constant 0 : i32
    %c0_i32_1 = arith.constant 0 : i32
    return %c0_i32, %c0_i32_0 : i32, i32
  }
  func.func @transform_3(%arg0: i32) -> (i32, i32, i32) {
    %c0_i32 = arith.constant 0 : i32
    %c0_i32_0 = arith.constant 0 : i32
    %c0_i32_1 = arith.constant 0 : i32
    %c0_i32_2 = arith.constant 0 : i32
    return %c0_i32, %c0_i32_0, %c0_i32_1 : i32, i32, i32
  }
  func.func @transform_4(%arg0: i32) -> (i32, i32) {
    %c0_i32 = arith.constant 0 : i32
    %c0_i32_0 = arith.constant 0 : i32
    %c0_i32_1 = arith.constant 0 : i32
    return %c0_i32, %c0_i32_0 : i32, i32
  }
  func.func @transform_5(%arg0: i32) -> (i32, i32) {
    %c0_i32 = arith.constant 0 : i32
    %c0_i32_0 = arith.constant 0 : i32
    %c0_i32_1 = arith.constant 0 : i32
    return %c0_i32, %c0_i32_0 : i32, i32
  }
  func.func @transform_6(%arg0: i32) -> (i32, i32) {
    %c0_i32 = arith.constant 0 : i32
    %c0_i32_0 = arith.constant 0 : i32
    %c0_i32_1 = arith.constant 0 : i32
    return %c0_i32, %c0_i32_0 : i32, i32
  }
  func.func @transform_7(%arg0: i32) -> (i32, i32) {
    %c0_i32 = arith.constant 0 : i32
    %c0_i32_0 = arith.constant 0 : i32
    %c0_i32_1 = arith.constant 0 : i32
    return %c0_i32, %c0_i32_0 : i32, i32
  }
  func.func @transform_8(%arg0: i32) -> (i32, i32) {
    %c0_i32 = arith.constant 0 : i32
    %c0_i32_0 = arith.constant 0 : i32
    %c0_i32_1 = arith.constant 0 : i32
    return %c0_i32, %c0_i32_0 : i32, i32
  }
  func.func @transform_9(%arg0: i32) -> (i32, i32) {
    %c0_i32 = arith.constant 0 : i32
    %c0_i32_0 = arith.constant 0 : i32
    %c0_i32_1 = arith.constant 0 : i32
    return %c0_i32, %c0_i32_0 : i32, i32
  }
  func.func @transform_10(%arg0: i32) -> (i32, i32) {
    %c0_i32 = arith.constant 0 : i32
    %c0_i32_0 = arith.constant 0 : i32
    %c0_i32_1 = arith.constant 0 : i32
    return %c0_i32, %c0_i32_0 : i32, i32
  }
  func.func @transform_11(%arg0: i32) -> (i32, i32) {
    %c0_i32 = arith.constant 0 : i32
    %c0_i32_0 = arith.constant 0 : i32
    %c0_i32_1 = arith.constant 0 : i32
    return %c0_i32, %c0_i32_0 : i32, i32
  }
  func.func @transform_12(%arg0: i32) -> (i32, i32) {
    %c0_i32 = arith.constant 0 : i32
    %c0_i32_0 = arith.constant 0 : i32
    %c0_i32_1 = arith.constant 0 : i32
    return %c0_i32, %c0_i32_0 : i32, i32
  }
  func.func @transform_13(%arg0: i32) -> (i32, i32, i32) {
    %c0_i32 = arith.constant 0 : i32
    %c0_i32_0 = arith.constant 0 : i32
    %c0_i32_1 = arith.constant 0 : i32
    return %arg0, %c0_i32, %c0_i32_0 : i32, i32, i32
  }
}

</mosaic_0001>

<bundles_post_ra>
// kernel: _lambda_.1
= control target key start
LH: loop header
LB: loop body
LE: loop exit
PB: predicated region body
PF: predicated region fallthrough
CT: control target
= control target key end

     0   :  { %s5986_s0 = inlined_call_operand.vmem [shape: f32[1,80,32], index: 0, kind: input, shape index: {}]   ;;  %s5987_s1 = inlined_call_operand.vmem [shape: f32[32,96], index: 1, kind: input, shape index: {}]   ;;  %s5988_s2 = inlined_call_operand.vmem [shape: f32[1,96], index: 2, kind: input, shape index: {}]   ;;  %s5989_s3 = inlined_call_operand.vmem [shape: f32[4,8,32], index: 3, kind: input, shape index: {}]   ;;  %s5990_s4 = inlined_call_operand.vmem [shape: f32[1,32], index: 4, kind: input, shape index: {}]   ;;  %s5991_s5 = inlined_call_operand.vmem [shape: f32[80,32], index: 5, kind: input, shape index: {}, may-alias: {5,11}]   ;;  %s5992_s6 = inlined_call_operand.vmem [shape: f32[80,32], index: 6, kind: input, shape index: {}, may-alias: {6,12}]   ;;  %s5993_s7 = inlined_call_operand.vmem [shape: f32[32,64], index: 7, kind: input, shape index: {}]   ;;  %s5994_s8 = inlined_call_operand.vmem [shape: f32[1,64], index: 8, kind: input, shape index: {}]   ;;  %s5995_s9 = inlined_call_operand.vmem [shape: f32[64,32], index: 9, kind: input, shape index: {}]   ;;  %s5996_s10 = inlined_call_operand.vmem [shape: f32[1,32], index: 10, kind: input, shape index: {}]   ;;  %s5997_s11 = inlined_call_operand.vmem [shape: f32[80,32], index: 11, kind: input, shape index: {}, may-alias: {5,11}]   ;;  %s5998_s12 = inlined_call_operand.vmem [shape: f32[80,32], index: 12, kind: input, shape index: {}, may-alias: {6,12}]   ;;  %s5999_s13 = inlined_call_operand.hbm [shape: f32[1,16,32], index: 13, kind: output, shape index: {}]  }
   0x1   :  { %v170_v0 = vld [vmem:[%s5987_s1 + $0x18] sm:$0xff]  ;;  %v169_v1 = vld [vmem:[%s5987_s1 + $0x10] sm:$0xff]  ;;  %v168_v2 = vld [vmem:[%s5987_s1 + $0x8] sm:$0xff] }
   0x2   :  { %218 = vmatpush.msra.mxu0 %v170_v0  ;;  %v167_v3 = vld [vmem:[%s5987_s1] sm:$0xff] }
   0x4   :  { %219 = vmatpush.msra.mxu0 %v169_v1 }
   0x5   :  { %18 = vsyncpa [#allocation3], 0  ;;  %v45_v4 = vld [vmem:[%s5986_s0] sm:$0xff]  ;;  %vm175_vm0 = vcmask 261120   ;;  %v46_v5 = vld [vmem:[%s5986_s0 + $0x8] sm:$0xff]  ;;  %s3868_s20 = smov 88  }
   0x6   :  { %220 = vmatpush.msra.mxu0 %v168_v2  ;;  %v47_v6 = vld [vmem:[%s5986_s0 + $0x10] sm:$0xff]  ;;  %v48_v7 = vld [vmem:[%s5986_s0 + $0x18] sm:$0xff]  ;;  %v49_v8 = vld [vmem:[%s5986_s0 + $0x20] sm:$0xff]  ;;  %s3869_s21 = smov 96   ;;  %s3870_s1 = smov 120   ;;  %vm523_vm1 = vcmask 64512  }
   0x7   :  { %v50_v9 = vld [vmem:[%s5986_s0 + $0x28] sm:$0xff]  ;;  %v51_v10 = vld [vmem:[%s5986_s0 + $0x30] sm:$0xff]  ;;  %v52_v11 = vld [vmem:[%s5986_s0 + $0x38] sm:$0xff]  ;;  %s3872_s22 = smov 72   ;;  %s3873_s23 = smov 112   ;;  %vm872_vm5 = vcmask 654336  }
   0x8   :  { %221 = vmatpush.msra.mxu0 %v167_v3  ;;  %v53_v12 = vld [vmem:[%s5986_s0 + $0x40] sm:$0xff]  ;;  %v54_v13 = vld [vmem:[%s5986_s0 + $0x48] sm:$0xff]  ;;  %s3874_s24 = smov 104   ;;  %s3875_s25 = smov 64  }
   0x9   :  { %3149 = vmatmul.msk.f32.vlgmr.msra.gmra.mxu0 %vm175_vm0, %v45_v4  ;;  %v3628_v14 = vld [vmem:[%s5988_s2] ss:$0 sm:$0xff]  ;;  %s3871_s2 = smov 80   ;;  %s3876_s26 = smov 56  }
   0xa   :  { %s3877_s27 = smov 48   ;;  %s3878_s28 = smov 40  }
  0x11   :  { %3150 = vmatmul.msk.f32.gmra.mxu0 %vm175_vm0, %v46_v5 }
  0x19   :  { %3151 = vmatmul.msk.f32.gmra.mxu0 %vm175_vm0, %v47_v6 }
  0x21   :  { %3152 = vmatmul.msk.f32.gmra.mxu0 %vm175_vm0, %v48_v7 }
  0x29   :  { %3153 = vmatmul.msk.f32.gmra.mxu0 %vm175_vm0, %v49_v8 }
  0x31   :  { %3154 = vmatmul.msk.f32.gmra.mxu0 %vm175_vm0, %v50_v9 }
  0x39   :  { %3155 = vmatmul.msk.f32.gmra.mxu0 %vm175_vm0, %v51_v10 }
  0x41   :  { %3156 = vmatmul.msk.f32.gmra.mxu0 %vm175_vm0, %v52_v11 }
  0x49   :  { %3157 = vmatmul.msk.f32.gmra.mxu0 %vm175_vm0, %v53_v12 }
  0x51   :  { %3158 = vmatmul.msk.f32.gmra.mxu0 %vm175_vm0, %v54_v13 }
  0x86   :  { %v223_v15 = vpop.f32.mrf.mxu0 }
  0x87   :  { %v4009_v16 = vadd.f32 %v3628_v14, %v223_v15 }
  0x89   :  { %343 = vrot.lane.b32.xlu1 %v4009_v16, %s3868_s20  ;;  %323 = vrot.lane.b32.xlu2 %v4009_v16, %s3869_s21 }
  0x8e   :  { %v226_v17 = vpop.f32.mrf.mxu0 }
  0x8f   :  { %v4015_v18 = vadd.f32 %v3628_v14, %v226_v17 }
  0x91   :  { %325 = vrot.lane.b32.xlu0 %v4015_v18, %s3869_s21  ;;  %263 = vrot.lane.b32.xlu2 %v4009_v16, %s3870_s1  ;;  %v4226_v4 = vpack.i.bf16 %v4009_v16, %v4015_v18 }
  0x96   :  { %v229_v19 = vpop.f32.mrf.mxu0 }
  0x97   :  { %v4021_v20 = vadd.f32 %v3628_v14, %v229_v19 }
  0x99   :  { %345 = vrot.lane.b32.xlu0 %v4015_v18, %s3868_s20  ;;  %327 = vrot.lane.b32.xlu1 %v4021_v20, %s3869_s21 }
  0x9a   :  { %347 = vrot.lane.b32.xlu2 %v4021_v20, %s3868_s20 }
  0x9e   :  { %v232_v21 = vpop.f32.mrf.mxu0 }
  0x9f   :  { %v4029_v22 = vadd.f32 %v3628_v14, %v232_v21 }
  0xa1   :  { %265 = vrot.lane.b32.xlu0 %v4015_v18, %s3870_s1  ;;  %267 = vrot.lane.b32.xlu1 %v4021_v20, %s3870_s1  ;;  %v4248_v9 = vpack.i.bf16 %v4021_v20, %v4029_v22 }
  0xa2   :  { %329 = vrot.lane.b32.xlu2 %v4029_v22, %s3869_s21 }
  0xa6   :  { %v235_v23 = vpop.f32.mrf.mxu0 }
  0xa7   :  { %v4037_v24 = vadd.f32 %v3628_v14, %v235_v23 }
  0xa9   :  { %331 = vrot.lane.b32.xlu0 %v4037_v24, %s3869_s21  ;;  %349 = vrot.lane.b32.xlu1 %v4029_v22, %s3868_s20 }
  0xaa   :  { %269 = vrot.lane.b32.xlu2 %v4029_v22, %s3870_s1 }
  0xae   :  { %v238_v25 = vpop.f32.mrf.mxu0 }
  0xaf   :  { %v4045_v26 = vadd.f32 %v3628_v14, %v238_v25 }
  0xb1   :  { %351 = vrot.lane.b32.xlu0 %v4037_v24, %s3868_s20  ;;  %353 = vrot.lane.b32.xlu1 %v4045_v26, %s3868_s20  ;;  %v4232_v5 = vpack.i.bf16 %v4037_v24, %v4045_v26 }
  0xb2   :  { %333 = vrot.lane.b32.xlu2 %v4045_v26, %s3869_s21 }
  0xb6   :  { %v241_v27 = vpop.f32.mrf.mxu0 }
  0xb7   :  { %v4053_v28 = vadd.f32 %v3628_v14, %v241_v27 }
  0xb9   :  { %271 = vrot.lane.b32.xlu0 %v4037_v24, %s3870_s1  ;;  %273 = vrot.lane.b32.xlu1 %v4045_v26, %s3870_s1 }
  0xba   :  { %355 = vrot.lane.b32.xlu2 %v4053_v28, %s3868_s20 }
  0xbe   :  { %v244_v29 = vpop.f32.mrf.mxu0 }
  0xbf   :  { %v4061_v30 = vadd.f32 %v3628_v14, %v244_v29 }
  0xc1   :  { %357 = vrot.lane.b32.xlu0 %v4061_v30, %s3868_s20  ;;  %335 = vrot.lane.b32.xlu1 %v4053_v28, %s3869_s21  ;;  %v4192_v58 = vpack.i.bf16 %v4053_v28, %v4061_v30 }
  0xc6   :  { %v247_v31 = vpop.f32.mrf.mxu0 }
  0xc7   :  { %v4067_v32 = vadd.f32 %v3628_v14, %v247_v31 }
  0xc9   :  { %339 = vrot.lane.b32.xlu0 %v4067_v32, %s3869_s21  ;;  %275 = vrot.lane.b32.xlu1 %v4053_v28, %s3870_s1 }
  0xce   :  { %v250_v33 = vpop.f32.mrf.mxu0 }
  0xcf   :  { %v4073_v34 = vadd.f32 %v3628_v14, %v250_v33 }
  0xd1   :  { %379 = vrot.lane.b32.xlu0 %v4067_v32, %s3871_s2  ;;  %337 = vrot.lane.b32.xlu1 %v4061_v30, %s3869_s21  ;;  %v3538_v10 = vpack.i.bf16 %v4067_v32, %v4073_v34 }
  0xd2   :  { %361 = vrot.lane.b32.xlu2 %v4073_v34, %s3868_s20 }
  0xd9   :  { %341 = vrot.lane.b32.xlu0 %v4073_v34, %s3869_s21  ;;  %359 = vrot.lane.b32.xlu1 %v4067_v32, %s3868_s20 }
  0xda   :  { %377 = vrot.lane.b32.xlu2 %v4061_v30, %s3871_s2 }
  0xe1   :  { %375 = vrot.lane.b32.xlu0 %v4053_v28, %s3871_s2  ;;  %277 = vrot.lane.b32.xlu1 %v4061_v30, %s3870_s1 }
  0xe2   :  { %373 = vrot.lane.b32.xlu2 %v4045_v26, %s3871_s2 }
  0xe3   :  { %v4097_v35 = vpop.permute.xlu2 %323 }
  0xe9   :  { %371 = vrot.lane.b32.xlu0 %v4037_v24, %s3871_s2  ;;  %399 = vrot.lane.b32.xlu1 %v4067_v32, %s3872_s22 }
  0xea   :  { %279 = vrot.lane.b32.xlu2 %v4067_v32, %s3870_s1 }
  0xeb   :  { %v4107_v36 = vpop.permute.xlu2 %263 }
  0xf1   :  { %369 = vrot.lane.b32.xlu0 %v4029_v22, %s3871_s2  ;;  %363 = vrot.lane.b32.xlu1 %v4009_v16, %s3871_s2 }
  0xf2   :  { %367 = vrot.lane.b32.xlu2 %v4021_v20, %s3871_s2 }
  0xf4   :  { %v4115_v37 = vpop.permute.xlu2 %347 }
  0xf9   :  { %397 = vrot.lane.b32.xlu0 %v4061_v30, %s3872_s22  ;;  %391 = vrot.lane.b32.xlu1 %v4037_v24, %s3872_s22 }
  0xfa   :  { %365 = vrot.lane.b32.xlu2 %v4015_v18, %s3871_s2 }
  0xfb   :  { %v4123_v38 = vpop.permute.xlu1 %343 }
  0xfc   :  { %v4127_v40 = vpop.permute.xlu2 %329 }
 0x101   :  { %395 = vrot.lane.b32.xlu0 %v4053_v28, %s3872_s22  ;;  %387 = vrot.lane.b32.xlu1 %v4021_v20, %s3872_s22 }
 0x102   :  { %393 = vrot.lane.b32.xlu2 %v4045_v26, %s3872_s22 }
 0x103   :  { %v4125_v39 = vpop.permute.xlu0 %325 }
 0x104   :  { %v4143_v43 = vpop.permute.xlu2 %269 }
 0x109   :  { %283 = vrot.lane.b32.xlu0 %v4009_v16, %s3873_s23  ;;  %383 = vrot.lane.b32.xlu1 %v4009_v16, %s3872_s22 }
 0x10a   :  { %389 = vrot.lane.b32.xlu2 %v4029_v22, %s3872_s22 }
 0x10b   :  { %v4135_v41 = vpop.permute.xlu0 %345  ;;  %v4137_v42 = vpop.permute.xlu1 %327 }
 0x10c   :  { %v4161_v48 = vpop.permute.xlu2 %333 }
 0x111   :  { %285 = vrot.lane.b32.xlu0 %v4015_v18, %s3873_s23  ;;  %305 = vrot.lane.b32.xlu1 %v4015_v18, %s3874_s24 }
 0x112   :  { %385 = vrot.lane.b32.xlu2 %v4015_v18, %s3872_s22 }
 0x113   :  { %v4147_v44 = vpop.permute.xlu0 %265  ;;  %v4149_v45 = vpop.permute.xlu1 %267 }
 0x114   :  { %v356_v51 = vpop.permute.xlu2 %355 }
 0x119   :  { %287 = vrot.lane.b32.xlu0 %v4021_v20, %s3873_s23  ;;  %293 = vrot.lane.b32.xlu1 %v4045_v26, %s3873_s23 }
 0x11a   :  { %303 = vrot.lane.b32.xlu2 %v4009_v16, %s3874_s24 }
 0x11b   :  { %v4157_v46 = vpop.permute.xlu0 %331  ;;  %v4159_v47 = vpop.permute.xlu1 %349 }
 0x121   :  { %289 = vrot.lane.b32.xlu0 %v4029_v22, %s3873_s23  ;;  %311 = vrot.lane.b32.xlu1 %v4037_v24, %s3874_s24 }
 0x122   :  { %381 = vrot.lane.b32.xlu2 %v4073_v34, %s3871_s2 }
 0x123   :  { %v4169_v49 = vpop.permute.xlu0 %351  ;;  %v354_v50 = vpop.permute.xlu1 %353 }
 0x129   :  { %307 = vrot.lane.b32.xlu0 %v4021_v20, %s3874_s24  ;;  %299 = vrot.lane.b32.xlu1 %v4067_v32, %s3873_s23 }
 0x12a   :  { %291 = vrot.lane.b32.xlu2 %v4037_v24, %s3873_s23 }
 0x12b   :  { %v4177_v52 = vpop.permute.xlu0 %271  ;;  %v4179_v53 = vpop.permute.xlu1 %273 }
 0x12c   :  { %v362_v54 = vpop.permute.xlu2 %361 }
 0x12d   :  { %3179 = vmatpush.xpose.msk.msra.mxu2 %vm523_vm1, %v362_v54 }
 0x131   :  { %295 = vrot.lane.b32.xlu0 %v4053_v28, %s3873_s23  ;;  %317 = vrot.lane.b32.xlu1 %v4061_v30, %s3874_s24 }
 0x132   :  { %309 = vrot.lane.b32.xlu2 %v4029_v22, %s3874_s24 }
 0x133   :  { %v358_v55 = vpop.permute.xlu0 %357  ;;  %v336_v56 = vpop.permute.xlu1 %335 }
 0x134   :  { %v4188_v57 = vpop.permute.xlu2 %377 }
 0x139   :  { %313 = vrot.lane.b32.xlu0 %v4045_v26, %s3874_s24  ;;  %3529 = vrot.lane.b32.xlu1 %v4192_v58, %s3875_s25 }
 0x13a   :  { %297 = vrot.lane.b32.xlu2 %v4061_v30, %s3873_s23 }
 0x13b   :  { %v340_v59 = vpop.permute.xlu0 %339  ;;  %v4200_v60 = vpop.permute.xlu1 %275 }
 0x13c   :  { %v4202_v61 = vpop.permute.xlu2 %373 }
 0x141   :  { %301 = vrot.lane.b32.xlu0 %v4073_v34, %s3873_s23  ;;  %401 = vrot.lane.b32.xlu1 %v4073_v34, %s3872_s22 }
 0x142   :  { %315 = vrot.lane.b32.xlu2 %v4053_v28, %s3874_s24 }
 0x143   :  { %v4210_v62 = vpop.permute.xlu0 %379  ;;  %v338_v63 = vpop.permute.xlu1 %337 }
 0x144   :  { %v4212_v0 = vpop.permute.xlu2 %279 }
 0x149   :  { %321 = vrot.lane.b32.xlu0 %v4073_v34, %s3874_s24  ;;  %281 = vrot.lane.b32.xlu1 %v4073_v34, %s3870_s1 }
 0x14a   :  { %319 = vrot.lane.b32.xlu2 %v4067_v32, %s3874_s24  ;;  %s3882_s24 = smov 128  }
 0x14b   :  { %v342_v1 = vpop.permute.xlu0 %341  ;;  %v360_v2 = vpop.permute.xlu1 %359 }
 0x14c   :  { %v4220_v3 = vpop.permute.xlu2 %367  ;;  %3159 = vmatpush.xpose.msk.msra.mxu1 %vm523_vm1, %v342_v1  ;;  %3180 = vmatpush.xpose.msk.msra.mxu2 %vm523_vm1, %v360_v2 }
 0x150   :  { %3160 = vmatpush.xpose.msk.msra.mxu1 %vm523_vm1, %v340_v59  ;;  %3181 = vmatpush.xpose.msk.msra.mxu2 %vm523_vm1, %v358_v55 }
 0x151   :  { %3549 = vrot.lane.b32.xlu0 %v4226_v4, %s3875_s25  ;;  %3559 = vrot.lane.b32.xlu1 %v4192_v58, %s3876_s26 }
 0x152   :  { %3534 = vrot.lane.b32.xlu2 %v4232_v5, %s3875_s25 }
 0x153   :  { %v376_v6 = vpop.permute.xlu0 %375  ;;  %v4240_v7 = vpop.permute.xlu1 %277 }
 0x154   :  { %v4242_v8 = vpop.permute.xlu2 %365  ;;  %3161 = vmatpush.xpose.msk.msra.mxu1 %vm523_vm1, %v338_v63  ;;  %3182 = vmatpush.xpose.msk.msra.mxu2 %vm523_vm1, %v356_v51 }
 0x158   :  { %3162 = vmatpush.xpose.msk.msra.mxu1 %vm523_vm1, %v336_v56  ;;  %3183 = vmatpush.xpose.msk.msra.mxu2 %vm523_vm1, %v354_v50 }
 0x159   :  { %3564 = vrot.lane.b32.xlu0 %v4232_v5, %s3876_s26  ;;  %3594 = vrot.lane.b32.xlu1 %v4248_v9, %s3877_s27 }
 0x15a   :  { %3539 = vrot.lane.b32.xlu2 %v3538_v10, %s3875_s25 }
 0x15b   :  { %v372_v11 = vpop.permute.xlu0 %371  ;;  %v4259_v12 = vpop.permute.xlu1 %399 }
 0x15c   :  { %v4261_v13 = vpop.permute.xlu2 %393  ;;  %3163 = vmatpush.xpose.msk.msra.mxu1 %vm523_vm1, %v4161_v48  ;;  %3184 = vmatpush.xpose.msk.msra.mxu2 %vm523_vm1, %v4169_v49 }
 0x160   :  { %3164 = vmatpush.xpose.msk.msra.mxu1 %vm523_vm1, %v4157_v46  ;;  %3185 = vmatpush.xpose.msk.msra.mxu2 %vm523_vm1, %v4159_v47 }
 0x161   :  { %3574 = vrot.lane.b32.xlu0 %v4226_v4, %s3876_s26  ;;  %3609 = vrot.lane.b32.xlu1 %v4192_v58, %s3878_s28 }
 0x162   :  { %3544 = vrot.lane.b32.xlu2 %v4248_v9, %s3875_s25  ;;  %s3883_s25 = smov 8  }
 0x163   :  { %v370_v14 = vpop.permute.xlu0 %369  ;;  %v364_v15 = vpop.permute.xlu1 %363 }
 0x164   :  { %v4277_v17 = vpop.permute.xlu2 %389  ;;  %3165 = vmatpush.xpose.msk.msra.mxu1 %vm523_vm1, %v4127_v40  ;;  %3186 = vmatpush.xpose.msk.msra.mxu2 %vm523_vm1, %v4115_v37 }
 0x168   :  { %3166 = vmatpush.xpose.msk.msra.mxu1 %vm523_vm1, %v4137_v42  ;;  %3187 = vmatpush.xpose.msk.msra.mxu2 %vm523_vm1, %v4135_v41 }
 0x169   :  { %3599 = vrot.lane.b32.xlu0 %v3538_v10, %s3878_s28 }
 0x16a   :  { %3554 = vrot.lane.b32.xlu2 %v3538_v10, %s3876_s26 }
 0x16b   :  { %v4289_v19 = vpop.permute.xlu0 %397  ;;  %v4291_v21 = vpop.permute.xlu1 %391 }
 0x16c   :  { %v4293_v23 = vpop.permute.xlu2 %385  ;;  %3167 = vmatpush.xpose.msk.msra.mxu1 %vm523_vm1, %v4125_v39  ;;  %3188 = vmatpush.xpose.msk.msra.mxu2 %vm523_vm1, %v4123_v38 }
 0x16f   :  { %3189 = vmatmul.msk.f32.vlgmr.msra.gmra.mxu2 %vm523_vm1, %v4107_v36 }
 0x170   :  { %3168 = vmatpush.xpose.msk.msra.mxu1 %vm523_vm1, %v4097_v35 }
 0x172   :  { %3569 = vrot.lane.b32.xlu2 %v4248_v9, %s3876_s26 }
 0x173   :  { %v4305_v25 = vpop.permute.xlu0 %395  ;;  %v4307_v27 = vpop.permute.xlu1 %387  ;;  %3169 = vmatmul.msk.f32.vlgmr.msra.gmra.mxu1 %vm523_vm1, %v4009_v16 }
 0x174   :  { %v4311_v29 = vpop.permute.xlu2 %303 }
 0x177   :  { %3190 = vmatmul.msk.f32.gmra.mxu2 %vm523_vm1, %v4147_v44 }
 0x17a   :  { %3579 = vrot.lane.b32.xlu2 %v3538_v10, %s3877_s27 }
 0x17b   :  { %v284_v31 = vpop.permute.xlu0 %283  ;;  %v4316_v33 = vpop.permute.xlu1 %383  ;;  %3170 = vmatmul.msk.f32.gmra.mxu1 %vm523_vm1, %v4015_v18 }
 0x17c   :  { %v382_v35 = vpop.permute.xlu2 %381 }
 0x17d   :  { %3199 = vmatpush.xpose.msk.msra.mxu3 %vm523_vm1, %v382_v35 }
 0x17f   :  { %3191 = vmatmul.msk.f32.gmra.mxu2 %vm523_vm1, %v4149_v45 }
 0x181   :  { %3200 = vmatpush.xpose.msk.msra.mxu3 %vm523_vm1, %v4210_v62 }
 0x182   :  { %3584 = vrot.lane.b32.xlu2 %v4192_v58, %s3877_s27 }
 0x183   :  { %v286_v16 = vpop.permute.xlu0 %285  ;;  %v4327_v36 = vpop.permute.xlu1 %305  ;;  %3171 = vmatmul.msk.f32.gmra.mxu1 %vm523_vm1, %v4021_v20 }
 0x184   :  { %v4331_v37 = vpop.permute.xlu2 %291 }
 0x185   :  { %3201 = vmatpush.xpose.msk.msra.mxu3 %vm523_vm1, %v4188_v57 }
 0x187   :  { %3192 = vmatmul.msk.f32.gmra.mxu2 %vm523_vm1, %v4143_v43 }
 0x189   :  { %3202 = vmatpush.xpose.msk.msra.mxu3 %vm523_vm1, %v376_v6 }
 0x18a   :  { %3589 = vrot.lane.b32.xlu2 %v4232_v5, %s3877_s27 }
 0x18b   :  { %v288_v18 = vpop.permute.xlu0 %287  ;;  %v4340_v38 = vpop.permute.xlu1 %293  ;;  %3172 = vmatmul.msk.f32.gmra.mxu1 %vm523_vm1, %v4029_v22 }
 0x18c   :  { %v4344_v20 = vpop.permute.xlu2 %309 }
 0x18d   :  { %3203 = vmatpush.xpose.msk.msra.mxu3 %vm523_vm1, %v4202_v61 }
 0x18f   :  { %3193 = vmatmul.msk.f32.gmra.mxu2 %vm523_vm1, %v4177_v52 }
 0x191   :  { %3204 = vmatpush.xpose.msk.msra.mxu3 %vm523_vm1, %v372_v11 }
 0x192   :  { %3604 = vrot.lane.b32.xlu2 %v4226_v4, %s3877_s27 }
 0x193   :  { %v290_v39 = vpop.permute.xlu0 %289  ;;  %v4353_v40 = vpop.permute.xlu1 %311  ;;  %3173 = vmatmul.msk.f32.gmra.mxu1 %vm523_vm1, %v4037_v24 }
 0x194   :  { %v4357_v22 = vpop.permute.xlu2 %297 }
 0x195   :  { %3205 = vmatpush.xpose.msk.msra.mxu3 %vm523_vm1, %v370_v14 }
 0x197   :  { %3194 = vmatmul.msk.f32.gmra.mxu2 %vm523_vm1, %v4179_v53 }
 0x199   :  { %3206 = vmatpush.xpose.msk.msra.mxu3 %vm523_vm1, %v4220_v3 }
 0x19b   :  { %v4364_v41 = vpop.permute.xlu0 %307  ;;  %v4366_v42 = vpop.permute.xlu1 %299  ;;  %3174 = vmatmul.msk.f32.gmra.mxu1 %vm523_vm1, %v4045_v26 }
 0x19c   :  { %v4370_v43 = vpop.permute.xlu2 %315 }
 0x19d   :  { %3207 = vmatpush.xpose.msk.msra.mxu3 %vm523_vm1, %v4242_v8  ;;  %v55_v8 = vlaneseq }
 0x19f   :  { %3195 = vmatmul.msk.f32.gmra.mxu2 %vm523_vm1, %v4200_v60  ;;  %v4427_v14 = vshrl.u32 %v55_v8, 7 }
 0x1a1   :  { %3208 = vmatpush.xpose.msk.msra.mxu3 %vm523_vm1, %v364_v15  ;;  %6042 = vst [vmem:[#allocation6_spill] sm:$0xff] %v4427_v14 }
 0x1a3   :  { %v4377_v24 = vpop.permute.xlu0 %295  ;;  %v4379_v44 = vpop.permute.xlu1 %317  ;;  %3175 = vmatmul.msk.f32.gmra.mxu1 %vm523_vm1, %v4053_v28 }
 0x1a4   :  { %3209 = vmatmul.msk.f32.vlgmr.msra.gmra.mxu3 %vm523_vm1, %v284_v31  ;;  %v4384_v26 = vpop.permute.xlu2 %319 }
 0x1a7   :  { %3196 = vmatmul.msk.f32.gmra.mxu2 %vm523_vm1, %v4240_v7 }
 0x1ab   :  { %v4388_v45 = vpop.permute.xlu0 %313  ;;  %v3530_v46 = vpop.permute.xlu1 %3529  ;;  %3176 = vmatmul.msk.f32.gmra.mxu1 %vm523_vm1, %v4061_v30 }
 0x1ac   :  { %3210 = vmatmul.msk.f32.gmra.mxu3 %vm523_vm1, %v286_v16  ;;  %v3535_v47 = vpop.permute.xlu2 %3534  ;;  %v3531_v51 = vunpack.i.l.bf16 %v3530_v46  ;;  %v3532_v54 = vunpack.i.h.bf16 %v3530_v46 }
 0x1ad   :  { %v3536_v55 = vunpack.i.l.bf16 %v3535_v47  ;;  %v3537_v56 = vunpack.i.h.bf16 %v3535_v47 }
 0x1af   :  { %3197 = vmatmul.msk.f32.gmra.mxu2 %vm523_vm1, %v4212_v0 }
 0x1b3   :  { %v4395_v28 = vpop.permute.xlu0 %301  ;;  %v402_v48 = vpop.permute.xlu1 %401  ;;  %3177 = vmatmul.msk.f32.gmra.mxu1 %vm523_vm1, %v4067_v32 }
 0x1b4   :  { %3211 = vmatmul.msk.f32.gmra.mxu3 %vm523_vm1, %v288_v18  ;;  %v3540_v49 = vpop.permute.xlu2 %3539  ;;  %3219 = vmatpush.xpose.msk.msrb.mxu0 %vm523_vm1, %v402_v48 }
 0x1b5   :  { %v3541_v50 = vunpack.i.l.bf16 %v3540_v49  ;;  %v3542_v30 = vunpack.i.h.bf16 %v3540_v49 }
 0x1b7   :  { %1469 = vmatpush.msrb.mxu1 %v3541_v50  ;;  %3381 = vmatpush.msrb.mxu3 %v3541_v50 }
 0x1b8   :  { %3220 = vmatpush.xpose.msk.msrb.mxu0 %vm523_vm1, %v4259_v12 }
 0x1b9   :  { %1470 = vmatpush.msrb.mxu1 %v3542_v30  ;;  %3382 = vmatpush.msrb.mxu3 %v3542_v30 }
 0x1bb   :  { %1471 = vmatpush.msrb.mxu1 %v3531_v51  ;;  %3383 = vmatpush.msrb.mxu3 %v3531_v51  ;;  %v4403_v52 = vpop.permute.xlu0 %321  ;;  %v282_v32 = vpop.permute.xlu1 %281  ;;  %v3879_v51 = vmov -1e+30  }
 0x1bc   :  { %3178 = vmatmul.msk.f32.gmra.mxu1 %vm523_vm1, %v4073_v34  ;;  %3212 = vmatmul.msk.f32.gmra.mxu3 %vm523_vm1, %v290_v39  ;;  %v3545_v53 = vpop.permute.xlu2 %3544 }
 0x1bd   :  { %3198 = vmatmul.msk.f32.gmra.mxu2 %vm523_vm1, %v282_v32  ;;  %3221 = vmatpush.xpose.msk.msrb.mxu0 %vm523_vm1, %v4289_v19  ;;  %v3546_v34 = vunpack.i.l.bf16 %v3545_v53  ;;  %v3547_v59 = vunpack.i.h.bf16 %v3545_v53  ;;  %v4429_v19 = vand.u32 127, %v55_v8 }
 0x1be   :  { %1472 = vmatpush.msrb.mxu1 %v3532_v54  ;;  %3384 = vmatpush.msrb.mxu3 %v3532_v54 }
 0x1bf   :  { %6043 = vst [vmem:[#allocation7_spill] sm:$0xff] %v4429_v19 }
 0x1c0   :  { %1473 = vmatpush.msrb.mxu1 %v3536_v55  ;;  %3385 = vmatpush.msrb.mxu3 %v3536_v55 }
 0x1c1   :  { %3222 = vmatpush.xpose.msk.msrb.mxu0 %vm523_vm1, %v4305_v25 }
 0x1c2   :  { %1474 = vmatpush.msrb.mxu1 %v3537_v56  ;;  %3386 = vmatpush.msrb.mxu3 %v3537_v56 }
 0x1c3   :  { %v3550_v57 = vpop.permute.xlu0 %3549  ;;  %v3560_v62 = vpop.permute.xlu1 %3559 }
 0x1c4   :  { %1475 = vmatpush.msrb.mxu1 %v3546_v34  ;;  %3387 = vmatpush.msrb.mxu3 %v3546_v34  ;;  %v3555_v58 = vpop.permute.xlu2 %3554  ;;  %v3551_v60 = vunpack.i.l.bf16 %v3550_v57  ;;  %v3552_v0 = vunpack.i.h.bf16 %v3550_v57  ;;  %v3561_v1 = vunpack.i.l.bf16 %v3560_v62  ;;  %v3562_v3 = vunpack.i.h.bf16 %v3560_v62 }
 0x1c5   :  { %3213 = vmatmul.msk.f32.gmra.mxu3 %vm523_vm1, %v4331_v37  ;;  %3223 = vmatpush.xpose.msk.msrb.mxu0 %vm523_vm1, %v4261_v13  ;;  %v3556_v61 = vunpack.i.l.bf16 %v3555_v58  ;;  %v3557_v63 = vunpack.i.h.bf16 %v3555_v58 }
 0x1c6   :  { %1476 = vmatpush.msrb.mxu1 %v3547_v59  ;;  %3388 = vmatpush.msrb.mxu3 %v3547_v59 }
 0x1c7   :  { %1546 = vmatpush.msrb.mxu2 %v3556_v61 }
 0x1c8   :  { %1477 = vmatpush.msrb.mxu1 %v3551_v60  ;;  %3389 = vmatpush.msrb.mxu3 %v3551_v60 }
 0x1c9   :  { %3224 = vmatpush.xpose.msk.msrb.mxu0 %vm523_vm1, %v4291_v21  ;;  %1547 = vmatpush.msrb.mxu2 %v3557_v63  ;;  %v6010_v21 = vcvt.s32.f32 %v4427_v14 }
 0x1ca   :  { %1478 = vmatpush.msrb.mxu1 %v3552_v0  ;;  %3390 = vmatpush.msrb.mxu3 %v3552_v0 }
 0x1cb   :  { %1548 = vmatpush.msrb.mxu2 %v3561_v1  ;;  %v3565_v2 = vpop.permute.xlu0 %3564  ;;  %v4425_v12 = vpop.permute.xlu1 %3594  ;;  %v79_v35 = vmul.f32 0.2, %v6010_v21 }
 0x1cc   :  { %3391 = vmatpush.msra.mxu3 %v3556_v61  ;;  %v3566_v6 = vunpack.i.l.bf16 %v3565_v2  ;;  %v3570_v7 = vpop.permute.xlu2 %3569  ;;  %v3567_v10 = vunpack.i.h.bf16 %v3565_v2  ;;  %6041 = vst [vmem:[#allocation5_spill] sm:$0xff] %v4425_v12 }
 0x1cd   :  { %3214 = vmatmul.msk.f32.gmra.mxu3 %vm523_vm1, %v4340_v38  ;;  %3225 = vmatpush.xpose.msk.msrb.mxu0 %vm523_vm1, %v4277_v17  ;;  %v3571_v11 = vunpack.i.l.bf16 %v3570_v7  ;;  %v3572_v15 = vunpack.i.h.bf16 %v3570_v7  ;;  %v3404_v39 = vfloor.f32 %v79_v35  ;;  %vm3402_vm2 = vcmp.lt.s32.totalorder %v79_v35, 0 }
 0x1ce   :  { %3392 = vmatpush.msra.mxu3 %v3557_v63  ;;  %1549 = vmatpush.msrb.mxu2 %v3562_v3 }
 0x1d0   :  { %3393 = vmatpush.msra.mxu3 %v3561_v1  ;;  %1550 = vmatpush.msrb.mxu2 %v3566_v6 }
 0x1d1   :  { %3226 = vmatpush.xpose.msk.msrb.mxu0 %vm523_vm1, %v4307_v27  ;;  %v6009_v27 = vcvt.s32.f32 %v4429_v19 }
 0x1d2   :  { %3394 = vmatpush.msra.mxu3 %v3562_v3  ;;  %1551 = vmatpush.msrb.mxu2 %v3567_v10 }
 0x1d3   :  { %v3575_v13 = vpop.permute.xlu0 %3574  ;;  %v99_v16 = vmul.f32 0.2, %v6009_v27  ;;  %v3610_v37 = vpop.permute.xlu1 %3609 }
 0x1d4   :  { %3395 = vmatpush.msra.mxu3 %v3566_v6  ;;  %1552 = vmatpush.msrb.mxu2 %v3571_v11  ;;  %v3576_v17 = vunpack.i.l.bf16 %v3575_v13  ;;  %v3577_v25 = vunpack.i.h.bf16 %v3575_v13  ;;  %v3611_v38 = vunpack.i.l.bf16 %v3610_v37 }
 0x1d5   :  { %3215 = vmatmul.msk.f32.gmra.mxu3 %vm523_vm1, %v4377_v24  ;;  %3227 = vmatpush.xpose.msk.msrb.mxu0 %vm523_vm1, %v4293_v23  ;;  %v3453_v24 = vceil.f32 %v99_v16  ;;  %v3454_v46 = vfloor.f32 %v99_v16  ;;  %vm3452_vm3 = vcmp.lt.s32.totalorder %v99_v16, 0 }
 0x1d6   :  { %3396 = vmatpush.msra.mxu3 %v3567_v10  ;;  %1553 = vmatpush.msrb.mxu2 %v3572_v15 }
 0x1d7   :  { %v3455_v48 = vsel %vm3452_vm3, %v3453_v24, %v3454_v46 }
 0x1d8   :  { %3397 = vmatpush.msra.mxu3 %v3571_v11  ;;  %1554 = vmatpush.msrb.mxu2 %v3576_v17  ;;  %v4454_v50 = vcvt.f32.s32 %v3455_v48 }
 0x1d9   :  { %3228 = vmatpush.xpose.msk.msrb.mxu0 %vm523_vm1, %v4316_v33  ;;  %v3403_v33 = vceil.f32 %v79_v35 }
 0x1da   :  { %3398 = vmatpush.msra.mxu3 %v3572_v15  ;;  %1555 = vmatpush.msrb.mxu2 %v3577_v25  ;;  %6045 = vst [vmem:[#allocation9_spill] sm:$0xff] %v4454_v50 }
 0x1db   :  { %v3600_v31 = vpop.permute.xlu0 %3599  ;;  %v3405_v47 = vsel %vm3402_vm2, %v3403_v33, %v3404_v39 }
 0x1dc   :  { %3399 = vmatpush.msra.mxu3 %v3576_v17  ;;  %v3601_v23 = vunpack.i.l.bf16 %v3600_v31  ;;  %3229 = vmatmul.msk.f32.vlgmr.msrb.gmra.mxu0 %vm523_vm1, %v4311_v29  ;;  %v3602_v18 = vunpack.i.h.bf16 %v3600_v31  ;;  %v3612_v29 = vunpack.i.h.bf16 %v3610_v37  ;;  %v3406_v49 = vcvt.f32.s32 %v3405_v47 }
 0x1dd   :  { %3216 = vmatmul.msk.f32.gmra.mxu3 %vm523_vm1, %v4357_v22  ;;  %v4450_v22 = vadd.s32 8, %v4427_v14 }
 0x1de   :  { %3400 = vmatpush.msra.mxu3 %v3577_v25  ;;  %1700 = vmatpush.msra.mxu0 %v3601_v23  ;;  %vm101_vm4 = vcmp.eq.s32.totalorder %v3406_v49, %v4454_v50 }
 0x1df   :  { %6044 = vst [vmem:[#allocation8_spill] sm:$0xff] %v4450_v22  ;;  %v6008_v30 = vcvt.s32.f32 %v4450_v22 }
 0x1e0   :  { %1701 = vmatpush.msra.mxu0 %v3602_v18 }
 0x1e2   :  { %1702 = vmatpush.msra.mxu0 %v3611_v38  ;;  %v4539_v38 = vadd.s32 32, %v4427_v14 }
 0x1e4   :  { %3230 = vmatmul.msk.f32.gmra.mxu0 %vm523_vm1, %v4327_v36  ;;  %v80_v36 = vmul.f32 0.2, %v6008_v30  ;;  %6048 = vst [vmem:[#allocation12_spill] sm:$0xff] %v4539_v38  ;;  %v6004_v48 = vcvt.s32.f32 %v4539_v38 }
 0x1e5   :  { %3217 = vmatmul.msk.f32.gmra.mxu3 %vm523_vm1, %v4366_v42  ;;  %1703 = vmatpush.msra.mxu0 %v3612_v29  ;;  %v4465_v42 = vsel %vm101_vm4, 0.0, %v3879_v51 }
 0x1e6   :  { %v3408_v53 = vceil.f32 %v80_v36  ;;  %v3409_v54 = vfloor.f32 %v80_v36  ;;  %vm3407_vm6 = vcmp.lt.s32.totalorder %v80_v36, 0 }
 0x1ec   :  { %3231 = vmatmul.msk.f32.gmra.mxu0 %vm523_vm1, %v4364_v41 }
 0x1ed   :  { %3218 = vmatmul.msk.f32.gmra.mxu3 %vm523_vm1, %v4395_v28  ;;  %v3410_v28 = vsel %vm3407_vm6, %v3408_v53, %v3409_v54  ;;  %v4558_v53 = vadd.s32 40, %v4427_v14 }
 0x1ee   :  { %v3411_v57 = vcvt.f32.s32 %v3410_v28 }
 0x1ef   :  { %6049 = vst [vmem:[#allocation13_spill] sm:$0xff] %v4558_v53 }
 0x1f0   :  { %v581_v32 = vpop.f32.mrf.mxu1  ;;  %vm102_vm7 = vcmp.eq.s32.totalorder %v3411_v57, %v4454_v50 }
 0x1f1   :  { %v4468_v55 = vadd.f32 %v581_v32, %v4465_v42  ;;  %v4483_v60 = vsel %vm102_vm7, 0.0, %v3879_v51  ;;  %v83_v32 = vmul.f32 0.2, %v6004_v48 }
 0x1f2   :  { %v668_v56 = vpop.f32.mrf.mxu2 }
 0x1f3   :  { %v873_v41 = vsel %vm872_vm5, %v4468_v55, -inf  ;;  %v4475_v34 = vadd.f32 %v668_v56, %v4465_v42  ;;  %v3423_v28 = vceil.f32 %v83_v32  ;;  %v3424_v57 = vfloor.f32 %v83_v32 }
 0x1f4   :  { %3232 = vmatmul.msk.f32.gmra.mxu0 %vm523_vm1, %v4344_v20  ;;  %874 = vmax.xlane.f32.xlu0 %v873_v41  ;;  %vm3422_vm12 = vcmp.lt.s32.totalorder %v83_v32, 0 }
 0x1f5   :  { %v903_v58 = vsel %vm872_vm5, %v4475_v34, -inf }
 0x1f8   :  { %v584_v1 = vpop.f32.mrf.mxu1 }
 0x1f9   :  { %v4518_v11 = vadd.f32 %v584_v1, %v4483_v60 }
 0x1fa   :  { %v671_v59 = vpop.f32.mrf.mxu2 }
 0x1fb   :  { %v4486_v20 = vadd.f32 %v671_v59, %v4483_v60  ;;  %v876_v35 = vsel %vm872_vm5, %v4518_v11, -inf }
 0x1fc   :  { %3233 = vmatmul.msk.f32.gmra.mxu0 %vm523_vm1, %v4353_v40  ;;  %904 = vmax.xlane.f32.xlu0 %v903_v58  ;;  %v4497_v40 = vadd.s32 16, %v4427_v14  ;;  %v6003_v58 = vcvt.s32.f32 %v4558_v53 }
 0x1fd   :  { %v906_v61 = vsel %vm872_vm5, %v4486_v20, -inf }
 0x1fe   :  { %6046 = vst [vmem:[#allocation10_spill] sm:$0xff] %v4497_v40  ;;  %v6007_v62 = vcvt.s32.f32 %v4497_v40 }
 0x200   :  { %v81_v63 = vmul.f32 0.2, %v6007_v62  ;;  %v587_v17 = vpop.f32.mrf.mxu1 }
 0x202   :  { %v3414_v0 = vfloor.f32 %v81_v63  ;;  %vm3412_vm8 = vcmp.lt.s32.totalorder %v81_v63, 0  ;;  %v674_v16 = vpop.f32.mrf.mxu2 }
 0x204   :  { %3234 = vmatmul.msk.f32.gmra.mxu0 %vm523_vm1, %v4388_v45  ;;  %907 = vmax.xlane.f32.xlu0 %v906_v61  ;;  %v4505_v45 = vadd.s32 24, %v4427_v14  ;;  %v3425_v61 = vsel %vm3422_vm12, %v3423_v28, %v3424_v57  ;;  %v4612_v28 = vadd.s32 64, %v4427_v14 }
 0x205   :  { %v3426_v1 = vcvt.f32.s32 %v3425_v61 }
 0x206   :  { %6047 = vst [vmem:[#allocation11_spill] sm:$0xff] %v4505_v45 }
 0x207   :  { %vm105_vm14 = vcmp.eq.s32.totalorder %v3426_v1, %v4454_v50  ;;  %6051 = vst [vmem:[#allocation15_spill] sm:$0xff] %v4612_v28 }
 0x208   :  { %v590_v29 = vpop.f32.mrf.mxu1 }
 0x20a   :  { %v677_v41 = vpop.f32.mrf.mxu2 }
 0x20c   :  { %3235 = vmatmul.msk.f32.gmra.mxu0 %vm523_vm1, %v4370_v43  ;;  %v3413_v43 = vceil.f32 %v81_v63  ;;  %v84_v63 = vmul.f32 0.2, %v6003_v58 }
 0x20e   :  { %v3415_v3 = vsel %vm3412_vm8, %v3413_v43, %v3414_v0  ;;  %vm3427_vm13 = vcmp.lt.s32.totalorder %v84_v63, 0 }
 0x20f   :  { %v3416_v8 = vcvt.f32.s32 %v3415_v3  ;;  %v3429_v3 = vfloor.f32 %v84_v63 }
 0x211   :  { %vm103_vm10 = vcmp.eq.s32.totalorder %v3416_v8, %v4454_v50 }
 0x212   :  { %v4529_v23 = vsel %vm103_vm10, 0.0, %v3879_v51 }
 0x213   :  { %v4532_v18 = vadd.f32 %v587_v17, %v4529_v23  ;;  %v4535_v33 = vadd.f32 %v674_v16, %v4529_v23 }
 0x214   :  { %3236 = vmatmul.msk.f32.gmra.mxu0 %vm523_vm1, %v4379_v44  ;;  %v6005_v44 = vcvt.s32.f32 %v4505_v45 }
 0x215   :  { %v909_v39 = vsel %vm872_vm5, %v4535_v33, -inf  ;;  %v879_v24 = vsel %vm872_vm5, %v4532_v18, -inf }
 0x216   :  { %v82_v6 = vmul.f32 0.2, %v6005_v44 }
 0x218   :  { %v3419_v10 = vfloor.f32 %v82_v6  ;;  %vm3417_vm9 = vcmp.lt.s32.totalorder %v82_v6, 0 }
 0x21c   :  { %3237 = vmatmul.msk.f32.gmra.mxu0 %vm523_vm1, %v4384_v26 }
 0x224   :  { %3238 = vmatmul.msk.f32.gmra.mxu0 %vm523_vm1, %v4403_v52  ;;  %v3418_v52 = vceil.f32 %v82_v6 }
 0x226   :  { %v3420_v25 = vsel %vm3417_vm9, %v3418_v52, %v3419_v10  ;;  %v4579_v10 = vsel %vm105_vm14, 0.0, %v3879_v51 }
 0x227   :  { %v755_v2 = vpop.f32.mrf.mxu3  ;;  %v3421_v37 = vcvt.f32.s32 %v3420_v25  ;;  %v4584_v25 = vpop.f32.mrf.mxu2 }
 0x228   :  { %v4511_v26 = vadd.f32 %v755_v2, %v4465_v42  ;;  %v3428_v2 = vceil.f32 %v84_v63  ;;  %v6001_v63 = vcvt.s32.f32 %v4612_v28 }
 0x229   :  { %vm104_vm11 = vcmp.eq.s32.totalorder %v3421_v37, %v4454_v50 }
 0x22a   :  { %v933_v7 = vsel %vm872_vm5, %v4511_v26, -inf  ;;  %v4546_v46 = vsel %vm104_vm11, 0.0, %v3879_v51  ;;  %v3430_v8 = vsel %vm3427_vm13, %v3428_v2, %v3429_v3 }
 0x22b   :  { %934 = vmax.xlane.f32.xlu1 %v933_v7  ;;  %v4550_v49 = vadd.f32 %v590_v29, %v4546_v46  ;;  %v4566_v59 = vadd.f32 %v677_v41, %v4546_v46  ;;  %v593_v7 = vpop.f32.mrf.mxu1  ;;  %v4598_v29 = vadd.s32 56, %v4427_v14 }
 0x22c   :  { %v4582_v17 = vadd.f32 %v593_v7, %v4579_v10  ;;  %v87_v7 = vmul.f32 0.2, %v6001_v63 }
 0x22d   :  { %v882_v56 = vsel %vm872_vm5, %v4550_v49, -inf  ;;  %v912_v43 = vsel %vm872_vm5, %v4566_v59, -inf  ;;  %6050 = vst [vmem:[#allocation14_spill] sm:$0xff] %v4598_v29  ;;  %v6002_v32 = vcvt.s32.f32 %v4598_v29  ;;  %v4744_v29 = vpop.permute.xlu2 %3579 }
 0x22e   :  { %v885_v16 = vsel %vm872_vm5, %v4582_v17, -inf  ;;  %vm3442_vm3 = vcmp.lt.s32.totalorder %v87_v7, 0  ;;  %6055 = vst [vmem:[#allocation19_spill] sm:$0xff] %v4744_v29 }
 0x22f   :  { %v758_v13 = vpop.f32.mrf.mxu3  ;;  %v86_v61 = vmul.f32 0.2, %v6002_v32 }
 0x230   :  { %v4522_v15 = vadd.f32 %v758_v13, %v4483_v60  ;;  %v3431_v13 = vcvt.f32.s32 %v3430_v8 }
 0x231   :  { %vm3437_vm2 = vcmp.lt.s32.totalorder %v86_v61, 0 }
 0x232   :  { %v936_v31 = vsel %vm872_vm5, %v4522_v15, -inf  ;;  %vm106_vm15 = vcmp.eq.s32.totalorder %v3431_v13, %v4454_v50  ;;  %v4631_v13 = vadd.s32 72, %v4427_v14 }
 0x233   :  { %937 = vmax.xlane.f32.xlu0 %v936_v31  ;;  %877 = vmax.xlane.f32.xlu1 %v876_v35  ;;  %v4593_v37 = vsel %vm106_vm15, 0.0, %v3879_v51 }
 0x234   :  { %6052 = vst [vmem:[#allocation16_spill] sm:$0xff] %v4631_v13 }
 0x237   :  { %v761_v47 = vpop.f32.mrf.mxu3 }
 0x238   :  { %v4553_v36 = vadd.f32 %v761_v47, %v4529_v23 }
 0x23a   :  { %v939_v54 = vsel %vm872_vm5, %v4553_v36, -inf }
 0x23b   :  { %910 = vmax.xlane.f32.xlu0 %v909_v39  ;;  %880 = vmax.xlane.f32.xlu1 %v879_v24  ;;  %v596_v39 = vpop.f32.mrf.mxu1 }
 0x23c   :  { %v4601_v47 = vadd.f32 %v596_v39, %v4593_v37  ;;  %v3444_v39 = vfloor.f32 %v87_v7 }
 0x23e   :  { %v888_v41 = vsel %vm872_vm5, %v4601_v47, -inf }
 0x23f   :  { %v764_v0 = vpop.f32.mrf.mxu3 }
 0x240   :  { %v4573_v6 = vadd.f32 %v764_v0, %v4546_v46  ;;  %v3439_v0 = vfloor.f32 %v86_v61 }
 0x242   :  { %v942_v52 = vsel %vm872_vm5, %v4573_v6, -inf }
 0x243   :  { %940 = vmax.xlane.f32.xlu0 %v939_v54  ;;  %883 = vmax.xlane.f32.xlu1 %v882_v56  ;;  %v4619_v1 = vpop.f32.mrf.mxu1 }
 0x24b   :  { %913 = vmax.xlane.f32.xlu1 %v912_v43  ;;  %v3438_v43 = vceil.f32 %v86_v61 }
 0x253   :  { %943 = vmax.xlane.f32.xlu1 %v942_v52  ;;  %v3440_v52 = vsel %vm3437_vm2, %v3438_v43, %v3439_v0  ;;  %v4643_v0 = vadd.s32 48, %v4427_v14 }
 0x255   :  { %6053 = vst [vmem:[#allocation17_spill] sm:$0xff] %v4643_v0 }
 0x259   :  { %v842_v31 = vpop.f32.mrf.mxu0 }
 0x25a   :  { %v4588_v35 = vadd.f32 %v842_v31, %v4465_v42  ;;  %v4603_v42 = vpop.f32.mrf.mxu2  ;;  %v3441_v31 = vcvt.f32.s32 %v3440_v52  ;;  %v6006_v52 = vcvt.s32.f32 %v4643_v0 }
 0x25b   :  { %886 = vmax.xlane.f32.xlu1 %v885_v16  ;;  %v3443_v16 = vceil.f32 %v87_v7 }
 0x25c   :  { %v963_v24 = vsel %vm872_vm5, %v4588_v35, -inf  ;;  %vm108_vm4 = vcmp.eq.s32.totalorder %v3441_v31, %v4454_v50 }
 0x25d   :  { %964 = vmax.xlane.f32.xlu2 %v963_v24  ;;  %v3445_v61 = vsel %vm3442_vm3, %v3443_v16, %v3444_v39  ;;  %v4648_v7 = vsel %vm108_vm4, 0.0, %v3879_v51 }
 0x261   :  { %v845_v54 = vpop.f32.mrf.mxu0 }
 0x262   :  { %v4607_v56 = vadd.f32 %v845_v54, %v4483_v60  ;;  %v4621_v2 = vpop.f32.mrf.mxu2  ;;  %v6000_v54 = vcvt.s32.f32 %v4631_v13 }
 0x263   :  { %889 = vmax.xlane.f32.xlu1 %v888_v41  ;;  %v4638_v41 = vpop.f32.mrf.mxu1 }
 0x264   :  { %v966_v57 = vsel %vm872_vm5, %v4607_v56, -inf }
 0x265   :  { %967 = vmax.xlane.f32.xlu2 %v966_v57 }
 0x269   :  { %v848_v60 = vpop.f32.mrf.mxu0 }
 0x26a   :  { %v4624_v3 = vadd.f32 %v848_v60, %v4529_v23  ;;  %v689_v57 = vpop.f32.mrf.mxu2  ;;  %v88_v60 = vmul.f32 0.2, %v6000_v54 }
 0x26b   :  { %v605_v63 = vpop.f32.mrf.mxu1 }
 0x26c   :  { %v969_v8 = vsel %vm872_vm5, %v4624_v3, -inf  ;;  %v3448_v16 = vceil.f32 %v88_v60  ;;  %v3449_v39 = vfloor.f32 %v88_v60  ;;  %vm3447_vm7 = vcmp.lt.s32.totalorder %v88_v60, 0 }
 0x26d   :  { %970 = vmax.xlane.f32.xlu2 %v969_v8  ;;  %v4651_v8 = vadd.f32 %v689_v57, %v4648_v7  ;;  %v85_v57 = vmul.f32 0.2, %v6006_v52  ;;  %v4671_v60 = vadd.f32 %v4584_v25, %v4579_v10 }
 0x26e   :  { %v3450_v32 = vsel %vm3447_vm7, %v3448_v16, %v3449_v39 }
 0x26f   :  { %v3433_v58 = vceil.f32 %v85_v57  ;;  %v3434_v48 = vfloor.f32 %v85_v57  ;;  %v3451_v52 = vcvt.f32.s32 %v3450_v32  ;;  %vm3432_vm8 = vcmp.lt.s32.totalorder %v85_v57, 0 }
 0x270   :  { %v915_v16 = vsel %vm872_vm5, %v4671_v60, -inf }
 0x271   :  { %v851_v24 = vpop.f32.mrf.mxu0  ;;  %v3435_v39 = vsel %vm3432_vm8, %v3433_v58, %v3434_v48  ;;  %vm110_vm9 = vcmp.eq.s32.totalorder %v3451_v52, %v4454_v50  ;;  %v875_v58 = vpop.xlane.xlu0 %874 }
 0x272   :  { %v4635_v23 = vadd.f32 %v851_v24, %v4546_v46  ;;  %v3446_v46 = vcvt.f32.s32 %v3445_v61  ;;  %v924_v61 = vsel %vm872_vm5, %v4651_v8, -inf  ;;  %v3436_v57 = vcvt.f32.s32 %v3435_v39 }
 0x273   :  { %v608_v13 = vpop.f32.mrf.mxu1 }
 0x274   :  { %v972_v43 = vsel %vm872_vm5, %v4635_v23, -inf  ;;  %vm109_vm6 = vcmp.eq.s32.totalorder %v3446_v46, %v4454_v50  ;;  %v767_v46 = vpop.f32.mrf.mxu3  ;;  %vm107_vm10 = vcmp.eq.s32.totalorder %v3436_v57, %v4454_v50 }
 0x275   :  { %973 = vmax.xlane.f32.xlu2 %v972_v43  ;;  %v4665_v54 = vsel %vm109_vm6, 0.0, %v3879_v51  ;;  %v4694_v30 = vadd.f32 %v767_v46, %v4579_v10  ;;  %v117_v46 = vsel %vm107_vm10, 0.0, %v3879_v51 }
 0x276   :  { %v4674_v44 = vadd.f32 %v605_v63, %v4665_v54  ;;  %v4688_v63 = vadd.f32 %v4603_v42, %v4593_v37  ;;  %v4727_v50 = vadd.f32 %v4621_v2, %v117_v46 }
 0x277   :  { %v945_v42 = vsel %vm872_vm5, %v4694_v30, -inf }
 0x278   :  { %v897_v25 = vsel %vm872_vm5, %v4674_v44, -inf }
 0x279   :  { %v854_v31 = vpop.f32.mrf.mxu0  ;;  %v905_v57 = vpop.xlane.xlu0 %904 }
 0x27a   :  { %v4655_v24 = vadd.f32 %v854_v31, %v4579_v10  ;;  %v4667_v31 = vpop.f32.mrf.mxu2 }
 0x27c   :  { %v975_v43 = vsel %vm872_vm5, %v4655_v24, -inf }
 0x27d   :  { %976 = vmax.xlane.f32.xlu0 %v975_v43  ;;  %925 = vmax.xlane.f32.xlu2 %v924_v61 }
 0x281   :  { %v857_v43 = vpop.f32.mrf.mxu0  ;;  %v908_v21 = vpop.xlane.xlu0 %907 }
 0x282   :  { %v4677_v61 = vadd.f32 %v857_v43, %v4593_v37  ;;  %v695_v32 = vpop.f32.mrf.mxu2  ;;  %v4691_v43 = vsel %vm110_vm9, 0.0, %v3879_v51 }
 0x283   :  { %v4697_v48 = vadd.f32 %v695_v32, %v4691_v43  ;;  %v4740_v2 = vadd.f32 %v608_v13, %v4691_v43  ;;  %v4753_v13 = vadd.f32 %v4638_v41, %v4648_v7  ;;  %v4766_v41 = vadd.f32 %v4667_v31, %v4665_v54 }
 0x284   :  { %v978_v62 = vsel %vm872_vm5, %v4677_v61, -inf }
 0x285   :  { %979 = vmax.xlane.f32.xlu1 %v978_v62  ;;  %916 = vmax.xlane.f32.xlu0 %v915_v16  ;;  %v770_v62 = vpop.f32.mrf.mxu3  ;;  %v918_v16 = vsel %vm872_vm5, %v4688_v63, -inf  ;;  %v930_v10 = vsel %vm872_vm5, %v4697_v48, -inf }
 0x286   :  { %898 = vmax.xlane.f32.xlu2 %v897_v25  ;;  %v4708_v39 = vadd.f32 %v770_v62, %v4593_v37 }
 0x288   :  { %v948_v27 = vsel %vm872_vm5, %v4708_v39, -inf }
 0x289   :  { %v860_v52 = vpop.f32.mrf.mxu0 }
 0x28a   :  { %v4710_v25 = vadd.f32 %v860_v52, %v117_v46 }
 0x28c   :  { %6054 = vst [vmem:[#allocation18_spill] sm:$0xff] %v4710_v25 }
 0x28d   :  { %919 = vmax.xlane.f32.xlu1 %v918_v16  ;;  %946 = vmax.xlane.f32.xlu0 %v945_v42  ;;  %v773_v32 = vpop.f32.mrf.mxu3  ;;  %v981_v16 = vsel %vm872_vm5, %v4710_v25, -inf }
 0x28e   :  { %931 = vmax.xlane.f32.xlu2 %v930_v10  ;;  %v4717_v10 = vadd.f32 %v4619_v1, %v117_v46  ;;  %v993_v1 = vsub.f32 %v4468_v55, %v875_v58  ;;  %v4742_v28 = vadd.f32 %v773_v32, %v117_v46  ;;  %v1004_v55 = vsub.f32 %v4486_v20, %v908_v21  ;;  %v4758_v20 = vpop.permute.xlu2 %3584 }
 0x28f   :  { %6056 = vst [vmem:[#allocation20_spill] sm:$0xff] %v4758_v20 }
 0x290   :  { %v891_v37 = vsel %vm872_vm5, %v4717_v10, -inf  ;;  %v951_v58 = vsel %vm872_vm5, %v4742_v28, -inf }
 0x291   :  { %v863_v42 = vpop.f32.mrf.mxu0 }
 0x292   :  { %v4720_v51 = vadd.f32 %v863_v42, %v4648_v7 }
 0x294   :  { %v984_v62 = vsel %vm872_vm5, %v4720_v51, -inf }
 0x295   :  { %949 = vmax.xlane.f32.xlu1 %v948_v27  ;;  %982 = vmax.xlane.f32.xlu0 %v981_v16  ;;  %v776_v52 = vpop.f32.mrf.mxu3  ;;  %v921_v16 = vsel %vm872_vm5, %v4727_v50, -inf }
 0x296   :  { %v4730_v27 = vadd.f32 %v776_v52, %v4648_v7  ;;  %v4778_v31 = vpop.permute.xlu2 %3589 }
 0x297   :  { %6057 = vst [vmem:[#allocation21_spill] sm:$0xff] %v4778_v31 }
 0x298   :  { %v954_v42 = vsel %vm872_vm5, %v4730_v27, -inf }
 0x29d   :  { %892 = vmax.xlane.f32.xlu1 %v891_v37  ;;  %985 = vmax.xlane.f32.xlu0 %v984_v62  ;;  %v1033_v62 = vmul.f32 1.442695, %v993_v1 }
 0x29e   :  { %v935_v52 = vpop.xlane.xlu1 %934 }
 0x29f   :  { %3632 = vpow2.f32 %v1033_v62  ;;  %v894_v62 = vsel %vm872_vm5, %v4753_v13, -inf }
 0x2a5   :  { %922 = vmax.xlane.f32.xlu1 %v921_v16  ;;  %955 = vmax.xlane.f32.xlu0 %v954_v42  ;;  %v900_v16 = vsel %vm872_vm5, %v4740_v2, -inf  ;;  %v1055_v42 = vmul.f32 1.442695, %v1004_v55  ;;  %v4755_v46 = vpop.eup %3632 }
 0x2a6   :  { %v4737_v37 = vpop.xlane.xlu0 %937  ;;  %v878_v32 = vpop.xlane.xlu1 %877 }
 0x2a7   :  { %3634 = vpow2.f32 %v1055_v42  ;;  %v927_v42 = vsel %vm872_vm5, %v4766_v41, -inf }
 0x2ad   :  { %952 = vmax.xlane.f32.xlu1 %v951_v58  ;;  %901 = vmax.xlane.f32.xlu0 %v900_v16  ;;  %v1113_v58 = vsel %vm872_vm5, %v4755_v46, 0.0  ;;  %v4768_v16 = vpop.eup %3634 }
 0x2ae   :  { %v911_v1 = vpop.xlane.xlu0 %910 }
 0x2af   :  { %v1005_v21 = vsub.f32 %v4535_v33, %v911_v1  ;;  %v1003_v33 = vsub.f32 %v4475_v34, %v905_v57 }
 0x2b1   :  { %v1057_v55 = vmul.f32 1.442695, %v1005_v21  ;;  %v4776_v21 = vpop.xlane.xlu1 %880  ;;  %v1053_v0 = vmul.f32 1.442695, %v1003_v33 }
 0x2b3   :  { %3636 = vpow2.f32 %v1057_v55 }
 0x2b4   :  { %3638 = vpow2.f32 %v1053_v0 }
 0x2b5   :  { %895 = vmax.xlane.f32.xlu1 %v894_v62  ;;  %1114 = vadd.xlane.f32.xlu0 %v1113_v58  ;;  %v1146_v62 = vsel %vm872_vm5, %v4768_v16, 0.0  ;;  %v779_v58 = vpop.f32.mrf.mxu3 }
 0x2b6   :  { %v941_v7 = vpop.xlane.xlu0 %940  ;;  %v4781_v34 = vadd.f32 %v779_v58, %v4665_v54 }
 0x2b7   :  { %v1015_v1 = vsub.f32 %v4553_v36, %v941_v7  ;;  %v1013_v36 = vsub.f32 %v4511_v26, %v935_v52  ;;  %v994_v26 = vsub.f32 %v4518_v11, %v878_v32 }
 0x2b8   :  { %v957_v55 = vsel %vm872_vm5, %v4781_v34, -inf }
 0x2b9   :  { %v1077_v53 = vmul.f32 1.442695, %v1015_v1  ;;  %v4783_v57 = vpop.eup %3636  ;;  %v4790_v33 = vpop.xlane.xlu1 %883  ;;  %v1035_v52 = vmul.f32 1.442695, %v994_v26 }
 0x2ba   :  { %v1149_v7 = vsel %vm872_vm5, %v4783_v57, 0.0  ;;  %v4792_v1 = vpop.eup %3638 }
 0x2bb   :  { %3640 = vpow2.f32 %v1077_v53  ;;  %v1143_v53 = vsel %vm872_vm5, %v4792_v1, 0.0 }
 0x2bd   :  { %928 = vmax.xlane.f32.xlu1 %v927_v42  ;;  %1147 = vadd.xlane.f32.xlu0 %v1146_v62  ;;  %v1073_v42 = vmul.f32 1.442695, %v1013_v36  ;;  %v4794_v62 = vpop.permute.xlu2 %3604 }
 0x2be   :  { %6058 = vst [vmem:[#allocation22_spill] sm:$0xff] %v4794_v62 }
 0x2bf   :  { %3642 = vpow2.f32 %v1073_v42  ;;  %v1014_v42 = vsub.f32 %v4522_v15, %v4737_v37 }
 0x2c0   :  { %3644 = vpow2.f32 %v1035_v52 }
 0x2c1   :  { %v4796_v58 = vpop.eup %3640  ;;  %v1075_v45 = vmul.f32 1.442695, %v1014_v42  ;;  %v782_v42 = vpop.f32.mrf.mxu3 }
 0x2c2   :  { %6059 = vst [vmem:[#allocation23_spill] sm:$0xff] %v4796_v58  ;;  %v1179_v0 = vsel %vm872_vm5, %v4796_v58, 0.0 }
 0x2c5   :  { %958 = vmax.xlane.f32.xlu1 %v957_v55  ;;  %1150 = vadd.xlane.f32.xlu0 %v1149_v7  ;;  %v4803_v55 = vpop.eup %3642  ;;  %v914_v7 = vpop.xlane.xlu1 %913 }
 0x2c6   :  { %6060 = vst [vmem:[#allocation24_spill] sm:$0xff] %v4803_v55  ;;  %v1173_v32 = vsel %vm872_vm5, %v4803_v55, 0.0  ;;  %v4812_v26 = vpop.eup %3644  ;;  %v1006_v52 = vsub.f32 %v4566_v59, %v914_v7 }
 0x2cd   :  { %1144 = vadd.xlane.f32.xlu1 %v1143_v53  ;;  %1180 = vadd.xlane.f32.xlu0 %v1179_v0  ;;  %v944_v40 = vpop.xlane.xlu1 %943 }
 0x2d0   :  { %v965_v36 = vpop.xlane.xlu2 %964 }
 0x2d1   :  { %v1023_v38 = vsub.f32 %v4588_v35, %v965_v36  ;;  %v1116_v35 = vsel %vm872_vm5, %v4812_v26, 0.0 }
 0x2d3   :  { %v1093_v11 = vmul.f32 1.442695, %v1023_v38 }
 0x2d5   :  { %3646 = vpow2.f32 %v1093_v11  ;;  %1174 = vadd.xlane.f32.xlu1 %v1173_v32  ;;  %v1059_v11 = vmul.f32 1.442695, %v1006_v52  ;;  %v4830_v32 = vadd.f32 %v782_v42, %v4691_v43 }
 0x2d6   :  { %3648 = vpow2.f32 %v1075_v45  ;;  %v4827_v45 = vpop.xlane.xlu1 %886 }
 0x2d7   :  { %6063 = vst [vmem:[#allocation27_spill] sm:$0xff] %v4830_v32  ;;  %3650 = vpow2.f32 %v1059_v11 }
 0x2d8   :  { %v4810_v53 = vpop.xlane.xlu2 %967 }
 0x2db   :  { %v4814_v0 = vpop.eup %3646 }
 0x2dc   :  { %6061 = vst [vmem:[#allocation25_spill] sm:$0xff] %v4814_v0  ;;  %v1203_v15 = vsel %vm872_vm5, %v4814_v0, 0.0  ;;  %v4822_v37 = vpop.eup %3648  ;;  %v1016_v0 = vsub.f32 %v4573_v6, %v944_v40 }
 0x2dd   :  { %1117 = vadd.xlane.f32.xlu1 %v1116_v35  ;;  %1204 = vadd.xlane.f32.xlu2 %v1203_v15  ;;  %6062 = vst [vmem:[#allocation26_spill] sm:$0xff] %v4822_v37  ;;  %v1176_v36 = vsel %vm872_vm5, %v4822_v37, 0.0  ;;  %v960_v35 = vsel %vm872_vm5, %v4830_v32, -inf  ;;  %v4840_v19 = vpop.eup %3650 }
 0x2de   :  { %v4836_v15 = vpop.xlane.xlu1 %889  ;;  %v1152_v42 = vsel %vm872_vm5, %v4840_v19, 0.0 }
 0x2e0   :  { %v4820_v38 = vpop.xlane.xlu2 %970 }
 0x2e5   :  { %1177 = vadd.xlane.f32.xlu2 %v1176_v36 }
 0x2e8   :  { %v4832_v22 = vpop.xlane.xlu2 %973 }
 0x2ed   :  { %961 = vmax.xlane.f32.xlu2 %v960_v35 }
 0x2f0   :  { %v4838_v59 = vpop.xlane.xlu0 %976  ;;  %v926_v7 = vpop.xlane.xlu2 %925 }
 0x2f1   :  { %v1010_v36 = vsub.f32 %v4651_v8, %v926_v7 }
 0x2f3   :  { %v1067_v52 = vmul.f32 1.442695, %v1010_v36 }
 0x2f5   :  { %1153 = vadd.xlane.f32.xlu2 %v1152_v42  ;;  %3652 = vpow2.f32 %v1067_v52  ;;  %v1079_v52 = vmul.f32 1.442695, %v1016_v0 }
 0x2f8   :  { %v4845_v11 = vpop.xlane.xlu1 %979  ;;  %v4847_v14 = vpop.xlane.xlu0 %916 }
 0x2f9   :  { %v899_v35 = vpop.xlane.xlu2 %898 }
 0x2fa   :  { %v1001_v58 = vsub.f32 %v4674_v44, %v899_v35 }
 0x2fb   :  { %v4850_v37 = vpop.eup %3652 }
 0x2fc   :  { %6064 = vst [vmem:[#allocation28_spill] sm:$0xff] %v4850_v37  ;;  %v1049_v55 = vmul.f32 1.442695, %v1001_v58  ;;  %v1164_v8 = vsel %vm872_vm5, %v4850_v37, 0.0 }
 0x2fd   :  { %1165 = vadd.xlane.f32.xlu1 %v1164_v8  ;;  %v866_v8 = vpop.f32.mrf.mxu0 }
 0x2fe   :  { %3654 = vpow2.f32 %v1049_v55  ;;  %v4879_v62 = vadd.f32 %v866_v8, %v4665_v54  ;;  %v995_v54 = vsub.f32 %v4532_v18, %v4776_v21 }
 0x2ff   :  { %3656 = vpow2.f32 %v1079_v52 }
 0x300   :  { %v4855_v7 = vpop.xlane.xlu1 %919  ;;  %v4857_v36 = vpop.xlane.xlu0 %946 }
 0x301   :  { %v932_v6 = vpop.xlane.xlu2 %931 }
 0x302   :  { %v1012_v55 = vsub.f32 %v4697_v48, %v932_v6  ;;  %v987_v48 = vsel %vm872_vm5, %v4879_v62, -inf }
 0x304   :  { %v4859_v42 = vpop.eup %3654  ;;  %v1071_v37 = vmul.f32 1.442695, %v1012_v55 }
 0x305   :  { %6065 = vst [vmem:[#allocation29_spill] sm:$0xff] %v4859_v42  ;;  %v1137_v44 = vsel %vm872_vm5, %v4859_v42, 0.0  ;;  %v4867_v35 = vpop.eup %3656  ;;  %v996_v42 = vsub.f32 %v4550_v49, %v4790_v33 }
 0x306   :  { %1138 = vadd.xlane.f32.xlu1 %v1137_v44  ;;  %6067 = vst [vmem:[#allocation31_spill] sm:$0xff] %v4867_v35  ;;  %v1182_v0 = vsel %vm872_vm5, %v4867_v35, 0.0  ;;  %3658 = vpow2.f32 %v1071_v37  ;;  %v1037_v37 = vmul.f32 1.442695, %v995_v54 }
 0x308   :  { %v4863_v58 = vpop.xlane.xlu1 %949  ;;  %v4865_v40 = vpop.xlane.xlu0 %982 }
 0x309   :  { %6066 = vst [vmem:[#allocation30_spill] sm:$0xff] %v4865_v40 }
 0x30c   :  { %v4887_v35 = vpop.eup %3658 }
 0x30d   :  { %3619 = vrot.lane.b32.xlu2 %v4248_v9, %s3878_s28  ;;  %6068 = vst [vmem:[#allocation32_spill] sm:$0xff] %v4887_v35 }
 0x30e   :  { %1183 = vadd.xlane.f32.xlu1 %v1182_v0  ;;  %v1170_v0 = vsel %vm872_vm5, %v4887_v35, 0.0 }
 0x310   :  { %v4874_v52 = vpop.xlane.xlu1 %892  ;;  %v4876_v44 = vpop.xlane.xlu0 %985 }
 0x316   :  { %988 = vmax.xlane.f32.xlu1 %v987_v48 }
 0x318   :  { %v4883_v6 = vpop.xlane.xlu1 %922  ;;  %v4885_v9 = vpop.xlane.xlu0 %955 }
 0x31e   :  { %1171 = vadd.xlane.f32.xlu1 %v1170_v0  ;;  %v1039_v0 = vmul.f32 1.442695, %v996_v42 }
 0x320   :  { %v4891_v12 = vpop.xlane.xlu1 %952  ;;  %v902_v55 = vpop.xlane.xlu0 %901 }
 0x328   :  { %v896_v8 = vpop.xlane.xlu1 %895  ;;  %v1115_v32 = vpop.xlane.xlu0 %1114 }
 0x329   :  { %v1000_v48 = vsub.f32 %v4753_v13, %v896_v8  ;;  %3660 = vrcp.f32 %v1115_v32  ;;  %v1002_v13 = vsub.f32 %v4740_v2, %v902_v55 }
 0x32a   :  { %3662 = vpow2.f32 %v1037_v37  ;;  %v1026_v37 = vsub.f32 %v4635_v23, %v4832_v22 }
 0x32b   :  { %v1047_v31 = vmul.f32 1.442695, %v1000_v48 }
 0x32c   :  { %v1099_v33 = vmul.f32 1.442695, %v1026_v37 }
 0x32d   :  { %3664 = vpow2.f32 %v1047_v31 }
 0x32e   :  { %3666 = vpow2.f32 %v1039_v0 }
 0x32f   :  { %v3661_v35 = vpop.eup %3660 }
 0x330   :  { %v1273_v20 = vmul.f32 %v3661_v35, %v1115_v32  ;;  %v929_v25 = vpop.xlane.xlu1 %928  ;;  %v4899_v29 = vpop.eup %3662  ;;  %v997_v32 = vsub.f32 %v4582_v17, %v4827_v45  ;;  %v1027_v17 = vsub.f32 %v4655_v24, %v4838_v59  ;;  %v998_v59 = vsub.f32 %v4601_v47, %v4836_v15 }
 0x331   :  { %v1011_v40 = vsub.f32 %v4766_v41, %v929_v25  ;;  %v1119_v25 = vsel %vm872_vm5, %v4899_v29, 0.0  ;;  %v1051_v41 = vmul.f32 1.442695, %v1002_v13 }
 0x332   :  { %v1313_v18 = vsub.f32 2.0, %v1273_v20 }
 0x333   :  { %v4901_v21 = vpop.eup %3664  ;;  %v1069_v54 = vmul.f32 1.442695, %v1011_v40  ;;  %v1041_v40 = vmul.f32 1.442695, %v997_v32 }
 0x334   :  { %v1353_v49 = vmul.f32 %v3661_v35, %v1313_v18  ;;  %v1134_v31 = vsel %vm872_vm5, %v4901_v21, 0.0  ;;  %v4916_v22 = vpop.eup %3666 }
 0x335   :  { %3668 = vpow2.f32 %v1069_v54  ;;  %1135 = vadd.xlane.f32.xlu0 %v1134_v31  ;;  %v1101_v54 = vmul.f32 1.442695, %v1027_v17 }
 0x336   :  { %v1393_v20 = vmul.f32 %v4755_v46, %v1353_v49  ;;  %1120 = vadd.xlane.f32.xlu2 %v1119_v25  ;;  %3670 = vpow2.f32 %v1051_v41  ;;  %v1148_v46 = vpop.xlane.xlu0 %1147 }
 0x337   :  { %3624 = vrot.lane.b32.xlu1 %v4226_v4, %s3878_s28  ;;  %3672 = vpow2.f32 %v1099_v33  ;;  %v1122_v4 = vsel %vm872_vm5, %v4916_v22, 0.0 }
 0x338   :  { %v4913_v2 = vpop.xlane.xlu1 %958  ;;  %3239 = vmatmul.msk.f32.vlgmr.msrb.gmra.mxu1 %vm872_vm5, %v1393_v20  ;;  %3674 = vrcp.f32 %v1148_v46 }
 0x33b   :  { %v4918_v23 = vpop.eup %3668 }
 0x33c   :  { %v1167_v42 = vsel %vm872_vm5, %v4918_v23, 0.0  ;;  %v4926_v55 = vpop.eup %3670 }
 0x33d   :  { %1168 = vadd.xlane.f32.xlu0 %v1167_v42  ;;  %v4928_v8 = vpop.eup %3672  ;;  %v1140_v45 = vsel %vm872_vm5, %v4926_v55, 0.0 }
 0x33e   :  { %1123 = vadd.xlane.f32.xlu2 %v1122_v4  ;;  %v1212_v48 = vsel %vm872_vm5, %v4928_v8, 0.0  ;;  %v3675_v0 = vpop.eup %3674  ;;  %v1151_v18 = vpop.xlane.xlu0 %1150  ;;  %v1043_v4 = vmul.f32 1.442695, %v998_v59 }
 0x33f   :  { %v1284_v25 = vmul.f32 %v3675_v0, %v1148_v46 }
 0x340   :  { %v1145_v35 = vpop.xlane.xlu1 %1144 }
 0x341   :  { %3676 = vrcp.f32 %v1145_v35  ;;  %v1324_v33 = vsub.f32 2.0, %v1284_v25 }
 0x342   :  { %3678 = vpow2.f32 %v1041_v40  ;;  %v1017_v40 = vsub.f32 %v4694_v30, %v4857_v36 }
 0x343   :  { %3680 = vrcp.f32 %v1151_v18  ;;  %v1364_v15 = vmul.f32 %v3675_v0, %v1324_v33  ;;  %v1021_v33 = vsub.f32 %v4781_v34, %v4913_v2 }
 0x344   :  { %3682 = vpow2.f32 %v1101_v54 }
 0x345   :  { %1141 = vadd.xlane.f32.xlu0 %v1140_v45  ;;  %v1081_v45 = vmul.f32 1.442695, %v1017_v40  ;;  %v1404_v30 = vmul.f32 %v4768_v16, %v1364_v15  ;;  %v1030_v16 = vsub.f32 %v4720_v51, %v4876_v44 }
 0x346   :  { %1213 = vadd.xlane.f32.xlu2 %v1212_v48 }
 0x347   :  { %v3677_v13 = vpop.eup %3676 }
 0x348   :  { %v1283_v37 = vmul.f32 %v3677_v13, %v1145_v35  ;;  %v4936_v49 = vpop.xlane.xlu1 %1174  ;;  %v4938_v31 = vpop.eup %3678 }
 0x349   :  { %v1125_v41 = vsel %vm872_vm5, %v4938_v31, 0.0  ;;  %v3681_v42 = vpop.eup %3680 }
 0x34a   :  { %v1323_v24 = vsub.f32 2.0, %v1283_v37  ;;  %v4950_v47 = vpop.eup %3682  ;;  %v1285_v17 = vmul.f32 %v3681_v42, %v1151_v18  ;;  %v1020_v37 = vsub.f32 %v4730_v27, %v4885_v9 }
 0x34b   :  { %v1215_v48 = vsel %vm872_vm5, %v4950_v47, 0.0 }
 0x34c   :  { %v1363_v20 = vmul.f32 %v3677_v13, %v1323_v24  ;;  %v1325_v13 = vsub.f32 2.0, %v1285_v17  ;;  %v1087_v24 = vmul.f32 1.442695, %v1020_v37  ;;  %v1007_v37 = vsub.f32 %v4671_v60, %v4847_v14 }
 0x34e   :  { %v1403_v32 = vmul.f32 %v4792_v1, %v1363_v20  ;;  %1126 = vadd.xlane.f32.xlu2 %v1125_v41  ;;  %v999_v1 = vsub.f32 %v4717_v10, %v4874_v52  ;;  %v1365_v52 = vmul.f32 %v3681_v42, %v1325_v13  ;;  %v1107_v41 = vmul.f32 1.442695, %v1030_v16 }
 0x350   :  { %v1118_v35 = vpop.xlane.xlu1 %1117  ;;  %v4947_v46 = vpop.xlane.xlu2 %1204  ;;  %3249 = vmatmul.msk.f32.vlgmr.msrb.gmra.mxu2 %vm872_vm5, %v1403_v32  ;;  %v1045_v54 = vmul.f32 1.442695, %v999_v1 }
 0x351   :  { %3684 = vrcp.f32 %v1118_v35 }
 0x352   :  { %3686 = vpow2.f32 %v1043_v4 }
 0x353   :  { %3688 = vpow2.f32 %v1081_v45  ;;  %v1024_v45 = vsub.f32 %v4607_v56, %v4810_v53  ;;  %v1025_v53 = vsub.f32 %v4624_v3, %v4820_v38  ;;  %v1008_v38 = vsub.f32 %v4688_v63, %v4855_v7 }
 0x354   :  { %3690 = vpow2.f32 %v1045_v54 }
 0x355   :  { %3692 = vpow2.f32 %v1087_v24 }
 0x356   :  { %1216 = vadd.xlane.f32.xlu2 %v1215_v48  ;;  %3694 = vpow2.f32 %v1107_v41 }
 0x357   :  { %v3685_v36 = vpop.eup %3684 }
 0x358   :  { %v1274_v0 = vmul.f32 %v3685_v36, %v1118_v35  ;;  %v4959_v18 = vpop.xlane.xlu2 %1177  ;;  %3250 = vmatmul.msk.f32.gmra.mxu2 %vm872_vm5, %v1404_v30  ;;  %v4964_v10 = vpop.eup %3686 }
 0x359   :  { %3614 = vrot.lane.b32.xlu0 %v4232_v5, %s3878_s28  ;;  %v1128_v27 = vsel %vm872_vm5, %v4964_v10, 0.0  ;;  %v4970_v9 = vpop.eup %3688  ;;  %v1405_v5 = vmul.f32 %v4783_v57, %v1365_v52  ;;  %v1061_v52 = vmul.f32 1.442695, %v1007_v37 }
 0x35a   :  { %v1314_v25 = vsub.f32 2.0, %v1274_v0  ;;  %v1185_v51 = vsel %vm872_vm5, %v4970_v9, 0.0  ;;  %v4982_v44 = vpop.eup %3690 }
 0x35b   :  { %v1131_v57 = vsel %vm872_vm5, %v4982_v44, 0.0  ;;  %v4986_v42 = vpop.eup %3692 }
 0x35c   :  { %v1354_v59 = vmul.f32 %v3685_v36, %v1314_v25  ;;  %v1194_v2 = vsel %vm872_vm5, %v4986_v42, 0.0  ;;  %v4990_v4 = vpop.eup %3694  ;;  %v1095_v36 = vmul.f32 1.442695, %v1024_v45 }
 0x35d   :  { %v1224_v40 = vsel %vm872_vm5, %v4990_v4, 0.0 }
 0x35e   :  { %1129 = vadd.xlane.f32.xlu2 %v1128_v27  ;;  %v1394_v20 = vmul.f32 %v4812_v26, %v1354_v59  ;;  %v1089_v26 = vmul.f32 1.442695, %v1021_v33  ;;  %v1063_v33 = vmul.f32 1.442695, %v1008_v38 }
 0x360   :  { %v4976_v32 = vpop.xlane.xlu2 %961  ;;  %3240 = vmatmul.msk.f32.gmra.mxu1 %vm872_vm5, %v1394_v20  ;;  %3251 = vmatmul.msk.f32.gmra.mxu2 %vm872_vm5, %v1405_v5  ;;  %3696 = vpow2.f32 %v1089_v26  ;;  %v869_v5 = vpop.f32.mrf.mxu0  ;;  %v1018_v26 = vsub.f32 %v4708_v39, %v4863_v58 }
 0x361   :  { %1186 = vadd.xlane.f32.xlu1 %v1185_v51  ;;  %v5028_v51 = vadd.f32 %v869_v5, %v4691_v43  ;;  %v5040_v43 = vpop.xlane.xlu0 %1180 }
 0x362   :  { %v1083_v7 = vmul.f32 1.442695, %v1018_v26 }
 0x363   :  { %v990_v63 = vsel %vm872_vm5, %v5028_v51, -inf }
 0x366   :  { %1132 = vadd.xlane.f32.xlu2 %v1131_v57  ;;  %v4994_v35 = vpop.eup %3696 }
 0x367   :  { %v1197_v48 = vsel %vm872_vm5, %v4994_v35, 0.0 }
 0x368   :  { %v1154_v34 = vpop.xlane.xlu2 %1153 }
 0x369   :  { %3698 = vrcp.f32 %v1154_v34  ;;  %1195 = vadd.xlane.f32.xlu1 %v1194_v2 }
 0x36a   :  { %3700 = vpow2.f32 %v1095_v36  ;;  %v1028_v36 = vsub.f32 %v4677_v61, %v4845_v11 }
 0x36b   :  { %3702 = vpow2.f32 %v1061_v52 }
 0x36e   :  { %1225 = vadd.xlane.f32.xlu2 %v1224_v40 }
 0x36f   :  { %v3699_v15 = vpop.eup %3698 }
 0x370   :  { %v1286_v17 = vmul.f32 %v3699_v15, %v1154_v34  ;;  %v4998_v1 = vpop.xlane.xlu1 %1165  ;;  %v5006_v56 = vpop.eup %3700  ;;  %v1009_v34 = vsub.f32 %v4727_v50, %v4883_v6 }
 0x371   :  { %1198 = vadd.xlane.f32.xlu1 %v1197_v48  ;;  %v1206_v16 = vsel %vm872_vm5, %v5006_v56, 0.0  ;;  %v5014_v24 = vpop.eup %3702  ;;  %v5042_v2 = vpop.permute.xlu2 %3619 }
 0x372   :  { %v1326_v13 = vsub.f32 2.0, %v1286_v17  ;;  %v1155_v14 = vsel %vm872_vm5, %v5014_v24, 0.0  ;;  %v1019_v17 = vsub.f32 %v4742_v28, %v4891_v12 }
 0x374   :  { %v1366_v30 = vmul.f32 %v3699_v15, %v1326_v13  ;;  %v1065_v15 = vmul.f32 1.442695, %v1009_v34  ;;  %v1085_v48 = vmul.f32 1.442695, %v1019_v17 }
 0x376   :  { %v1406_v54 = vmul.f32 %v4840_v19, %v1366_v30  ;;  %v1097_v19 = vmul.f32 1.442695, %v1025_v53 }
 0x378   :  { %3252 = vmatmul.msk.f32.gmra.mxu2 %vm872_vm5, %v1406_v54  ;;  %3704 = vpow2.f32 %v1097_v19 }
 0x379   :  { %v1139_v0 = vpop.xlane.xlu1 %1138 }
 0x37e   :  { %v5019_v3 = vpop.eup %3704 }
 0x37f   :  { %v1209_v20 = vsel %vm872_vm5, %v5019_v3, 0.0 }
 0x381   :  { %v5010_v25 = vpop.xlane.xlu1 %1183 }
 0x383   :  { %1207 = vadd.xlane.f32.xlu0 %v1206_v16 }
 0x389   :  { %v989_v59 = vpop.xlane.xlu1 %988 }
 0x38a   :  { %v1031_v60 = vsub.f32 %v4879_v62, %v989_v59  ;;  %v1103_v59 = vmul.f32 1.442695, %v1028_v36 }
 0x38b   :  { %1156 = vadd.xlane.f32.xlu0 %v1155_v14 }
 0x38c   :  { %v1109_v27 = vmul.f32 1.442695, %v1031_v60 }
 0x38e   :  { %3706 = vpow2.f32 %v1109_v27 }
 0x38f   :  { %3708 = vpow2.f32 %v1063_v33  ;;  %v6070_v33 = vld [vmem:[#allocation30_spill] sm:$0xff] }
 0x390   :  { %3710 = vpow2.f32 %v1083_v7 }
 0x391   :  { %3712 = vpow2.f32 %v1065_v15 }
 0x392   :  { %3714 = vrcp.f32 %v1139_v0 }
 0x393   :  { %1210 = vadd.xlane.f32.xlu0 %v1209_v20  ;;  %v6069_v20 = vld [vmem:[#allocation19_spill] sm:$0xff] }
 0x394   :  { %v5025_v41 = vpop.eup %3706  ;;  %v3581_v5 = vunpack.i.l.bf16 %v6069_v20  ;;  %v3582_v34 = vunpack.i.h.bf16 %v6069_v20  ;;  %v6076_v20 = vld [vmem:[#allocation5_spill] sm:$0xff] }
 0x395   :  { %v1227_v62 = vsel %vm872_vm5, %v5025_v41, 0.0  ;;  %v5036_v57 = vpop.eup %3708 }
 0x396   :  { %1228 = vadd.xlane.f32.xlu1 %v1227_v62  ;;  %v1158_v40 = vsel %vm872_vm5, %v5036_v57, 0.0  ;;  %v5046_v39 = vpop.eup %3710 }
 0x397   :  { %v1188_v6 = vsel %vm872_vm5, %v5046_v39, 0.0  ;;  %v5052_v45 = vpop.eup %3712 }
 0x398   :  { %v3715_v13 = vpop.eup %3714  ;;  %v1161_v19 = vsel %vm872_vm5, %v5052_v45, 0.0 }
 0x399   :  { %v1281_v53 = vmul.f32 %v3715_v13, %v1139_v0  ;;  %v6071_v0 = vld [vmem:[#allocation18_spill] sm:$0xff] }
 0x39a   :  { %v1029_v62 = vsub.f32 %v6071_v0, %v6070_v33 }
 0x39b   :  { %991 = vmax.xlane.f32.xlu0 %v990_v63  ;;  %v1321_v38 = vsub.f32 2.0, %v1281_v53 }
 0x39d   :  { %v1361_v15 = vmul.f32 %v3715_v13, %v1321_v38  ;;  %v6074_v13 = vld [vmem:[#allocation21_spill] sm:$0xff] }
 0x39e   :  { %v3591_v53 = vunpack.i.l.bf16 %v6074_v13 }
 0x3a3   :  { %1159 = vadd.xlane.f32.xlu0 %v1158_v40 }
 0x3a8   :  { %v1136_v58 = vpop.xlane.xlu0 %1135 }
 0x3a9   :  { %3716 = vrcp.f32 %v1136_v58  ;;  %v1121_v50 = vpop.xlane.xlu2 %1120 }
 0x3aa   :  { %3718 = vrcp.f32 %v1121_v50 }
 0x3ab   :  { %1189 = vadd.xlane.f32.xlu0 %v1188_v6  ;;  %3720 = vpow2.f32 %v1085_v48 }
 0x3af   :  { %v3717_v30 = vpop.eup %3716 }
 0x3b0   :  { %v3719_v54 = vpop.eup %3718  ;;  %v1280_v37 = vmul.f32 %v3717_v30, %v1136_v58  ;;  %v5056_v52 = vpop.xlane.xlu0 %1168 }
 0x3b1   :  { %v1275_v12 = vmul.f32 %v3719_v54, %v1121_v50  ;;  %v1124_v28 = vpop.xlane.xlu2 %1123  ;;  %v5061_v11 = vpop.eup %3720  ;;  %v1105_v50 = vmul.f32 1.442695, %v1029_v62  ;;  %v3597_v62 = vunpack.i.h.bf16 %v6076_v20 }
 0x3b2   :  { %v1320_v16 = vsub.f32 2.0, %v1280_v37  ;;  %3722 = vrcp.f32 %v1124_v28  ;;  %v1191_v58 = vsel %vm872_vm5, %v5061_v11, 0.0  ;;  %v6073_v37 = vld [vmem:[#allocation29_spill] sm:$0xff] }
 0x3b3   :  { %v1315_v14 = vsub.f32 2.0, %v1275_v12  ;;  %1162 = vadd.xlane.f32.xlu0 %v1161_v19  ;;  %3724 = vpow2.f32 %v1103_v59  ;;  %v1401_v12 = vmul.f32 %v6073_v37, %v1361_v15  ;;  %v6075_v19 = vld [vmem:[#allocation27_spill] sm:$0xff] }
 0x3b4   :  { %v1360_v60 = vmul.f32 %v3717_v30, %v1320_v16  ;;  %3726 = vrcp.f32 %v4998_v1  ;;  %v1022_v59 = vsub.f32 %v6075_v19, %v4976_v32  ;;  %v3596_v32 = vunpack.i.l.bf16 %v6076_v20 }
 0x3b5   :  { %v1355_v27 = vmul.f32 %v3719_v54, %v1315_v14 }
 0x3b6   :  { %v1400_v61 = vmul.f32 %v4901_v21, %v1360_v60  ;;  %v3592_v60 = vunpack.i.h.bf16 %v6074_v13 }
 0x3b7   :  { %v1395_v26 = vmul.f32 %v4899_v29, %v1355_v27  ;;  %v6072_v29 = vld [vmem:[#allocation20_spill] sm:$0xff] }
 0x3b8   :  { %v3723_v63 = vpop.eup %3722  ;;  %v1142_v7 = vpop.xlane.xlu0 %1141  ;;  %3246 = vmatmul.msk.f32.vlgmr.msrb.gmra.mxu3 %vm872_vm5, %v1400_v61  ;;  %v3586_v17 = vunpack.i.l.bf16 %v6072_v29  ;;  %v3587_v30 = vunpack.i.h.bf16 %v6072_v29 }
 0x3b9   :  { %v1276_v40 = vmul.f32 %v3723_v63, %v1124_v28  ;;  %3728 = vrcp.f32 %v1142_v7  ;;  %1623 = vmatpush.msrb.mxu3 %v3581_v5  ;;  %v5070_v21 = vpop.xlane.xlu2 %1213  ;;  %3241 = vmatmul.msk.f32.gmra.mxu1 %vm872_vm5, %v1395_v26  ;;  %v5076_v48 = vpop.eup %3724  ;;  %v1091_v5 = vmul.f32 1.442695, %v1022_v59 }
 0x3ba   :  { %v3727_v54 = vpop.eup %3726  ;;  %3730 = vpow2.f32 %v1105_v50 }
 0x3bb   :  { %v1316_v6 = vsub.f32 2.0, %v1276_v40  ;;  %1624 = vmatpush.msrb.mxu3 %v3582_v34  ;;  %1192 = vadd.xlane.f32.xlu0 %v1191_v58  ;;  %3732 = vrcp.f32 %v4947_v46  ;;  %v1290_v38 = vmul.f32 %v3727_v54, %v4998_v1  ;;  %v6077_v40 = vld [vmem:[#allocation22_spill] sm:$0xff] }
 0x3bc   :  { %3734 = vrcp.f32 %v5056_v52  ;;  %v3606_v15 = vunpack.i.l.bf16 %v6077_v40  ;;  %v3607_v29 = vunpack.i.h.bf16 %v6077_v40 }
 0x3bd   :  { %v1356_v36 = vmul.f32 %v3723_v63, %v1316_v6  ;;  %1625 = vmatpush.msrb.mxu3 %v3586_v17  ;;  %v1330_v63 = vsub.f32 2.0, %v1290_v38 }
 0x3bf   :  { %v3729_v28 = vpop.eup %3728  ;;  %1626 = vmatpush.msrb.mxu3 %v3587_v30  ;;  %v1396_v16 = vmul.f32 %v4916_v22, %v1356_v36  ;;  %v1218_v22 = vsel %vm872_vm5, %v5076_v48, 0.0  ;;  %v1370_v6 = vmul.f32 %v3727_v54, %v1330_v63 }
 0x3c0   :  { %v1282_v14 = vmul.f32 %v3729_v28, %v1142_v7  ;;  %3247 = vmatmul.msk.f32.gmra.mxu3 %vm872_vm5, %v1401_v12  ;;  %v5093_v0 = vpop.eup %3730  ;;  %v1172_v7 = vpop.xlane.xlu1 %1171 }
 0x3c1   :  { %1627 = vmatpush.msrb.mxu3 %v3591_v53  ;;  %v1127_v27 = vpop.xlane.xlu2 %1126  ;;  %3242 = vmatmul.msk.f32.gmra.mxu1 %vm872_vm5, %v1396_v16  ;;  %v3733_v26 = vpop.eup %3732  ;;  %v6078_v16 = vld [vmem:[#allocation28_spill] sm:$0xff] }
 0x3c2   :  { %v1322_v61 = vsub.f32 2.0, %v1282_v14  ;;  %3736 = vrcp.f32 %v1127_v27  ;;  %v3735_v34 = vpop.eup %3734  ;;  %v1303_v36 = vmul.f32 %v3733_v26, %v4947_v46  ;;  %v1410_v19 = vmul.f32 %v6078_v16, %v1370_v6 }
 0x3c3   :  { %1628 = vmatpush.msrb.mxu3 %v3592_v60  ;;  %1219 = vadd.xlane.f32.xlu0 %v1218_v22  ;;  %3738 = vpow2.f32 %v1091_v5  ;;  %v1291_v30 = vmul.f32 %v3735_v34, %v5056_v52  ;;  %v1741_v22 = vld [vmem:[%s5989_s3] sm:$0xff] }
 0x3c4   :  { %v1362_v33 = vmul.f32 %v3729_v28, %v1322_v61  ;;  %3740 = vrcp.f32 %v1172_v7  ;;  %v1343_v52 = vsub.f32 2.0, %v1303_v36  ;;  %1790 = vmatpush.msra.mxu1 %v1741_v22 }
 0x3c5   :  { %1629 = vmatpush.msrb.mxu3 %v3596_v32  ;;  %v1331_v59 = vsub.f32 2.0, %v1291_v30  ;;  %3742 = vrcp.f32 %v4936_v49  ;;  %v6080_v30 = vld [vmem:[#allocation32_spill] sm:$0xff] }
 0x3c6   :  { %v1402_v1 = vmul.f32 %v4926_v55, %v1362_v33  ;;  %v1221_v55 = vsel %vm872_vm5, %v5093_v0, 0.0  ;;  %v1383_v5 = vmul.f32 %v3733_v26, %v1343_v52 }
 0x3c7   :  { %1630 = vmatpush.msrb.mxu3 %v3597_v62  ;;  %v1371_v32 = vmul.f32 %v3735_v34, %v1331_v59  ;;  %v6081_v59 = vld [vmem:[#allocation24_spill] sm:$0xff] }
 0x3c8   :  { %v3737_v58 = vpop.eup %3736  ;;  %3248 = vmatmul.msk.f32.gmra.mxu3 %vm872_vm5, %v1402_v1  ;;  %v3625_v46 = vpop.permute.xlu1 %3624 }
 0x3c9   :  { %v1277_v17 = vmul.f32 %v3737_v58, %v1127_v27  ;;  %1631 = vmatpush.msrb.mxu3 %v3606_v15  ;;  %v5100_v50 = vpop.xlane.xlu2 %1216  ;;  %v5106_v53 = vpop.eup %3738  ;;  %v3621_v27 = vunpack.i.l.bf16 %v5042_v2  ;;  %v3626_v33 = vunpack.i.l.bf16 %v3625_v46  ;;  %v3627_v63 = vunpack.i.h.bf16 %v3625_v46  ;;  %v6079_v15 = vld [vmem:[#allocation25_spill] sm:$0xff] }
 0x3ca   :  { %v3741_v54 = vpop.eup %3740  ;;  %v1200_v61 = vsel %vm872_vm5, %v5106_v53, 0.0  ;;  %v1411_v1 = vmul.f32 %v4918_v23, %v1371_v32 }
 0x3cb   :  { %v1317_v37 = vsub.f32 2.0, %v1277_v17  ;;  %1632 = vmatpush.msrb.mxu3 %v3607_v29  ;;  %v3615_v12 = vpop.permute.xlu0 %3614  ;;  %1222 = vadd.xlane.f32.xlu0 %v1221_v55  ;;  %v1292_v20 = vmul.f32 %v3741_v54, %v1172_v7  ;;  %v3743_v40 = vpop.eup %3742 }
 0x3cc   :  { %v3616_v28 = vunpack.i.l.bf16 %v3615_v12  ;;  %v3617_v14 = vunpack.i.h.bf16 %v3615_v12  ;;  %v1293_v26 = vmul.f32 %v3743_v40, %v4936_v49 }
 0x3cd   :  { %v1357_v13 = vmul.f32 %v3737_v58, %v1317_v37  ;;  %v1332_v62 = vsub.f32 2.0, %v1292_v20  ;;  %v1423_v58 = vmul.f32 %v6079_v15, %v1383_v5 }
 0x3ce   :  { %1704 = vmatpush.msra.mxu0 %v3616_v28  ;;  %v1333_v23 = vsub.f32 2.0, %v1293_v26 }
 0x3cf   :  { %v1397_v60 = vmul.f32 %v4938_v31, %v1357_v13  ;;  %v3622_v31 = vunpack.i.h.bf16 %v5042_v2  ;;  %v1372_v34 = vmul.f32 %v3741_v54, %v1332_v62 }
 0x3d0   :  { %3256 = vmatmul.msk.f32.vlgmr.msra.gmra.mxu3 %vm872_vm5, %v1410_v19  ;;  %1705 = vmatpush.msra.mxu0 %v3617_v14  ;;  %v1373_v13 = vmul.f32 %v3743_v40, %v1333_v23 }
 0x3d1   :  { %v1130_v38 = vpop.xlane.xlu2 %1129  ;;  %3243 = vmatmul.msk.f32.gmra.mxu1 %vm872_vm5, %v1397_v60  ;;  %v1412_v55 = vmul.f32 %v6080_v30, %v1372_v34 }
 0x3d2   :  { %3744 = vrcp.f32 %v1130_v38  ;;  %1706 = vmatpush.msra.mxu0 %v3621_v27  ;;  %v1413_v14 = vmul.f32 %v6081_v59, %v1373_v13 }
 0x3d3   :  { %1201 = vadd.xlane.f32.xlu0 %v1200_v61  ;;  %3746 = vrcp.f32 %v4959_v18 }
 0x3d4   :  { %1707 = vmatpush.msra.mxu0 %v3622_v31  ;;  %v1480_v31 = vpop.f32.mrf.mxu1 }
 0x3d6   :  { %1708 = vmatpush.msra.mxu0 %v3626_v33  ;;  %v6083_v33 = vld [vmem:[#allocation23_spill] sm:$0xff] }
 0x3d8   :  { %v3745_v29 = vpop.eup %3744  ;;  %3257 = vmatmul.msk.f32.gmra.mxu3 %vm872_vm5, %v1411_v1  ;;  %1709 = vmatpush.msra.mxu0 %v3627_v63 }
 0x3d9   :  { %v1278_v2 = vmul.f32 %v3745_v29, %v1130_v38  ;;  %v1133_v7 = vpop.xlane.xlu2 %1132  ;;  %3269 = vmatmul.msk.f32.vlgmr.msra.gmra.mxu0 %vm872_vm5, %v1423_v58  ;;  %v3747_v36 = vpop.eup %3746 }
 0x3da   :  { %3748 = vrcp.f32 %v1133_v7  ;;  %v1294_v49 = vmul.f32 %v3747_v36, %v4959_v18  ;;  %v1187_v38 = vpop.xlane.xlu1 %1186  ;;  %v6082_v18 = vld [vmem:[#allocation26_spill] sm:$0xff] }
 0x3db   :  { %v1318_v17 = vsub.f32 2.0, %v1278_v2  ;;  %3750 = vrcp.f32 %v5040_v43 }
 0x3dc   :  { %v1334_v54 = vsub.f32 2.0, %v1294_v49  ;;  %3752 = vrcp.f32 %v5010_v25 }
 0x3dd   :  { %v1358_v6 = vmul.f32 %v3745_v29, %v1318_v17  ;;  %3754 = vrcp.f32 %v1187_v38  ;;  %v1483_v63 = vpop.f32.mrf.mxu1 }
 0x3de   :  { %v1374_v27 = vmul.f32 %v3747_v36, %v1334_v54 }
 0x3df   :  { %v1398_v37 = vmul.f32 %v4964_v10, %v1358_v6 }
 0x3e0   :  { %v3749_v12 = vpop.eup %3748  ;;  %3258 = vmatmul.msk.f32.gmra.mxu3 %vm872_vm5, %v1412_v55  ;;  %v1414_v61 = vmul.f32 %v6082_v18, %v1374_v27 }
 0x3e1   :  { %v1279_v28 = vmul.f32 %v3749_v12, %v1133_v7  ;;  %3244 = vmatmul.msk.f32.gmra.mxu1 %vm872_vm5, %v1398_v37  ;;  %v3751_v52 = vpop.eup %3750  ;;  %v6084_v7 = vld [vmem:[#allocation31_spill] sm:$0xff] }
 0x3e2   :  { %v1295_v10 = vmul.f32 %v3751_v52, %v5040_v43  ;;  %v3753_v22 = vpop.eup %3752 }
 0x3e3   :  { %v1319_v16 = vsub.f32 2.0, %v1279_v28  ;;  %v1296_v20 = vmul.f32 %v3753_v22, %v5010_v25  ;;  %v3755_v43 = vpop.eup %3754 }
 0x3e4   :  { %v1335_v46 = vsub.f32 2.0, %v1295_v10  ;;  %v1297_v40 = vmul.f32 %v3755_v43, %v1187_v38 }
 0x3e5   :  { %v1359_v19 = vmul.f32 %v3749_v12, %v1319_v16  ;;  %v1336_v32 = vsub.f32 2.0, %v1296_v20 }
 0x3e6   :  { %v1337_v58 = vsub.f32 2.0, %v1297_v40 }
 0x3e7   :  { %v1399_v60 = vmul.f32 %v4982_v44, %v1359_v19  ;;  %v1375_v44 = vmul.f32 %v3751_v52, %v1335_v46  ;;  %v1376_v1 = vmul.f32 %v3753_v22, %v1336_v32 }
 0x3e8   :  { %3259 = vmatmul.msk.f32.vlgmr.msrb.gmra.mxu3 %vm872_vm5, %v1413_v14  ;;  %v1377_v34 = vmul.f32 %v3755_v43, %v1337_v58 }
 0x3e9   :  { %3245 = vmatmul.msk.f32.gmra.mxu1 %vm872_vm5, %v1399_v60  ;;  %v1415_v62 = vmul.f32 %v6083_v33, %v1375_v44  ;;  %v1416_v26 = vmul.f32 %v6084_v7, %v1376_v1 }
 0x3ea   :  { %v1417_v36 = vmul.f32 %v4970_v9, %v1377_v34 }
 0x3f0   :  { %3260 = vmatmul.msk.f32.gmra.mxu3 %vm872_vm5, %v1414_v61 }
 0x3f1   :  { %3279 = vmatmul.msk.f32.vlgmr.msra.gmra.mxu1 %vm523_vm1, %v1480_v31  ;;  %v1742_v31 = vld [vmem:[%s5989_s3 + $0x8] sm:$0xff] }
 0x3f2   :  { %1867 = vmatpush.msra.mxu2 %v1742_v31 }
 0x3f6   :  { %v1208_v5 = vpop.xlane.xlu0 %1207 }
 0x3f7   :  { %3756 = vrcp.f32 %v1208_v5 }
 0x3f8   :  { %3261 = vmatmul.msk.f32.gmra.mxu3 %vm872_vm5, %v1415_v62 }
 0x3f9   :  { %3280 = vmatmul.msk.f32.gmra.mxu1 %vm523_vm1, %v1483_v63  ;;  %v1196_v63 = vpop.xlane.xlu1 %1195 }
 0x3fd   :  { %v3757_v15 = vpop.eup %3756 }
 0x3fe   :  { %v1304_v29 = vmul.f32 %v3757_v15, %v1208_v5  ;;  %v1157_v2 = vpop.xlane.xlu0 %1156 }
 0x3ff   :  { %3758 = vrcp.f32 %v1157_v2 }
 0x400   :  { %v1344_v25 = vsub.f32 2.0, %v1304_v29  ;;  %3262 = vmatmul.msk.f32.gmra.mxu3 %vm872_vm5, %v1416_v26  ;;  %3760 = vrcp.f32 %v5070_v21 }
 0x402   :  { %v1384_v17 = vmul.f32 %v3757_v15, %v1344_v25 }
 0x404   :  { %v1424_v6 = vmul.f32 %v5006_v56, %v1384_v17 }
 0x405   :  { %v3759_v23 = vpop.eup %3758 }
 0x406   :  { %v1287_v30 = vmul.f32 %v3759_v23, %v1157_v2  ;;  %v1211_v55 = vpop.xlane.xlu0 %1210  ;;  %3270 = vmatmul.msk.f32.gmra.mxu0 %vm872_vm5, %v1424_v6  ;;  %v3761_v28 = vpop.eup %3760 }
 0x407   :  { %3762 = vrcp.f32 %v1211_v55  ;;  %v1306_v59 = vmul.f32 %v3761_v28, %v5070_v21  ;;  %v1199_v2 = vpop.xlane.xlu1 %1198 }
 0x408   :  { %v1327_v37 = vsub.f32 2.0, %v1287_v30  ;;  %3263 = vmatmul.msk.f32.gmra.mxu3 %vm872_vm5, %v1417_v36  ;;  %3764 = vrcp.f32 %v5100_v50  ;;  %v1557_v30 = vpop.f32.mrf.mxu2  ;;  %v1226_v36 = vpop.xlane.xlu2 %1225 }
 0x409   :  { %v1346_v52 = vsub.f32 2.0, %v1306_v59 }
 0x40a   :  { %v1367_v12 = vmul.f32 %v3759_v23, %v1327_v37 }
 0x40b   :  { %v1386_v27 = vmul.f32 %v3761_v28, %v1346_v52 }
 0x40c   :  { %v1407_v13 = vmul.f32 %v5014_v24, %v1367_v12 }
 0x40d   :  { %v3763_v49 = vpop.eup %3762  ;;  %v1426_v18 = vmul.f32 %v4928_v8, %v1386_v27 }
 0x40e   :  { %v1305_v16 = vmul.f32 %v3763_v49, %v1211_v55  ;;  %v992_v56 = vpop.xlane.xlu0 %991  ;;  %3253 = vmatmul.msk.f32.gmra.mxu2 %vm872_vm5, %v1407_v13  ;;  %v3765_v10 = vpop.eup %3764 }
 0x40f   :  { %v1032_v19 = vsub.f32 %v5028_v51, %v992_v56  ;;  %v1307_v46 = vmul.f32 %v3765_v10, %v5100_v50 }
 0x410   :  { %v1345_v9 = vsub.f32 2.0, %v1305_v16 }
 0x411   :  { %v1111_v14 = vmul.f32 1.442695, %v1032_v19  ;;  %v1347_v21 = vsub.f32 2.0, %v1307_v46 }
 0x412   :  { %v1385_v54 = vmul.f32 %v3763_v49, %v1345_v9 }
 0x413   :  { %3766 = vpow2.f32 %v1111_v14  ;;  %v1387_v50 = vmul.f32 %v3765_v10, %v1347_v21 }
 0x414   :  { %v1425_v60 = vmul.f32 %v5019_v3, %v1385_v54  ;;  %v1229_v54 = vpop.xlane.xlu1 %1228 }
 0x415   :  { %v1427_v32 = vmul.f32 %v4950_v47, %v1387_v50 }
 0x416   :  { %v1160_v24 = vpop.xlane.xlu0 %1159  ;;  %3271 = vmatmul.msk.f32.gmra.mxu0 %vm872_vm5, %v1425_v60 }
 0x417   :  { %3768 = vrcp.f32 %v1160_v24 }
 0x419   :  { %v5160_v38 = vpop.eup %3766 }
 0x41a   :  { %v1230_v51 = vsel %vm872_vm5, %v5160_v38, 0.0 }
 0x41b   :  { %1231 = vadd.xlane.f32.xlu2 %v1230_v51 }
 0x41d   :  { %v3769_v61 = vpop.eup %3768 }
 0x41e   :  { %v1288_v22 = vmul.f32 %v3769_v61, %v1160_v24  ;;  %v1190_v3 = vpop.xlane.xlu0 %1189  ;;  %3272 = vmatmul.msk.f32.gmra.mxu0 %vm872_vm5, %v1426_v18 }
 0x41f   :  { %3770 = vrcp.f32 %v1190_v3 }
 0x420   :  { %v1328_v44 = vsub.f32 2.0, %v1288_v22 }
 0x422   :  { %v1368_v20 = vmul.f32 %v3769_v61, %v1328_v44 }
 0x424   :  { %v1408_v5 = vmul.f32 %v5036_v57, %v1368_v20 }
 0x425   :  { %v3771_v33 = vpop.eup %3770 }
 0x426   :  { %v1298_v8 = vmul.f32 %v3771_v33, %v1190_v3  ;;  %v1163_v62 = vpop.xlane.xlu0 %1162  ;;  %3254 = vmatmul.msk.f32.gmra.mxu2 %vm872_vm5, %v1408_v5  ;;  %3273 = vmatmul.msk.f32.gmra.mxu0 %vm872_vm5, %v1427_v32 }
 0x427   :  { %3772 = vrcp.f32 %v1163_v62 }
 0x428   :  { %v1338_v43 = vsub.f32 2.0, %v1298_v8  ;;  %3774 = vrcp.f32 %v1196_v63 }
 0x42a   :  { %v1378_v1 = vmul.f32 %v3771_v33, %v1338_v43 }
 0x42c   :  { %v1418_v40 = vmul.f32 %v5046_v39, %v1378_v1 }
 0x42d   :  { %v3773_v15 = vpop.eup %3772 }
 0x42e   :  { %v1289_v58 = vmul.f32 %v3773_v15, %v1163_v62  ;;  %v1193_v29 = vpop.xlane.xlu0 %1192  ;;  %3264 = vmatmul.msk.f32.gmra.mxu3 %vm872_vm5, %v1418_v40  ;;  %v3775_v7 = vpop.eup %3774 }
 0x42f   :  { %3776 = vrcp.f32 %v1193_v29  ;;  %v1300_v39 = vmul.f32 %v3775_v7, %v1196_v63 }
 0x430   :  { %v1329_v47 = vsub.f32 2.0, %v1289_v58  ;;  %3778 = vrcp.f32 %v1199_v2 }
 0x431   :  { %v1340_v28 = vsub.f32 2.0, %v1300_v39 }
 0x432   :  { %v1369_v57 = vmul.f32 %v3773_v15, %v1329_v47 }
 0x433   :  { %v1380_v19 = vmul.f32 %v3775_v7, %v1340_v28 }
 0x434   :  { %v1409_v26 = vmul.f32 %v5052_v45, %v1369_v57 }
 0x435   :  { %v3777_v25 = vpop.eup %3776  ;;  %v1420_v27 = vmul.f32 %v4986_v42, %v1380_v19 }
 0x436   :  { %v1299_v34 = vmul.f32 %v3777_v25, %v1193_v29  ;;  %v1220_v17 = vpop.xlane.xlu0 %1219  ;;  %v1486_v6 = vpop.f32.mrf.mxu1  ;;  %3255 = vmatmul.msk.f32.gmra.mxu2 %vm872_vm5, %v1409_v26 }
 0x437   :  { %3780 = vrcp.f32 %v1220_v17  ;;  %3281 = vmatmul.msk.f32.gmra.mxu1 %vm523_vm1, %v1486_v6  ;;  %v3779_v12 = vpop.eup %3778 }
 0x438   :  { %v1339_v23 = vsub.f32 2.0, %v1299_v34  ;;  %3782 = vrcp.f32 %v1226_v36  ;;  %v1301_v59 = vmul.f32 %v3779_v12, %v1199_v2  ;;  %v1744_v34 = vld [vmem:[%s5989_s3 + $0x18] sm:$0xff] }
 0x43a   :  { %v1379_v55 = vmul.f32 %v3777_v25, %v1339_v23  ;;  %v1341_v10 = vsub.f32 2.0, %v1301_v59 }
 0x43b   :  { %v5178_v37 = vpop.f32.mrf.mxu3 }
 0x43c   :  { %v1419_v45 = vmul.f32 %v5061_v11, %v1379_v55  ;;  %v1560_v11 = vpop.f32.mrf.mxu2  ;;  %v1381_v61 = vmul.f32 %v3779_v12, %v1341_v10 }
 0x43d   :  { %v3781_v13 = vpop.eup %3780 }
 0x43e   :  { %v1308_v49 = vmul.f32 %v3781_v13, %v1220_v17  ;;  %v1223_v16 = vpop.xlane.xlu0 %1222  ;;  %v1489_v56 = vpop.f32.mrf.mxu1  ;;  %3265 = vmatmul.msk.f32.gmra.mxu3 %vm872_vm5, %v1419_v45  ;;  %3289 = vmatmul.msk.f32.vlgmr.msra.gmra.mxu2 %vm523_vm1, %v1557_v30  ;;  %v1421_v42 = vmul.f32 %v4994_v35, %v1381_v61  ;;  %v1743_v35 = vld [vmem:[%s5989_s3 + $0x10] sm:$0xff] }
 0x43f   :  { %3784 = vrcp.f32 %v1223_v16  ;;  %3282 = vmatmul.msk.f32.gmra.mxu1 %vm523_vm1, %v1489_v56  ;;  %v3783_v60 = vpop.eup %3782  ;;  %3401 = vmatpush.msra.mxu3 %v1743_v35 }
 0x440   :  { %v1348_v9 = vsub.f32 2.0, %v1308_v49  ;;  %3786 = vrcp.f32 %v1229_v54  ;;  %v1310_v18 = vmul.f32 %v3783_v60, %v1226_v36  ;;  %1944 = vmatpush.msrb.mxu0 %v1743_v35 }
 0x442   :  { %v1388_v14 = vmul.f32 %v3781_v13, %v1348_v9  ;;  %2021 = vmatpush.msra.mxu0 %v1744_v34 }
 0x443   :  { %v1504_v52 = vpop.f32.mrf.mxu3 }
 0x444   :  { %v1428_v24 = vmul.f32 %v5076_v48, %v1388_v14  ;;  %v1350_v48 = vsub.f32 2.0, %v1310_v18  ;;  %v1563_v32 = vpop.f32.mrf.mxu2 }
 0x445   :  { %v3785_v46 = vpop.eup %3784 }
 0x446   :  { %v1309_v51 = vmul.f32 %v3785_v46, %v1223_v16  ;;  %v1202_v21 = vpop.xlane.xlu0 %1201  ;;  %3266 = vmatmul.msk.f32.gmra.mxu3 %vm872_vm5, %v1420_v27  ;;  %3274 = vmatmul.msk.f32.gmra.mxu0 %vm872_vm5, %v1428_v24  ;;  %v3787_v50 = vpop.eup %3786  ;;  %v1390_v8 = vmul.f32 %v3783_v60, %v1350_v48 }
 0x447   :  { %3788 = vrcp.f32 %v1202_v21  ;;  %3290 = vmatmul.msk.f32.gmra.mxu2 %vm523_vm1, %v1560_v11  ;;  %v1311_v62 = vmul.f32 %v3787_v50, %v1229_v54 }
 0x448   :  { %v1349_v22 = vsub.f32 2.0, %v1309_v51 }
 0x449   :  { %v1351_v40 = vsub.f32 2.0, %v1311_v62 }
 0x44a   :  { %v1389_v3 = vmul.f32 %v3785_v46, %v1349_v22 }
 0x44b   :  { %v1507_v31 = vpop.f32.mrf.mxu3  ;;  %v1391_v29 = vmul.f32 %v3787_v50, %v1351_v40 }
 0x44c   :  { %v1429_v44 = vmul.f32 %v5093_v0, %v1389_v3  ;;  %v1430_v0 = vmul.f32 %v4990_v4, %v1390_v8  ;;  %v1566_v58 = vpop.f32.mrf.mxu2 }
 0x44d   :  { %v3789_v20 = vpop.eup %3788  ;;  %v1431_v57 = vmul.f32 %v5025_v41, %v1391_v29 }
 0x44e   :  { %v1302_v5 = vmul.f32 %v3789_v20, %v1202_v21  ;;  %v1492_v33 = vpop.f32.mrf.mxu1  ;;  %3267 = vmatmul.msk.f32.gmra.mxu3 %vm872_vm5, %v1421_v42  ;;  %3275 = vmatmul.msk.f32.gmra.mxu0 %vm872_vm5, %v1429_v44 }
 0x44f   :  { %3291 = vmatmul.msk.f32.gmra.mxu2 %vm523_vm1, %v1563_v32  ;;  %3283 = vmatmul.msk.f32.gmra.mxu1 %vm523_vm1, %v1492_v33 }
 0x450   :  { %v1342_v43 = vsub.f32 2.0, %v1302_v5 }
 0x452   :  { %v1382_v63 = vmul.f32 %v3789_v20, %v1342_v43 }
 0x453   :  { %v1578_v1 = vpop.f32.mrf.mxu3 }
 0x454   :  { %v1422_v15 = vmul.f32 %v5106_v53, %v1382_v63 }
 0x456   :  { %3268 = vmatmul.msk.f32.gmra.mxu3 %vm872_vm5, %v1422_v15  ;;  %3276 = vmatmul.msk.f32.gmra.mxu0 %vm872_vm5, %v1430_v0  ;;  %v1711_v12 = vpop.f32.mrf.mxu0 }
 0x457   :  { %3292 = vmatmul.msk.f32.gmra.mxu2 %vm523_vm1, %v1566_v58 }
 0x45b   :  { %v1581_v47 = vpop.f32.mrf.mxu3 }
 0x45e   :  { %v1495_v2 = vpop.f32.mrf.mxu1  ;;  %3277 = vmatmul.msk.f32.gmra.mxu0 %vm872_vm5, %v1431_v57 }
 0x45f   :  { %3284 = vmatmul.msk.f32.gmra.mxu1 %vm523_vm1, %v1495_v2 }
 0x463   :  { %v1584_v4 = vpop.f32.mrf.mxu3 }
 0x466   :  { %v1498_v53 = vpop.f32.mrf.mxu1 }
 0x467   :  { %3285 = vmatmul.msk.f32.gmra.mxu1 %vm523_vm1, %v1498_v53 }
 0x46b   :  { %v1634_v7 = vpop.f32.mrf.mxu3 }
 0x46e   :  { %v1792_v46 = vpop.f32.mrf.mxu1 }
 0x46f   :  { %3286 = vmatmul.msk.f32.gmra.mxu1 %vm523_vm1, %v5178_v37 }
 0x473   :  { %v1637_v26 = vpop.f32.mrf.mxu3 }
 0x474   :  { %3300 = vmatmul.msk.f32.vlgmr.msra.gmra.mxu3 %vm523_vm1, %v1637_v26 }
 0x477   :  { %3287 = vmatmul.msk.f32.gmra.mxu1 %vm523_vm1, %v1504_v52 }
 0x47b   :  { %v1640_v25 = vpop.f32.mrf.mxu3 }
 0x47c   :  { %3301 = vmatmul.msk.f32.gmra.mxu3 %vm523_vm1, %v1640_v25 }
 0x47f   :  { %3288 = vmatmul.msk.f32.gmra.mxu1 %vm523_vm1, %v1507_v31  ;;  %v1795_v31 = vpop.f32.mrf.mxu1 }
 0x483   :  { %v1643_v41 = vpop.f32.mrf.mxu3  ;;  %v1714_v45 = vpop.f32.mrf.mxu0 }
 0x484   :  { %3302 = vmatmul.msk.f32.gmra.mxu3 %vm523_vm1, %v1643_v41 }
 0x48b   :  { %v1646_v17 = vpop.f32.mrf.mxu3 }
 0x48c   :  { %3303 = vmatmul.msk.f32.gmra.mxu3 %vm523_vm1, %v1646_v17 }
 0x48e   :  { %v1232_v6 = vpop.xlane.xlu2 %1231 }
 0x48f   :  { %3790 = vrcp.f32 %v1232_v6 }
 0x491   :  { %v1569_v39 = vpop.f32.mrf.mxu2 }
 0x492   :  { %3293 = vmatmul.msk.f32.gmra.mxu2 %vm523_vm1, %v1569_v39 }
 0x493   :  { %v1717_v49 = vpop.f32.mrf.mxu0 }
 0x495   :  { %v3791_v23 = vpop.eup %3790 }
 0x496   :  { %v1312_v30 = vmul.f32 %v3791_v23, %v1232_v6 }
 0x498   :  { %v1352_v55 = vsub.f32 2.0, %v1312_v30 }
 0x49a   :  { %v1392_v36 = vmul.f32 %v3791_v23, %v1352_v55 }
 0x49c   :  { %v1432_v37 = vmul.f32 %v5160_v38, %v1392_v36  ;;  %v1720_v38 = vpop.f32.mrf.mxu0 }
 0x49e   :  { %3278 = vmatmul.msk.f32.gmra.mxu0 %vm872_vm5, %v1432_v37 }
 0x4a4   :  { %v1723_v19 = vpop.f32.mrf.mxu0 }
 0x4a6   :  { %3299 = vmatmul.msk.f32.vlgmr.msrb.gmra.mxu0 %vm523_vm1, %v1634_v7 }
 0x4a9   :  { %v1572_v28 = vpop.f32.mrf.mxu2 }
 0x4aa   :  { %3294 = vmatmul.msk.f32.gmra.mxu2 %vm523_vm1, %v1572_v28 }
 0x4ae   :  { %3309 = vmatmul.msk.f32.vlgmr.msra.gmra.mxu0 %vm523_vm1, %v1711_v12 }
 0x4b1   :  { %v1649_v13 = vpop.f32.mrf.mxu3 }
 0x4b2   :  { %3304 = vmatmul.msk.f32.gmra.mxu3 %vm523_vm1, %v1649_v13 }
 0x4b4   :  { %v1798_v32 = vpop.f32.mrf.mxu1 }
 0x4b6   :  { %3310 = vmatmul.msk.f32.gmra.mxu0 %vm523_vm1, %v1714_v45 }
 0x4b9   :  { %v1575_v16 = vpop.f32.mrf.mxu2 }
 0x4ba   :  { %3295 = vmatmul.msk.f32.gmra.mxu2 %vm523_vm1, %v1575_v16 }
 0x4bc   :  { %v1801_v63 = vpop.f32.mrf.mxu1 }
 0x4be   :  { %3311 = vmatmul.msk.f32.gmra.mxu0 %vm523_vm1, %v1717_v49 }
 0x4c1   :  { %v1652_v56 = vpop.f32.mrf.mxu3  ;;  %v1869_v24 = vpop.f32.mrf.mxu2 }
 0x4c2   :  { %3296 = vmatmul.msk.f32.gmra.mxu2 %vm523_vm1, %v1578_v1  ;;  %3305 = vmatmul.msk.f32.gmra.mxu3 %vm523_vm1, %v1652_v56  ;;  %v2053_v51 = vadd.f32 %v1869_v24, %v1792_v46 }
 0x4c3   :  { %v1726_v9 = vpop.f32.mrf.mxu0 }
 0x4c6   :  { %3312 = vmatmul.msk.f32.gmra.mxu0 %vm523_vm1, %v1720_v38 }
 0x4c9   :  { %v1655_v59 = vpop.f32.mrf.mxu3 }
 0x4ca   :  { %3297 = vmatmul.msk.f32.gmra.mxu2 %vm523_vm1, %v1581_v47  ;;  %3306 = vmatmul.msk.f32.gmra.mxu3 %vm523_vm1, %v1655_v59  ;;  %v1872_v18 = vpop.f32.mrf.mxu2 }
 0x4cb   :  { %v1729_v54 = vpop.f32.mrf.mxu0  ;;  %v2054_v50 = vadd.f32 %v1872_v18, %v1795_v31 }
 0x4cc   :  { %v1804_v40 = vpop.f32.mrf.mxu1 }
 0x4ce   :  { %3313 = vmatmul.msk.f32.gmra.mxu0 %vm523_vm1, %v1723_v19 }
 0x4d1   :  { %v1658_v14 = vpop.f32.mrf.mxu3 }
 0x4d2   :  { %3298 = vmatmul.msk.f32.gmra.mxu2 %vm523_vm1, %v1584_v4  ;;  %3307 = vmatmul.msk.f32.gmra.mxu3 %vm523_vm1, %v1658_v14  ;;  %v1875_v20 = vpop.f32.mrf.mxu2 }
 0x4d3   :  { %v1732_v60 = vpop.f32.mrf.mxu0  ;;  %v2055_v33 = vadd.f32 %v1875_v20, %v1798_v32  ;;  %v6087_v20 = vld [vmem:[#allocation7_spill] sm:$0xff] }
 0x4d4   :  { %v6088_v32 = vcvt.s32.f32 %v6087_v20  ;;  %v6095_v20 = vld [vmem:[#allocation12_spill] sm:$0xff] }
 0x4d6   :  { %3314 = vmatmul.msk.f32.gmra.mxu0 %vm523_vm1, %v1726_v9 }
 0x4d9   :  { %v1661_v52 = vpop.f32.mrf.mxu3 }
 0x4da   :  { %3308 = vmatmul.msk.f32.gmra.mxu3 %vm523_vm1, %v1661_v52  ;;  %v1878_v1 = vpop.f32.mrf.mxu2  ;;  %v3629_v52 = vld [vmem:[%s5990_s4] ss:$0 sm:$0xff] }
 0x4db   :  { %v1735_v11 = vpop.f32.mrf.mxu0 }
 0x4dc   :  { %v1807_v47 = vpop.f32.mrf.mxu1 }
 0x4de   :  { %3315 = vmatmul.msk.f32.gmra.mxu0 %vm523_vm1, %v1729_v54 }
 0x4e4   :  { %v1810_v7 = vpop.f32.mrf.mxu1 }
 0x4e6   :  { %3316 = vmatmul.msk.f32.gmra.mxu0 %vm523_vm1, %v1732_v60 }
 0x4ec   :  { %v1813_v34 = vpop.f32.mrf.mxu1 }
 0x4ee   :  { %3317 = vmatmul.msk.f32.gmra.mxu0 %vm523_vm1, %v1735_v11 }
 0x4f4   :  { %v1816_v23 = vpop.f32.mrf.mxu1 }
 0x4f7   :  { %v1949_v3 = vpop.f32.mrf.mxu3 }
 0x4f8   :  { %v2064_v48 = vadd.f32 %v2054_v50, %v1949_v3  ;;  %v3832_v3 = vld [vmem:[%s5986_s0 + $0x48] sm:$0xff]  ;;  %v6085_v50 = vld [vmem:[#allocation6_spill] sm:$0xff] }
 0x4fc   :  { %v1819_v12 = vpop.f32.mrf.mxu1 }
 0x4ff   :  { %v1952_v5 = vpop.f32.mrf.mxu3 }
 0x500   :  { %v2065_v8 = vadd.f32 %v2055_v33, %v1952_v5  ;;  %v141_v5 = vmul.f32 0.025, %v6088_v32  ;;  %v6096_v32 = vcvt.s32.f32 %v6095_v20 }
 0x502   :  { %vm3507_vm11 = vcmp.lt.s32.totalorder %v141_v5, 0 }
 0x507   :  { %v1955_v35 = vpop.f32.mrf.mxu3 }
 0x50f   :  { %v1958_v58 = vpop.f32.mrf.mxu3 }
 0x515   :  { %v1881_v15 = vpop.f32.mrf.mxu2 }
 0x516   :  { %v2057_v54 = vadd.f32 %v1881_v15, %v1804_v40 }
 0x51b   :  { %v1738_v10 = vpop.f32.mrf.mxu0 }
 0x51c   :  { %3318 = vmatmul.msk.f32.gmra.mxu0 %vm523_vm1, %v1738_v10 }
 0x523   :  { %v1946_v27 = vpop.f32.mrf.mxu0 }
 0x524   :  { %v2063_v21 = vadd.f32 %v2053_v51, %v1946_v27  ;;  %v2056_v51 = vadd.f32 %v1878_v1, %v1801_v63  ;;  %v3833_v63 = vld [vmem:[%s5986_s0 + $0x40] sm:$0xff] }
 0x526   :  { %v2066_v33 = vadd.f32 %v2056_v51, %v1955_v35 }
 0x52b   :  { %v2023_v61 = vpop.f32.mrf.mxu0 }
 0x52c   :  { %v5242_v22 = vadd.f32 %v2063_v21, %v2023_v61  ;;  %v2067_v61 = vadd.f32 %v2057_v54, %v1958_v58  ;;  %v3834_v58 = vld [vmem:[%s5986_s0 + $0x38] sm:$0xff] }
 0x52d   :  { %v1884_v57 = vpop.f32.mrf.mxu2 }
 0x52e   :  { %v2058_v59 = vadd.f32 %v1884_v57, %v1807_v47  ;;  %v3508_v57 = vceil.f32 %v141_v5 }
 0x533   :  { %v2026_v42 = vpop.f32.mrf.mxu0 }
 0x534   :  { %v5244_v44 = vadd.f32 %v2064_v48, %v2026_v42  ;;  %v6086_v48 = vcvt.s32.f32 %v6085_v50 }
 0x535   :  { %v1961_v2 = vpop.f32.mrf.mxu3 }
 0x536   :  { %v2068_v10 = vadd.f32 %v2058_v59, %v1961_v2  ;;  %v121_v42 = vmul.f32 0.025, %v6086_v48  ;;  %v3509_v2 = vfloor.f32 %v141_v5  ;;  %v125_v5 = vmul.f32 0.025, %v6096_v32 }
 0x538   :  { %v3458_v35 = vceil.f32 %v121_v42  ;;  %vm3457_vm1 = vcmp.lt.s32.totalorder %v121_v42, 0  ;;  %vm3477_vm4 = vcmp.lt.s32.totalorder %v125_v5, 0 }
 0x53b   :  { %v2029_v62 = vpop.f32.mrf.mxu0 }
 0x53c   :  { %v5246_v43 = vadd.f32 %v2065_v8, %v2029_v62 }
 0x53d   :  { %v1887_v53 = vpop.f32.mrf.mxu2 }
 0x53e   :  { %v2059_v38 = vadd.f32 %v1887_v53, %v1810_v7 }
 0x543   :  { %v2032_v0 = vpop.f32.mrf.mxu0 }
 0x544   :  { %v2076_v40 = vadd.f32 %v2066_v33, %v2032_v0  ;;  %v3835_v0 = vld [vmem:[%s5986_s0 + $0x30] sm:$0xff] }
 0x545   :  { %v1964_v26 = vpop.f32.mrf.mxu3  ;;  %v1890_v41 = vpop.f32.mrf.mxu2 }
 0x546   :  { %v2060_v28 = vadd.f32 %v1890_v41, %v1813_v34  ;;  %v2069_v60 = vadd.f32 %v2059_v38, %v1964_v26  ;;  %v2090_v7 = vadd.f32 %v3629_v52, %v2076_v40  ;;  %v3836_v26 = vld [vmem:[%s5986_s0 + $0x28] sm:$0xff]  ;;  %v3510_v34 = vsel %vm3507_vm11, %v3508_v57, %v3509_v2 }
 0x547   :  { %v3840_v38 = vld [vmem:[%s5986_s0 + $0x8] sm:$0xff] }
 0x54b   :  { %v2035_v29 = vpop.f32.mrf.mxu0 }
 0x54c   :  { %v2077_v8 = vadd.f32 %v2067_v61, %v2035_v29  ;;  %v3459_v29 = vfloor.f32 %v121_v42 }
 0x54d   :  { %v1967_v17 = vpop.f32.mrf.mxu3  ;;  %v1893_v39 = vpop.f32.mrf.mxu2 }
 0x54e   :  { %v2061_v37 = vadd.f32 %v1893_v39, %v1816_v23  ;;  %v2070_v16 = vadd.f32 %v2060_v28, %v1967_v17  ;;  %v3460_v41 = vsel %vm3457_vm1, %v3458_v35, %v3459_v29  ;;  %v6089_v17 = vld [vmem:[#allocation8_spill] sm:$0xff]  ;;  %v2089_v23 = vadd.f32 %v3629_v52, %v5246_v43  ;;  %v3838_v28 = vld [vmem:[%s5986_s0 + $0x18] sm:$0xff] }
 0x54f   :  { %v5300_v43 = vadd.f32 %v3838_v28, %v2090_v7  ;;  %v6099_v7 = vld [vmem:[#allocation17_spill] sm:$0xff] }
 0x553   :  { %v2038_v4 = vpop.f32.mrf.mxu0 }
 0x554   :  { %v2078_v21 = vadd.f32 %v2068_v10, %v2038_v4  ;;  %v2091_v4 = vadd.f32 %v3629_v52, %v2077_v8 }
 0x555   :  { %v1970_v30 = vpop.f32.mrf.mxu3  ;;  %v1896_v36 = vpop.f32.mrf.mxu2 }
 0x556   :  { %v2062_v13 = vadd.f32 %v1896_v36, %v1819_v12  ;;  %v2071_v49 = vadd.f32 %v2061_v37, %v1970_v30  ;;  %v2092_v15 = vadd.f32 %v3629_v52, %v2078_v21  ;;  %v3837_v30 = vld [vmem:[%s5986_s0 + $0x20] sm:$0xff]  ;;  %v3461_v36 = vcvt.f32.s32 %v3460_v41 }
 0x557   :  { %v5293_v37 = vcvt.f32.s32 %v3510_v34  ;;  %v2088_v12 = vadd.f32 %v3629_v52, %v5244_v44 }
 0x559   :  { %vm143_vm13 = vcmp.eq.s32.totalorder %v3461_v36, %v5293_v37  ;;  %v6101_v36 = vld [vmem:[#allocation14_spill] sm:$0xff] }
 0x55b   :  { %v2041_v25 = vpop.f32.mrf.mxu0 }
 0x55c   :  { %v2079_v24 = vadd.f32 %v2069_v60, %v2041_v25  ;;  %v5282_v25 = vadd.f32 %v3836_v26, %v2092_v15  ;;  %v6097_v15 = vld [vmem:[#allocation13_spill] sm:$0xff]  ;;  %v6100_v26 = vcvt.s32.f32 %v6099_v7 }
 0x55d   :  { %v1973_v45 = vpop.f32.mrf.mxu3 }
 0x55e   :  { %v2072_v56 = vadd.f32 %v2062_v13, %v1973_v45  ;;  %v2093_v62 = vadd.f32 %v3629_v52, %v2079_v24  ;;  %v127_v41 = vmul.f32 0.025, %v6100_v26 }
 0x560   :  { %v5276_v53 = vadd.f32 %v3835_v0, %v2093_v62  ;;  %v3478_v62 = vceil.f32 %v125_v5  ;;  %vm3487_vm9 = vcmp.lt.s32.totalorder %v127_v41, 0 }
 0x563   :  { %v2044_v6 = vpop.f32.mrf.mxu0 }
 0x564   :  { %v2080_v9 = vadd.f32 %v2070_v16, %v2044_v6  ;;  %v6090_v6 = vcvt.s32.f32 %v6089_v17  ;;  %v3839_v16 = vld [vmem:[%s5986_s0 + $0x10] sm:$0xff] }
 0x565   :  { %v5307_v44 = vadd.f32 %v3839_v16, %v2089_v23  ;;  %v3489_v23 = vfloor.f32 %v127_v41 }
 0x566   :  { %v2094_v18 = vadd.f32 %v3629_v52, %v2080_v9  ;;  %v122_v39 = vmul.f32 0.025, %v6090_v6 }
 0x568   :  { %v5269_v47 = vadd.f32 %v3834_v58, %v2094_v18  ;;  %v3463_v45 = vceil.f32 %v122_v39  ;;  %v3464_v13 = vfloor.f32 %v122_v39  ;;  %vm3462_vm12 = vcmp.lt.s32.totalorder %v122_v39, 0 }
 0x569   :  { %v6098_v58 = vcvt.s32.f32 %v6097_v15  ;;  %v3488_v39 = vceil.f32 %v127_v41 }
 0x56b   :  { %v2047_v55 = vpop.f32.mrf.mxu0  ;;  %v126_v35 = vmul.f32 0.025, %v6098_v58 }
 0x56c   :  { %v2081_v19 = vadd.f32 %v2071_v49, %v2047_v55  ;;  %v5291_v55 = vadd.f32 %v3837_v30, %v2091_v4  ;;  %v2087_v49 = vadd.f32 %v3629_v52, %v5242_v22  ;;  %v6091_v22 = vld [vmem:[#allocation10_spill] sm:$0xff]  ;;  %v3490_v30 = vsel %vm3487_vm9, %v3488_v39, %v3489_v23 }
 0x56d   :  { %v6092_v59 = vcvt.s32.f32 %v6091_v22  ;;  %v3483_v2 = vceil.f32 %v126_v35  ;;  %v3484_v4 = vfloor.f32 %v126_v35  ;;  %vm3482_vm7 = vcmp.lt.s32.totalorder %v126_v35, 0 }
 0x56e   :  { %v2095_v27 = vadd.f32 %v3629_v52, %v2081_v19  ;;  %v3465_v19 = vsel %vm3462_vm12, %v3463_v45, %v3464_v13  ;;  %v3491_v13 = vcvt.f32.s32 %v3490_v30 }
 0x56f   :  { %v123_v9 = vmul.f32 0.025, %v6092_v59  ;;  %v3485_v0 = vsel %vm3482_vm7, %v3483_v2, %v3484_v4 }
 0x570   :  { %v5264_v1 = vadd.f32 %v3833_v63, %v2095_v27  ;;  %v3479_v63 = vfloor.f32 %v125_v5  ;;  %v3486_v6 = vcvt.f32.s32 %v3485_v0  ;;  %vm149_vm11 = vcmp.eq.s32.totalorder %v3491_v13, %v5293_v37 }
 0x571   :  { %v3468_v10 = vceil.f32 %v123_v9  ;;  %v3469_v24 = vfloor.f32 %v123_v9  ;;  %vm3467_vm14 = vcmp.lt.s32.totalorder %v123_v9, 0 }
 0x572   :  { %v3480_v40 = vsel %vm3477_vm4, %v3478_v62, %v3479_v63  ;;  %vm148_vm10 = vcmp.eq.s32.totalorder %v3486_v6, %v5293_v37 }
 0x573   :  { %v3470_v27 = vsel %vm3467_vm14, %v3468_v10, %v3469_v24  ;;  %v3481_v57 = vcvt.f32.s32 %v3480_v40 }
 0x574   :  { %v3471_v61 = vcvt.f32.s32 %v3470_v27  ;;  %v6105_v27 = vld [vmem:[#allocation16_spill] sm:$0xff] }
 0x575   :  { %vm147_vm8 = vcmp.eq.s32.totalorder %v3481_v57, %v5293_v37 }
 0x576   :  { %vm145_vm3 = vcmp.eq.s32.totalorder %v3471_v61, %v5293_v37 }
 0x599   :  { %v2050_v14 = vpop.f32.mrf.mxu0 }
 0x59a   :  { %v2082_v11 = vadd.f32 %v2072_v56, %v2050_v14  ;;  %v5314_v56 = vadd.f32 %v3840_v38, %v2088_v12  ;;  %v3841_v14 = vld [vmem:[%s5986_s0] sm:$0xff]  ;;  %v6102_v12 = vcvt.s32.f32 %v6101_v36 }
 0x59b   :  { %v5322_v54 = vadd.f32 %v3841_v14, %v2087_v49 }
 0x59c   :  { %v2096_v46 = vadd.f32 %v3629_v52, %v2082_v11  ;;  %v3880_v52 = vmov 0.0   ;;  %v3466_v11 = vcvt.f32.s32 %v3465_v19  ;;  %v128_v28 = vmul.f32 0.025, %v6102_v12  ;;  %v6103_v19 = vld [vmem:[#allocation15_spill] sm:$0xff] }
 0x59d   :  { %v5325_v60 = vsel %vm143_vm13, 0.00078125, %v3880_v52  ;;  %v5342_v33 = vsel %vm145_vm3, 0.00078125, %v3880_v52  ;;  %v5358_v34 = vsel %vm147_vm8, 0.00078125, %v3880_v52  ;;  %v6104_v22 = vcvt.s32.f32 %v6103_v19 }
 0x59e   :  { %v5254_v31 = vadd.f32 %v3832_v3, %v2096_v46  ;;  %vm144_vm15 = vcmp.eq.s32.totalorder %v3466_v11, %v5293_v37  ;;  %v6093_v46 = vld [vmem:[#allocation11_spill] sm:$0xff]  ;;  %v5366_v45 = vsel %vm148_vm10, 0.00078125, %v3880_v52  ;;  %v3493_v49 = vceil.f32 %v128_v28 }
 0x59f   :  { %v6094_v51 = vcvt.s32.f32 %v6093_v46  ;;  %v5334_v18 = vsel %vm144_vm15, 0.00078125, %v3880_v52  ;;  %v3494_v16 = vfloor.f32 %v128_v28  ;;  %vm3492_vm1 = vcmp.lt.s32.totalorder %v128_v28, 0 }
 0x5a0   :  { %2143 = vmatpush.msrb.mxu1 %v5254_v31  ;;  %v129_v59 = vmul.f32 0.025, %v6104_v22  ;;  %v5374_v9 = vsel %vm149_vm11, 0.00078125, %v3880_v52  ;;  %v6106_v46 = vcvt.s32.f32 %v6105_v27 }
 0x5a1   :  { %v124_v21 = vmul.f32 0.025, %v6094_v51  ;;  %v3495_v38 = vsel %vm3492_vm1, %v3493_v49, %v3494_v16 }
 0x5a2   :  { %2144 = vmatpush.msrb.mxu1 %v5264_v1  ;;  %v3496_v14 = vcvt.f32.s32 %v3495_v38  ;;  %v3498_v11 = vceil.f32 %v129_v59  ;;  %v3499_v10 = vfloor.f32 %v129_v59  ;;  %vm3497_vm12 = vcmp.lt.s32.totalorder %v129_v59, 0 }
 0x5a3   :  { %v3473_v3 = vceil.f32 %v124_v21  ;;  %v3474_v48 = vfloor.f32 %v124_v21  ;;  %vm3472_vm2 = vcmp.lt.s32.totalorder %v124_v21, 0  ;;  %v130_v51 = vmul.f32 0.025, %v6106_v46 }
 0x5a4   :  { %2145 = vmatpush.msrb.mxu1 %v5269_v47  ;;  %vm150_vm13 = vcmp.eq.s32.totalorder %v3496_v14, %v5293_v37  ;;  %v3500_v24 = vsel %vm3497_vm12, %v3498_v11, %v3499_v10 }
 0x5a5   :  { %v3475_v42 = vsel %vm3472_vm2, %v3473_v3, %v3474_v48  ;;  %v5382_v21 = vsel %vm150_vm13, 0.00078125, %v3880_v52  ;;  %v3501_v61 = vcvt.f32.s32 %v3500_v24  ;;  %v3503_v3 = vceil.f32 %v130_v51 }
 0x5a6   :  { %2146 = vmatpush.msrb.mxu1 %v5276_v53  ;;  %v3476_v8 = vcvt.f32.s32 %v3475_v42  ;;  %v3504_v48 = vfloor.f32 %v130_v51  ;;  %vm3502_vm14 = vcmp.lt.s32.totalorder %v130_v51, 0 }
 0x5a7   :  { %vm151_vm15 = vcmp.eq.s32.totalorder %v3501_v61, %v5293_v37 }
 0x5a8   :  { %2147 = vmatpush.msrb.mxu1 %v5282_v25  ;;  %vm146_vm6 = vcmp.eq.s32.totalorder %v3476_v8, %v5293_v37  ;;  %v3505_v42 = vsel %vm3502_vm14, %v3503_v3, %v3504_v48  ;;  %v5388_v20 = vsel %vm151_vm15, 0.00078125, %v3880_v52 }
 0x5a9   :  { %v5350_v29 = vsel %vm146_vm6, 0.00078125, %v3880_v52  ;;  %v3506_v32 = vcvt.f32.s32 %v3505_v42 }
 0x5aa   :  { %2148 = vmatpush.msrb.mxu1 %v5291_v55 }
 0x5ab   :  { %vm152_vm2 = vcmp.eq.s32.totalorder %v3506_v32, %v5293_v37 }
 0x5ac   :  { %2149 = vmatpush.msrb.mxu1 %v5300_v43  ;;  %v5394_v5 = vsel %vm152_vm2, 0.00078125, %v3880_v52 }
 0x5ae   :  { %2150 = vmatpush.msrb.mxu1 %v5307_v44 }
 0x5b0   :  { %2151 = vmatpush.msrb.mxu1 %v5314_v56 }
 0x5b2   :  { %2152 = vmatpush.msrb.mxu1 %v5322_v54 }
 0x5b3   :  { %3319 = vmatmul.msk.f32.vlgmr.msrb.gmra.mxu1 %vm872_vm5, %v5325_v60 }
 0x5bb   :  { %3320 = vmatmul.msk.f32.gmra.mxu1 %vm872_vm5, %v5334_v18 }
 0x5c3   :  { %3321 = vmatmul.msk.f32.gmra.mxu1 %vm872_vm5, %v5342_v33 }
 0x5cb   :  { %3322 = vmatmul.msk.f32.gmra.mxu1 %vm872_vm5, %v5350_v29 }
 0x5d3   :  { %3323 = vmatmul.msk.f32.gmra.mxu1 %vm872_vm5, %v5358_v34 }
 0x5db   :  { %3324 = vmatmul.msk.f32.gmra.mxu1 %vm872_vm5, %v5366_v45 }
 0x5e3   :  { %3325 = vmatmul.msk.f32.gmra.mxu1 %vm872_vm5, %v5374_v9 }
 0x5eb   :  { %3326 = vmatmul.msk.f32.gmra.mxu1 %vm872_vm5, %v5382_v21 }
 0x5f3   :  { %3327 = vmatmul.msk.f32.gmra.mxu1 %vm872_vm5, %v5388_v20 }
 0x5fb   :  { %3328 = vmatmul.msk.f32.gmra.mxu1 %vm872_vm5, %v5394_v5 }
 0x630   :  { %v2154_v8 = vpop.f32.mrf.mxu1 }
 0x631   :  { %v2184_v36 = vsel %vm175_vm0, %v2154_v8, 0.0 }
 0x638   :  { %v2157_v62 = vpop.f32.mrf.mxu1 }
 0x639   :  { %v2187_v26 = vsel %vm175_vm0, %v2157_v62, 0.0 }
 0x640   :  { %v2160_v63 = vpop.f32.mrf.mxu1 }
 0x641   :  { %v2190_v39 = vsel %vm175_vm0, %v2160_v63, 0.0 }
 0x648   :  { %v2163_v40 = vpop.f32.mrf.mxu1 }
 0x649   :  { %v2193_v30 = vsel %vm175_vm0, %v2163_v40, 0.0 }
 0x650   :  { %v2166_v15 = vpop.f32.mrf.mxu1 }
 0x651   :  { %v2196_v37 = vsel %vm175_vm0, %v2166_v15, 0.0 }
 0x658   :  { %v2169_v58 = vpop.f32.mrf.mxu1 }
 0x659   :  { %v2199_v41 = vsel %vm175_vm0, %v2169_v58, 0.0 }
 0x660   :  { %v2172_v35 = vpop.f32.mrf.mxu1 }
 0x661   :  { %v2202_v23 = vsel %vm175_vm0, %v2172_v35, 0.0 }
 0x668   :  { %v2175_v57 = vpop.f32.mrf.mxu1 }
 0x669   :  { %v2205_v2 = vsel %vm175_vm0, %v2175_v57, 0.0 }
 0x66a   :  { %2206 = vadd.xlane.f32.xlu2 %v2205_v2 }
 0x670   :  { %v2178_v4 = vpop.f32.mrf.mxu1 }
 0x671   :  { %v2208_v0 = vsel %vm175_vm0, %v2178_v4, 0.0 }
 0x672   :  { %2197 = vadd.xlane.f32.xlu2 %v2196_v37  ;;  %2209 = vadd.xlane.f32.xlu1 %v2208_v0 }
 0x678   :  { %v2181_v7 = vpop.f32.mrf.mxu1 }
 0x679   :  { %v2211_v6 = vsel %vm175_vm0, %v2181_v7, 0.0 }
 0x67a   :  { %2188 = vadd.xlane.f32.xlu2 %v2187_v26  ;;  %2200 = vadd.xlane.f32.xlu1 %v2199_v41 }
 0x67b   :  { %2212 = vadd.xlane.f32.xlu0 %v2211_v6 }
 0x682   :  { %2191 = vadd.xlane.f32.xlu1 %v2190_v39 }
 0x683   :  { %2203 = vadd.xlane.f32.xlu0 %v2202_v23 }
 0x68b   :  { %2194 = vadd.xlane.f32.xlu0 %v2193_v30 }
 0x693   :  { %2185 = vadd.xlane.f32.xlu0 %v2184_v36  ;;  %v2524_v36 = vld [vmem:[%s5993_s7 + $0x18] sm:$0xff] }
 0x694   :  { %2571 = vmatpush.msrb.mxu3 %v2524_v36 }
 0x6dd   :  { %v2207_v28 = vpop.xlane.xlu2 %2206 }
 0x6de   :  { %v5415_v38 = vsub.f32 %v5269_v47, %v2207_v28 }
 0x6e0   :  { %v2231_v11 = vmul.f32 %v5415_v38, %v5415_v38 }
 0x6e5   :  { %v2210_v12 = vpop.xlane.xlu1 %2209  ;;  %v2198_v14 = vpop.xlane.xlu2 %2197 }
 0x6e6   :  { %v5409_v49 = vsub.f32 %v5264_v1, %v2210_v12  ;;  %v5430_v10 = vsub.f32 %v5291_v55, %v2198_v14  ;;  %v2523_v12 = vld [vmem:[%s5993_s7 + $0x10] sm:$0xff] }
 0x6e7   :  { %2572 = vmatpush.msrb.mxu3 %v2523_v12 }
 0x6e8   :  { %v2232_v59 = vmul.f32 %v5409_v49, %v5409_v49  ;;  %v2228_v51 = vmul.f32 %v5430_v10, %v5430_v10 }
 0x6ed   :  { %v2201_v22 = vpop.xlane.xlu1 %2200 }
 0x6ee   :  { %v2213_v13 = vpop.xlane.xlu0 %2212 }
 0x6ef   :  { %v5412_v16 = vsub.f32 %v5254_v31, %v2213_v13  ;;  %v5424_v31 = vsub.f32 %v5282_v25, %v2201_v22  ;;  %v2189_v25 = vpop.xlane.xlu2 %2188  ;;  %v2522_v13 = vld [vmem:[%s5993_s7 + $0x8] sm:$0xff]  ;;  %v2521_v22 = vld [vmem:[%s5993_s7] sm:$0xff]  ;;  %s3137_s7 = sshll.u32 %s5999_s13, 4  ;;  %s3138_s7 = int_to_ptr.hbm [resolvable:$true] %s3137_s7 }
 0x6f0   :  { %v5445_v3 = vsub.f32 %v5314_v56, %v2189_v25  ;;  %2573 = vmatpush.msrb.mxu3 %v2522_v13 }
 0x6f1   :  { %v2233_v19 = vmul.f32 %v5412_v16, %v5412_v16  ;;  %v2229_v27 = vmul.f32 %v5424_v31, %v5424_v31 }
 0x6f2   :  { %v2225_v32 = vmul.f32 %v5445_v3, %v5445_v3  ;;  %2574 = vmatpush.msrb.mxu3 %v2521_v22 }
 0x6f3   :  { %2240 = vmatpush.msrb.mxu2 %v2233_v19 }
 0x6f5   :  { %2241 = vmatpush.msrb.mxu2 %v2232_v59  ;;  %v2192_v46 = vpop.xlane.xlu1 %2191 }
 0x6f6   :  { %v2204_v1 = vpop.xlane.xlu0 %2203 }
 0x6f7   :  { %v5427_v47 = vsub.f32 %v5276_v53, %v2204_v1  ;;  %2242 = vmatpush.msrb.mxu2 %v2231_v11  ;;  %v5439_v53 = vsub.f32 %v5307_v44, %v2192_v46 }
 0x6f9   :  { %v2230_v24 = vmul.f32 %v5427_v47, %v5427_v47  ;;  %v2226_v42 = vmul.f32 %v5439_v53, %v5439_v53 }
 0x6fb   :  { %2243 = vmatpush.msrb.mxu2 %v2230_v24 }
 0x6fd   :  { %2244 = vmatpush.msrb.mxu2 %v2229_v27 }
 0x6fe   :  { %v2195_v61 = vpop.xlane.xlu0 %2194 }
 0x6ff   :  { %v5442_v55 = vsub.f32 %v5300_v43, %v2195_v61  ;;  %2245 = vmatpush.msrb.mxu2 %v2228_v51 }
 0x701   :  { %v2227_v48 = vmul.f32 %v5442_v55, %v5442_v55 }
 0x703   :  { %2246 = vmatpush.msrb.mxu2 %v2227_v48 }
 0x705   :  { %2247 = vmatpush.msrb.mxu2 %v2226_v42 }
 0x706   :  { %v2186_v44 = vpop.xlane.xlu0 %2185 }
 0x707   :  { %v5454_v8 = vsub.f32 %v5322_v54, %v2186_v44  ;;  %2248 = vmatpush.msrb.mxu2 %v2225_v32 }
 0x709   :  { %v2224_v43 = vmul.f32 %v5454_v8, %v5454_v8 }
 0x70b   :  { %2249 = vmatpush.msrb.mxu2 %v2224_v43 }
 0x70c   :  { %3329 = vmatmul.msk.f32.vlgmr.msrb.gmra.mxu2 %vm872_vm5, %v5325_v60 }
 0x714   :  { %3330 = vmatmul.msk.f32.gmra.mxu2 %vm872_vm5, %v5334_v18 }
 0x71c   :  { %3331 = vmatmul.msk.f32.gmra.mxu2 %vm872_vm5, %v5342_v33 }
 0x724   :  { %3332 = vmatmul.msk.f32.gmra.mxu2 %vm872_vm5, %v5350_v29 }
 0x72c   :  { %3333 = vmatmul.msk.f32.gmra.mxu2 %vm872_vm5, %v5358_v34 }
 0x734   :  { %3334 = vmatmul.msk.f32.gmra.mxu2 %vm872_vm5, %v5366_v45 }
 0x73c   :  { %3335 = vmatmul.msk.f32.gmra.mxu2 %vm872_vm5, %v5374_v9 }
 0x744   :  { %3336 = vmatmul.msk.f32.gmra.mxu2 %vm872_vm5, %v5382_v21 }
 0x74c   :  { %3337 = vmatmul.msk.f32.gmra.mxu2 %vm872_vm5, %v5388_v20 }
 0x754   :  { %3338 = vmatmul.msk.f32.gmra.mxu2 %vm872_vm5, %v5394_v5 }
 0x78f   :  { %v2251_v56 = vpop.f32.mrf.mxu2 }
 0x790   :  { %v2281_v54 = vsel %vm175_vm0, %v2251_v56, 0.0 }
 0x791   :  { %2282 = vadd.xlane.f32.xlu1 %v2281_v54 }
 0x797   :  { %v2254_v62 = vpop.f32.mrf.mxu2 }
 0x798   :  { %v2284_v63 = vsel %vm175_vm0, %v2254_v62, 0.0 }
 0x799   :  { %2285 = vadd.xlane.f32.xlu2 %v2284_v63 }
 0x79f   :  { %v2257_v40 = vpop.f32.mrf.mxu2 }
 0x7a0   :  { %v2287_v15 = vsel %vm175_vm0, %v2257_v40, 0.0 }
 0x7a1   :  { %2288 = vadd.xlane.f32.xlu0 %v2287_v15 }
 0x7a7   :  { %v2260_v58 = vpop.f32.mrf.mxu2 }
 0x7a8   :  { %v2290_v35 = vsel %vm175_vm0, %v2260_v58, 0.0 }
 0x7a9   :  { %2291 = vadd.xlane.f32.xlu1 %v2290_v35 }
 0x7af   :  { %v2263_v57 = vpop.f32.mrf.mxu2 }
 0x7b0   :  { %v2293_v2 = vsel %vm175_vm0, %v2263_v57, 0.0 }
 0x7b1   :  { %2294 = vadd.xlane.f32.xlu2 %v2293_v2 }
 0x7b7   :  { %v2266_v4 = vpop.f32.mrf.mxu2 }
 0x7b8   :  { %v2296_v37 = vsel %vm175_vm0, %v2266_v4, 0.0 }
 0x7b9   :  { %2297 = vadd.xlane.f32.xlu0 %v2296_v37 }
 0x7bf   :  { %v2269_v0 = vpop.f32.mrf.mxu2 }
 0x7c0   :  { %v2299_v7 = vsel %vm175_vm0, %v2269_v0, 0.0  ;;  %v2481_v0 = vld [vmem:[%s5991_s5] sm:$0xff] }
 0x7c1   :  { %2300 = vadd.xlane.f32.xlu1 %v2299_v7 }
 0x7c7   :  { %v2272_v26 = vpop.f32.mrf.mxu2 }
 0x7c8   :  { %v2302_v41 = vsel %vm175_vm0, %v2272_v26, 0.0 }
 0x7c9   :  { %2303 = vadd.xlane.f32.xlu2 %v2302_v41 }
 0x7cf   :  { %v2275_v6 = vpop.f32.mrf.mxu2 }
 0x7d0   :  { %v2305_v39 = vsel %vm175_vm0, %v2275_v6, 0.0 }
 0x7d1   :  { %2306 = vadd.xlane.f32.xlu0 %v2305_v39 }
 0x7d7   :  { %v2278_v23 = vpop.f32.mrf.mxu2 }
 0x7d8   :  { %v2308_v30 = vsel %vm175_vm0, %v2278_v23, 0.0  ;;  %v2501_v23 = vld [vmem:[%s5992_s6] sm:$0xff] }
 0x7d9   :  { %2309 = vadd.xlane.f32.xlu1 %v2308_v30 }
 0x804   :  { %v2283_v28 = vpop.xlane.xlu1 %2282 }
 0x805   :  { %v2311_v19 = vadd.f32 1e-05, %v2283_v28 }
 0x807   :  { %3792 = vrsqrt.f32 %v2311_v19  ;;  %vm2327_vm4 = vweird.f32 %v2311_v19  ;;  %v2421_v32 = vmul.f32 0.5, %v2311_v19 }
 0x80c   :  { %v2286_v59 = vpop.xlane.xlu2 %2285 }
 0x80d   :  { %v3793_v14 = vpop.eup %3792  ;;  %v2312_v11 = vadd.f32 1e-05, %v2286_v59 }
 0x80e   :  { %v2322_v1 = vmul.f32 %v3793_v14, %v2311_v19  ;;  %vm2328_vm3 = vweird.f32 %v3793_v14 }
 0x80f   :  { %3794 = vrsqrt.f32 %v2312_v11  ;;  %vm2329_vm6 = vmor %vm2327_vm4, %vm2328_vm3  ;;  %vm2337_vm8 = vweird.f32 %v2312_v11  ;;  %v2422_v37 = vmul.f32 0.5, %v2312_v11 }
 0x810   :  { %v2323_v24 = vmul.f32 %v3793_v14, %v2322_v1 }
 0x812   :  { %v2324_v27 = vmul.f32 0.5, %v2323_v24 }
 0x814   :  { %v2325_v46 = vsub.f32 1.5, %v2324_v27  ;;  %v2289_v51 = vpop.xlane.xlu0 %2288 }
 0x815   :  { %v3795_v25 = vpop.eup %3794  ;;  %v2313_v61 = vadd.f32 1e-05, %v2289_v51 }
 0x816   :  { %v2326_v48 = vmul.f32 %v3793_v14, %v2325_v46  ;;  %v2332_v42 = vmul.f32 %v3795_v25, %v2312_v11  ;;  %vm2338_vm7 = vweird.f32 %v3795_v25  ;;  %v2482_v46 = vld [vmem:[%s5991_s5 + $0x8] sm:$0xff] }
 0x817   :  { %3796 = vrsqrt.f32 %v2313_v61  ;;  %vm2339_vm9 = vmor %vm2337_vm8, %vm2338_vm7  ;;  %vm2347_vm1 = vweird.f32 %v2313_v61 }
 0x818   :  { %v2330_v44 = vsel %vm2329_vm6, %v3793_v14, %v2326_v48  ;;  %v2333_v43 = vmul.f32 %v3795_v25, %v2332_v42  ;;  %v2502_v42 = vld [vmem:[%s5992_s6 + $0x8] sm:$0xff] }
 0x819   :  { %v2431_v56 = vmul.f32 %v2421_v32, %v2330_v44 }
 0x81a   :  { %v2334_v54 = vmul.f32 0.5, %v2333_v43 }
 0x81b   :  { %v2441_v62 = vmul.f32 %v2431_v56, %v2330_v44 }
 0x81c   :  { %v2335_v63 = vsub.f32 1.5, %v2334_v54  ;;  %v2292_v40 = vpop.xlane.xlu1 %2291 }
 0x81d   :  { %v3797_v15 = vpop.eup %3796  ;;  %v2451_v58 = vsub.f32 1.5, %v2441_v62  ;;  %v2314_v35 = vadd.f32 1e-05, %v2292_v40 }
 0x81e   :  { %v2336_v57 = vmul.f32 %v3795_v25, %v2335_v63  ;;  %v2342_v2 = vmul.f32 %v3797_v15, %v2313_v61  ;;  %vm2348_vm10 = vweird.f32 %v3797_v15 }
 0x81f   :  { %v2461_v4 = vmul.f32 %v2451_v58, %v2330_v44  ;;  %3798 = vrsqrt.f32 %v2314_v35  ;;  %vm2349_vm11 = vmor %vm2347_vm1, %vm2348_vm10  ;;  %vm2357_vm13 = vweird.f32 %v2314_v35 }
 0x820   :  { %v2340_v7 = vsel %vm2339_vm9, %v3795_v25, %v2336_v57  ;;  %v2343_v26 = vmul.f32 %v3797_v15, %v2342_v2 }
 0x821   :  { %v2471_v41 = vmul.f32 %v2461_v4, %v5454_v8  ;;  %v2432_v6 = vmul.f32 %v2422_v37, %v2340_v7  ;;  %v2423_v8 = vmul.f32 0.5, %v2313_v61  ;;  %v2483_v4 = vld [vmem:[%s5991_s5 + $0x10] sm:$0xff] }
 0x822   :  { %v2344_v39 = vmul.f32 0.5, %v2343_v26  ;;  %v2503_v26 = vld [vmem:[%s5992_s6 + $0x10] sm:$0xff] }
 0x823   :  { %v2491_v30 = vmul.f32 %v2481_v0, %v2471_v41  ;;  %v2442_v36 = vmul.f32 %v2432_v6, %v2340_v7 }
 0x824   :  { %v2345_v12 = vsub.f32 1.5, %v2344_v39  ;;  %v2295_v28 = vpop.xlane.xlu2 %2294 }
 0x825   :  { %v3799_v13 = vpop.eup %3798  ;;  %v2452_v19 = vsub.f32 1.5, %v2442_v36  ;;  %v2315_v22 = vadd.f32 1e-05, %v2295_v28  ;;  %v5507_v59 = vadd.f32 %v2501_v23, %v2491_v30 }
 0x826   :  { %v2346_v14 = vmul.f32 %v3797_v15, %v2345_v12  ;;  %v2352_v11 = vmul.f32 %v3799_v13, %v2314_v35  ;;  %vm2358_vm12 = vweird.f32 %v3799_v13 }
 0x827   :  { %3800 = vrsqrt.f32 %v2315_v22  ;;  %3339 = vmatmul.msk.f32.vlgmr.msrb.gmra.mxu3 %vm175_vm0, %v5507_v59  ;;  %v2462_v1 = vmul.f32 %v2452_v19, %v2340_v7  ;;  %vm2359_vm14 = vmor %vm2357_vm13, %vm2358_vm12  ;;  %vm2367_vm2 = vweird.f32 %v2315_v22 }
 0x828   :  { %v2350_v24 = vsel %vm2349_vm11, %v3797_v15, %v2346_v14  ;;  %v2353_v27 = vmul.f32 %v3799_v13, %v2352_v11 }
 0x829   :  { %v2433_v51 = vmul.f32 %v2423_v8, %v2350_v24  ;;  %v2472_v25 = vmul.f32 %v2462_v1, %v5445_v3  ;;  %v2424_v3 = vmul.f32 0.5, %v2314_v35  ;;  %v2484_v8 = vld [vmem:[%s5991_s5 + $0x18] sm:$0xff] }
 0x82a   :  { %v2354_v48 = vmul.f32 0.5, %v2353_v27 }
 0x82b   :  { %v2443_v61 = vmul.f32 %v2433_v51, %v2350_v24  ;;  %v2492_v32 = vmul.f32 %v2482_v46, %v2472_v25  ;;  %v2504_v46 = vld [vmem:[%s5992_s6 + $0x18] sm:$0xff] }
 0x82c   :  { %v2355_v44 = vsub.f32 1.5, %v2354_v48  ;;  %v2298_v43 = vpop.xlane.xlu0 %2297 }
 0x82d   :  { %v3801_v56 = vpop.eup %3800  ;;  %v2453_v54 = vsub.f32 1.5, %v2443_v61  ;;  %v2316_v62 = vadd.f32 1e-05, %v2298_v43  ;;  %v5518_v63 = vadd.f32 %v2502_v42, %v2492_v32 }
 0x82e   :  { %v2356_v40 = vmul.f32 %v3799_v13, %v2355_v44  ;;  %v2362_v15 = vmul.f32 %v3801_v56, %v2315_v22  ;;  %vm2368_vm15 = vweird.f32 %v3801_v56 }
 0x82f   :  { %3802 = vrsqrt.f32 %v2316_v62  ;;  %3340 = vmatmul.msk.f32.gmra.mxu3 %vm175_vm0, %v5518_v63  ;;  %v2463_v58 = vmul.f32 %v2453_v54, %v2350_v24  ;;  %vm2369_vm3 = vmor %vm2367_vm2, %vm2368_vm15  ;;  %vm2377_vm6 = vweird.f32 %v2316_v62 }
 0x830   :  { %v2360_v57 = vsel %vm2359_vm14, %v3799_v13, %v2356_v40  ;;  %v2363_v2 = vmul.f32 %v3801_v56, %v2362_v15 }
 0x831   :  { %v2434_v37 = vmul.f32 %v2424_v3, %v2360_v57  ;;  %v2473_v0 = vmul.f32 %v2463_v58, %v5439_v53  ;;  %v2425_v53 = vmul.f32 0.5, %v2315_v22  ;;  %v2485_v3 = vld [vmem:[%s5991_s5 + $0x20] sm:$0xff] }
 0x832   :  { %v2364_v7 = vmul.f32 0.5, %v2363_v2 }
 0x833   :  { %v2444_v35 = vmul.f32 %v2434_v37, %v2360_v57  ;;  %v2493_v41 = vmul.f32 %v2483_v4, %v2473_v0  ;;  %v2505_v4 = vld [vmem:[%s5992_s6 + $0x20] sm:$0xff] }
 0x834   :  { %v2365_v6 = vsub.f32 1.5, %v2364_v7  ;;  %v2301_v39 = vpop.xlane.xlu1 %2300 }
 0x835   :  { %v3803_v23 = vpop.eup %3802  ;;  %v2454_v30 = vsub.f32 1.5, %v2444_v35  ;;  %v2317_v36 = vadd.f32 1e-05, %v2301_v39  ;;  %v5529_v12 = vadd.f32 %v2503_v26, %v2493_v41 }
 0x836   :  { %v2366_v28 = vmul.f32 %v3801_v56, %v2365_v6  ;;  %v2372_v13 = vmul.f32 %v3803_v23, %v2316_v62  ;;  %vm2378_vm4 = vweird.f32 %v3803_v23 }
 0x837   :  { %3804 = vrsqrt.f32 %v2317_v36  ;;  %3341 = vmatmul.msk.f32.gmra.mxu3 %vm175_vm0, %v5529_v12  ;;  %v2464_v19 = vmul.f32 %v2454_v30, %v2360_v57  ;;  %vm2379_vm7 = vmor %vm2377_vm6, %vm2378_vm4  ;;  %vm2387_vm9 = vweird.f32 %v2317_v36  ;;  %vm2628_vm6 = vcmask 523264  }
 0x838   :  { %v2370_v14 = vsel %vm2369_vm3, %v3801_v56, %v2366_v28  ;;  %v2373_v11 = vmul.f32 %v3803_v23, %v2372_v13 }
 0x839   :  { %v2435_v1 = vmul.f32 %v2425_v53, %v2370_v14  ;;  %v2474_v24 = vmul.f32 %v2464_v19, %v5442_v55  ;;  %v2426_v55 = vmul.f32 0.5, %v2316_v62  ;;  %v2486_v53 = vld [vmem:[%s5991_s5 + $0x28] sm:$0xff] }
 0x83a   :  { %v2374_v27 = vmul.f32 0.5, %v2373_v11 }
 0x83b   :  { %v2445_v22 = vmul.f32 %v2435_v1, %v2370_v14  ;;  %v2494_v51 = vmul.f32 %v2484_v8, %v2474_v24  ;;  %v2506_v8 = vld [vmem:[%s5992_s6 + $0x28] sm:$0xff] }
 0x83c   :  { %v2375_v25 = vsub.f32 1.5, %v2374_v27  ;;  %v2304_v48 = vpop.xlane.xlu2 %2303 }
 0x83d   :  { %v3805_v42 = vpop.eup %3804  ;;  %v2455_v61 = vsub.f32 1.5, %v2445_v22  ;;  %v2318_v32 = vadd.f32 1e-05, %v2304_v48  ;;  %v5540_v44 = vadd.f32 %v2504_v46, %v2494_v51 }
 0x83e   :  { %v2376_v43 = vmul.f32 %v3803_v23, %v2375_v25  ;;  %v2382_v56 = vmul.f32 %v3805_v42, %v2317_v36  ;;  %vm2388_vm8 = vweird.f32 %v3805_v42 }
 0x83f   :  { %3806 = vrsqrt.f32 %v2318_v32  ;;  %3342 = vmatmul.msk.f32.gmra.mxu3 %vm175_vm0, %v5540_v44  ;;  %v2465_v54 = vmul.f32 %v2455_v61, %v2370_v14  ;;  %vm2389_vm10 = vmor %vm2387_vm9, %vm2388_vm8  ;;  %vm2397_vm11 = vweird.f32 %v2318_v32 }
 0x840   :  { %v2380_v40 = vsel %vm2379_vm7, %v3803_v23, %v2376_v43  ;;  %v2383_v15 = vmul.f32 %v3805_v42, %v2382_v56  ;;  %v2623_v43 = vld [vmem:[%s5995_s9 + $0x38] sm:$0xff]  ;;  %v2622_v56 = vld [vmem:[%s5995_s9 + $0x30] sm:$0xff] }
 0x841   :  { %v2436_v58 = vmul.f32 %v2426_v55, %v2380_v40  ;;  %v2475_v57 = vmul.f32 %v2465_v54, %v5430_v10  ;;  %v2427_v10 = vmul.f32 0.5, %v2317_v36  ;;  %2667 = vmatpush.msrb.mxu0 %v2623_v43 }
 0x842   :  { %v2384_v2 = vmul.f32 0.5, %v2383_v15 }
 0x843   :  { %v2446_v62 = vmul.f32 %v2436_v58, %v2380_v40  ;;  %v2495_v37 = vmul.f32 %v2485_v3, %v2475_v57  ;;  %v2621_v3 = vld [vmem:[%s5995_s9 + $0x28] sm:$0xff]  ;;  %v2507_v57 = vld [vmem:[%s5992_s6 + $0x30] sm:$0xff]  ;;  %2668 = vmatpush.msrb.mxu0 %v2622_v56 }
 0x844   :  { %v2385_v0 = vsub.f32 1.5, %v2384_v2  ;;  %v2307_v7 = vpop.xlane.xlu0 %2306 }
 0x845   :  { %v3807_v26 = vpop.eup %3806  ;;  %v2456_v35 = vsub.f32 1.5, %v2446_v62  ;;  %v2319_v41 = vadd.f32 1e-05, %v2307_v7  ;;  %v5551_v6 = vadd.f32 %v2505_v4, %v2495_v37  ;;  %v2620_v62 = vld [vmem:[%s5995_s9 + $0x20] sm:$0xff]  ;;  %2669 = vmatpush.msrb.mxu0 %v2621_v3 }
 0x846   :  { %v2386_v39 = vmul.f32 %v3805_v42, %v2385_v0  ;;  %v2392_v23 = vmul.f32 %v3807_v26, %v2318_v32  ;;  %vm2398_vm1 = vweird.f32 %v3807_v26 }
 0x847   :  { %3808 = vrsqrt.f32 %v2319_v41  ;;  %3343 = vmatmul.msk.f32.gmra.mxu3 %vm175_vm0, %v5551_v6  ;;  %v2466_v30 = vmul.f32 %v2456_v35, %v2380_v40  ;;  %vm2399_vm12 = vmor %vm2397_vm11, %vm2398_vm1  ;;  %v2487_v40 = vld [vmem:[%s5991_s5 + $0x30] sm:$0xff]  ;;  %vm2407_vm14 = vweird.f32 %v2319_v41  ;;  %2670 = vmatpush.msrb.mxu0 %v2620_v62 }
 0x848   :  { %v2390_v28 = vsel %vm2389_vm10, %v3805_v42, %v2386_v39  ;;  %v2393_v13 = vmul.f32 %v3807_v26, %v2392_v23  ;;  %v2429_v23 = vmul.f32 0.5, %v2319_v41 }
 0x849   :  { %v2437_v19 = vmul.f32 %v2427_v10, %v2390_v28  ;;  %v2476_v14 = vmul.f32 %v2466_v30, %v5424_v31  ;;  %v2428_v31 = vmul.f32 0.5, %v2318_v32 }
 0x84a   :  { %v2394_v11 = vmul.f32 0.5, %v2393_v13  ;;  %v2488_v13 = vld [vmem:[%s5991_s5 + $0x38] sm:$0xff] }
 0x84b   :  { %v2447_v36 = vmul.f32 %v2437_v19, %v2390_v28  ;;  %v2496_v1 = vmul.f32 %v2486_v53, %v2476_v14 }
 0x84c   :  { %v2395_v24 = vsub.f32 1.5, %v2394_v11  ;;  %v2310_v27 = vpop.xlane.xlu1 %2309  ;;  %v2508_v11 = vld [vmem:[%s5992_s6 + $0x38] sm:$0xff] }
 0x84d   :  { %v3809_v46 = vpop.eup %3808  ;;  %v2457_v22 = vsub.f32 1.5, %v2447_v36  ;;  %v2320_v51 = vadd.f32 1e-05, %v2310_v27  ;;  %v5562_v25 = vadd.f32 %v2506_v8, %v2496_v1 }
 0x84e   :  { %v2396_v48 = vmul.f32 %v3807_v26, %v2395_v24  ;;  %v2402_v42 = vmul.f32 %v3809_v46, %v2319_v41  ;;  %vm2408_vm13 = vweird.f32 %v3809_v46 }
 0x84f   :  { %3810 = vrsqrt.f32 %v2320_v51  ;;  %3344 = vmatmul.msk.f32.gmra.mxu3 %vm175_vm0, %v5562_v25  ;;  %v2467_v61 = vmul.f32 %v2457_v22, %v2390_v28  ;;  %vm2409_vm15 = vmor %vm2407_vm14, %vm2408_vm13  ;;  %vm2417_vm3 = vweird.f32 %v2320_v51 }
 0x850   :  { %v2400_v55 = vsel %vm2399_vm12, %v3807_v26, %v2396_v48  ;;  %v2403_v54 = vmul.f32 %v3809_v46, %v2402_v42  ;;  %v2619_v26 = vld [vmem:[%s5995_s9 + $0x18] sm:$0xff]  ;;  %v2489_v48 = vld [vmem:[%s5991_s5 + $0x40] sm:$0xff] }
 0x851   :  { %v2438_v32 = vmul.f32 %v2428_v31, %v2400_v55  ;;  %v2477_v15 = vmul.f32 %v2467_v61, %v5427_v47  ;;  %2671 = vmatpush.msrb.mxu0 %v2619_v26  ;;  %v2509_v61 = vld [vmem:[%s5992_s6 + $0x40] sm:$0xff] }
 0x852   :  { %v2404_v58 = vmul.f32 0.5, %v2403_v54 }
 0x853   :  { %v2448_v2 = vmul.f32 %v2438_v32, %v2400_v55  ;;  %v2497_v4 = vmul.f32 %v2487_v40, %v2477_v15  ;;  %v2490_v40 = vld [vmem:[%s5991_s5 + $0x48] sm:$0xff] }
 0x854   :  { %v2405_v37 = vsub.f32 1.5, %v2404_v58  ;;  %v2618_v58 = vld [vmem:[%s5995_s9 + $0x10] sm:$0xff] }
 0x855   :  { %v3811_v47 = vpop.eup %3810  ;;  %v2458_v0 = vsub.f32 1.5, %v2448_v2  ;;  %v5585_v7 = vadd.f32 %v2507_v57, %v2497_v4  ;;  %2672 = vmatpush.msrb.mxu0 %v2618_v58  ;;  %v2617_v57 = vld [vmem:[%s5995_s9 + $0x8] sm:$0xff]  ;;  %v3630_v2 = vld [vmem:[%s5994_s8] ss:$0 sm:$0xff] }
 0x856   :  { %v2406_v35 = vmul.f32 %v3809_v46, %v2405_v37  ;;  %v2412_v39 = vmul.f32 %v3811_v47, %v2320_v51  ;;  %vm2418_vm2 = vweird.f32 %v3811_v47 }
 0x857   :  { %3345 = vmatmul.msk.f32.gmra.mxu3 %vm175_vm0, %v5585_v7  ;;  %v2468_v10 = vmul.f32 %v2458_v0, %v2400_v55  ;;  %vm2419_vm4 = vmor %vm2417_vm3, %vm2418_vm2  ;;  %2673 = vmatpush.msrb.mxu0 %v2617_v57 }
 0x858   :  { %v2410_v30 = vsel %vm2409_vm15, %v3809_v46, %v2406_v35  ;;  %v2413_v28 = vmul.f32 %v3811_v47, %v2412_v39  ;;  %v2430_v46 = vmul.f32 0.5, %v2320_v51 }
 0x859   :  { %v2439_v53 = vmul.f32 %v2429_v23, %v2410_v30  ;;  %v2478_v19 = vmul.f32 %v2468_v10, %v5415_v38 }
 0x85a   :  { %v2414_v14 = vmul.f32 0.5, %v2413_v28 }
 0x85b   :  { %v2449_v41 = vmul.f32 %v2439_v53, %v2410_v30  ;;  %v2498_v8 = vmul.f32 %v2488_v13, %v2478_v19 }
 0x85c   :  { %v2415_v36 = vsub.f32 1.5, %v2414_v14 }
 0x85d   :  { %v2459_v1 = vsub.f32 1.5, %v2449_v41  ;;  %v5599_v24 = vadd.f32 %v2508_v11, %v2498_v8 }
 0x85e   :  { %v2416_v27 = vmul.f32 %v3811_v47, %v2415_v36 }
 0x85f   :  { %3346 = vmatmul.msk.f32.gmra.mxu3 %vm175_vm0, %v5599_v24  ;;  %v2469_v38 = vmul.f32 %v2459_v1, %v2410_v30 }
 0x860   :  { %v2420_v22 = vsel %vm2419_vm4, %v3811_v47, %v2416_v27 }
 0x861   :  { %v2440_v42 = vmul.f32 %v2430_v46, %v2420_v22  ;;  %v2479_v31 = vmul.f32 %v2469_v38, %v5409_v49  ;;  %v2510_v49 = vld [vmem:[%s5992_s6 + $0x48] sm:$0xff] }
 0x863   :  { %v2450_v43 = vmul.f32 %v2440_v42, %v2420_v22  ;;  %v2499_v56 = vmul.f32 %v2489_v48, %v2479_v31 }
 0x865   :  { %v2460_v55 = vsub.f32 1.5, %v2450_v43  ;;  %v5610_v51 = vadd.f32 %v2509_v61, %v2499_v56 }
 0x867   :  { %3347 = vmatmul.msk.f32.gmra.mxu3 %vm175_vm0, %v5610_v51  ;;  %v2470_v54 = vmul.f32 %v2460_v55, %v2420_v22 }
 0x869   :  { %v2480_v32 = vmul.f32 %v2470_v54, %v5412_v16  ;;  %v2616_v16 = vld [vmem:[%s5995_s9] sm:$0xff] }
 0x86a   :  { %2674 = vmatpush.msrb.mxu0 %v2616_v16  ;;  %v3631_v16 = vld [vmem:[%s5996_s10] ss:$0 sm:$0xff] }
 0x86b   :  { %v2500_v15 = vmul.f32 %v2490_v40, %v2480_v32 }
 0x86d   :  { %v5621_v3 = vadd.f32 %v2510_v49, %v2500_v15 }
 0x86f   :  { %3348 = vmatmul.msk.f32.gmra.mxu3 %vm175_vm0, %v5621_v3 }
 0x8aa   :  { %v2576_v4 = vpop.f32.mrf.mxu3 }
 0x8ab   :  { %v2577_v62 = vadd.f32 %v3630_v2, %v2576_v4 }
 0x8ad   :  { %v2606_v37 = vmax.f32 %v2577_v62, 0.0 }
 0x8af   :  { %3349 = vmatmul.msk.f32.vlgmr.msrb.gmra.mxu0 %vm2628_vm6, %v2606_v37 }
 0x8b2   :  { %v2579_v47 = vpop.f32.mrf.mxu3 }
 0x8b3   :  { %v2580_v0 = vadd.f32 %v3630_v2, %v2579_v47 }
 0x8b5   :  { %v2607_v26 = vmax.f32 %v2580_v0, 0.0 }
 0x8b7   :  { %3350 = vmatmul.msk.f32.gmra.mxu0 %vm2628_vm6, %v2607_v26 }
 0x8ba   :  { %v2582_v35 = vpop.f32.mrf.mxu3 }
 0x8bb   :  { %v2583_v39 = vadd.f32 %v3630_v2, %v2582_v35 }
 0x8bd   :  { %v2608_v23 = vmax.f32 %v2583_v39, 0.0 }
 0x8bf   :  { %3351 = vmatmul.msk.f32.gmra.mxu0 %vm2628_vm6, %v2608_v23 }
 0x8c2   :  { %v2585_v10 = vpop.f32.mrf.mxu3 }
 0x8c3   :  { %v2586_v30 = vadd.f32 %v3630_v2, %v2585_v10 }
 0x8c5   :  { %v2609_v28 = vmax.f32 %v2586_v30, 0.0 }
 0x8c7   :  { %3352 = vmatmul.msk.f32.gmra.mxu0 %vm2628_vm6, %v2609_v28 }
 0x8ca   :  { %v2588_v13 = vpop.f32.mrf.mxu3 }
 0x8cb   :  { %v2589_v53 = vadd.f32 %v3630_v2, %v2588_v13 }
 0x8cd   :  { %v2610_v19 = vmax.f32 %v2589_v53, 0.0 }
 0x8cf   :  { %3353 = vmatmul.msk.f32.gmra.mxu0 %vm2628_vm6, %v2610_v19 }
 0x8d2   :  { %v2591_v14 = vpop.f32.mrf.mxu3 }
 0x8d3   :  { %v2592_v11 = vadd.f32 %v3630_v2, %v2591_v14 }
 0x8d5   :  { %v2611_v41 = vmax.f32 %v2592_v11, 0.0 }
 0x8d7   :  { %3354 = vmatmul.msk.f32.gmra.mxu0 %vm2628_vm6, %v2611_v41 }
 0x8da   :  { %v2594_v8 = vpop.f32.mrf.mxu3 }
 0x8db   :  { %v2595_v36 = vadd.f32 %v3630_v2, %v2594_v8 }
 0x8dd   :  { %v2612_v1 = vmax.f32 %v2595_v36, 0.0 }
 0x8df   :  { %3355 = vmatmul.msk.f32.gmra.mxu0 %vm2628_vm6, %v2612_v1 }
 0x8e2   :  { %v2597_v27 = vpop.f32.mrf.mxu3 }
 0x8e3   :  { %v2598_v46 = vadd.f32 %v3630_v2, %v2597_v27 }
 0x8e5   :  { %v2613_v38 = vmax.f32 %v2598_v46, 0.0 }
 0x8e7   :  { %3356 = vmatmul.msk.f32.gmra.mxu0 %vm2628_vm6, %v2613_v38 }
 0x8ea   :  { %v2600_v22 = vpop.f32.mrf.mxu3 }
 0x8eb   :  { %v2601_v48 = vadd.f32 %v3630_v2, %v2600_v22 }
 0x8ed   :  { %v2614_v42 = vmax.f32 %v2601_v48, 0.0 }
 0x8ef   :  { %3357 = vmatmul.msk.f32.gmra.mxu0 %vm2628_vm6, %v2614_v42 }
 0x8f2   :  { %v2603_v31 = vpop.f32.mrf.mxu3 }
 0x8f3   :  { %v2604_v61 = vadd.f32 %v3630_v2, %v2603_v31 }
 0x8f5   :  { %v2615_v43 = vmax.f32 %v2604_v61, 0.0 }
 0x8f7   :  { %3358 = vmatmul.msk.f32.gmra.mxu0 %vm2628_vm6, %v2615_v43 }
 0x92c   :  { %v2676_v56 = vpop.f32.mrf.mxu0 }
 0x934   :  { %v2679_v55 = vpop.f32.mrf.mxu0 }
 0x93c   :  { %v2682_v54 = vpop.f32.mrf.mxu0 }
 0x944   :  { %v2685_v40 = vpop.f32.mrf.mxu0 }
 0x94c   :  { %v2688_v32 = vpop.f32.mrf.mxu0 }
 0x94d   :  { %v2689_v23 = vadd.f32 %v3631_v16, %v2688_v32 }
 0x94f   :  { %v5670_v28 = vadd.f32 %v2689_v23, %v5551_v6 }
 0x954   :  { %v2691_v49 = vpop.f32.mrf.mxu0 }
 0x955   :  { %v2692_v35 = vadd.f32 %v3631_v16, %v2691_v49 }
 0x957   :  { %v5666_v30 = vadd.f32 %v2692_v35, %v5562_v25 }
 0x95c   :  { %v2694_v15 = vpop.f32.mrf.mxu0 }
 0x95d   :  { %v2695_v0 = vadd.f32 %v3631_v16, %v2694_v15 }
 0x95f   :  { %v5662_v10 = vadd.f32 %v2695_v0, %v5585_v7  ;;  %v2677_v7 = vadd.f32 %v3631_v16, %v2676_v56 }
 0x961   :  { %v5686_v6 = vadd.f32 %v2677_v7, %v5507_v59 }
 0x964   :  { %v2697_v58 = vpop.f32.mrf.mxu0 }
 0x965   :  { %v2698_v2 = vadd.f32 %v3631_v16, %v2697_v58 }
 0x967   :  { %v5658_v39 = vadd.f32 %v2698_v2, %v5599_v24  ;;  %v2680_v24 = vadd.f32 %v3631_v16, %v2679_v55 }
 0x969   :  { %v5682_v25 = vadd.f32 %v2680_v24, %v5518_v63 }
 0x96c   :  { %v2700_v57 = vpop.f32.mrf.mxu0 }
 0x96d   :  { %v2701_v62 = vadd.f32 %v3631_v16, %v2700_v57 }
 0x96f   :  { %v5654_v26 = vadd.f32 %v2701_v62, %v5610_v51  ;;  %v2683_v51 = vadd.f32 %v3631_v16, %v2682_v54 }
 0x971   :  { %v5678_v53 = vadd.f32 %v2683_v51, %v5529_v12 }
 0x974   :  { %v2703_v4 = vpop.f32.mrf.mxu0 }
 0x975   :  { %v2704_v37 = vadd.f32 %v3631_v16, %v2703_v4 }
 0x977   :  { %v5651_v47 = vadd.f32 %v2704_v37, %v5621_v3  ;;  %v2686_v3 = vadd.f32 %v3631_v16, %v2685_v40 }
 0x979   :  { %2722 = vmatpush.msra.mxu1 %v5651_v47  ;;  %v5674_v13 = vadd.f32 %v2686_v3, %v5540_v44 }
 0x97b   :  { %2723 = vmatpush.msra.mxu1 %v5654_v26 }
 0x97d   :  { %2724 = vmatpush.msra.mxu1 %v5658_v39 }
 0x97f   :  { %2725 = vmatpush.msra.mxu1 %v5662_v10 }
 0x981   :  { %2726 = vmatpush.msra.mxu1 %v5666_v30 }
 0x983   :  { %2727 = vmatpush.msra.mxu1 %v5670_v28 }
 0x985   :  { %2728 = vmatpush.msra.mxu1 %v5674_v13 }
 0x987   :  { %2729 = vmatpush.msra.mxu1 %v5678_v53 }
 0x989   :  { %2730 = vmatpush.msra.mxu1 %v5682_v25 }
 0x98b   :  { %2731 = vmatpush.msra.mxu1 %v5686_v6 }
 0x98c   :  { %3359 = vmatmul.msk.f32.vlgmr.msra.gmra.mxu1 %vm872_vm5, %v5325_v60 }
 0x994   :  { %3360 = vmatmul.msk.f32.gmra.mxu1 %vm872_vm5, %v5334_v18 }
 0x99c   :  { %3361 = vmatmul.msk.f32.gmra.mxu1 %vm872_vm5, %v5342_v33 }
 0x9a4   :  { %3362 = vmatmul.msk.f32.gmra.mxu1 %vm872_vm5, %v5350_v29 }
 0x9ac   :  { %3363 = vmatmul.msk.f32.gmra.mxu1 %vm872_vm5, %v5358_v34 }
 0x9b4   :  { %3364 = vmatmul.msk.f32.gmra.mxu1 %vm872_vm5, %v5366_v45 }
 0x9bc   :  { %3365 = vmatmul.msk.f32.gmra.mxu1 %vm872_vm5, %v5374_v9 }
 0x9c4   :  { %3366 = vmatmul.msk.f32.gmra.mxu1 %vm872_vm5, %v5382_v21 }
 0x9cc   :  { %3367 = vmatmul.msk.f32.gmra.mxu1 %vm872_vm5, %v5388_v20 }
 0x9d4   :  { %3368 = vmatmul.msk.f32.gmra.mxu1 %vm872_vm5, %v5394_v5 }
 0xa09   :  { %v2733_v59 = vpop.f32.mrf.mxu1 }
 0xa0a   :  { %v2763_v43 = vsel %vm175_vm0, %v2733_v59, 0.0 }
 0xa11   :  { %v2736_v63 = vpop.f32.mrf.mxu1 }
 0xa12   :  { %v2766_v38 = vsel %vm175_vm0, %v2736_v63, 0.0 }
 0xa19   :  { %v2739_v12 = vpop.f32.mrf.mxu1 }
 0xa1a   :  { %v2769_v42 = vsel %vm175_vm0, %v2739_v12, 0.0 }
 0xa21   :  { %v2742_v44 = vpop.f32.mrf.mxu1 }
 0xa22   :  { %v2772_v61 = vsel %vm175_vm0, %v2742_v44, 0.0 }
 0xa29   :  { %v2745_v19 = vpop.f32.mrf.mxu1 }
 0xa2a   :  { %v2775_v1 = vsel %vm175_vm0, %v2745_v19, 0.0 }
 0xa31   :  { %v2748_v14 = vpop.f32.mrf.mxu1 }
 0xa32   :  { %v2778_v22 = vsel %vm175_vm0, %v2748_v14, 0.0 }
 0xa39   :  { %v2751_v11 = vpop.f32.mrf.mxu1 }
 0xa3a   :  { %v2781_v31 = vsel %vm175_vm0, %v2751_v11, 0.0 }
 0xa41   :  { %v2754_v41 = vpop.f32.mrf.mxu1 }
 0xa42   :  { %v2784_v8 = vsel %vm175_vm0, %v2754_v41, 0.0 }
 0xa43   :  { %2785 = vadd.xlane.f32.xlu1 %v2784_v8 }
 0xa49   :  { %v2757_v36 = vpop.f32.mrf.mxu1 }
 0xa4a   :  { %v2787_v27 = vsel %vm175_vm0, %v2757_v36, 0.0 }
 0xa4b   :  { %2776 = vadd.xlane.f32.xlu1 %v2775_v1  ;;  %2788 = vadd.xlane.f32.xlu0 %v2787_v27 }
 0xa51   :  { %v2760_v46 = vpop.f32.mrf.mxu1 }
 0xa52   :  { %v2790_v48 = vsel %vm175_vm0, %v2760_v46, 0.0 }
 0xa53   :  { %2767 = vadd.xlane.f32.xlu1 %v2766_v38  ;;  %2779 = vadd.xlane.f32.xlu0 %v2778_v22 }
 0xa54   :  { %2791 = vadd.xlane.f32.xlu2 %v2790_v48 }
 0xa5b   :  { %2770 = vadd.xlane.f32.xlu0 %v2769_v42 }
 0xa5c   :  { %2782 = vadd.xlane.f32.xlu2 %v2781_v31 }
 0xa64   :  { %2773 = vadd.xlane.f32.xlu2 %v2772_v61 }
 0xa6c   :  { %2764 = vadd.xlane.f32.xlu2 %v2763_v43 }
 0xab6   :  { %v2786_v55 = vpop.xlane.xlu1 %2785 }
 0xab7   :  { %v5727_v49 = vsub.f32 %v5658_v39, %v2786_v55 }
 0xab9   :  { %v2810_v4 = vmul.f32 %v5727_v49, %v5727_v49 }
 0xabe   :  { %v2789_v56 = vpop.xlane.xlu0 %2788  ;;  %v2777_v16 = vpop.xlane.xlu1 %2776 }
 0xabf   :  { %v5721_v40 = vsub.f32 %v5654_v26, %v2789_v56 }
 0xac1   :  { %v2811_v57 = vmul.f32 %v5721_v40, %v5721_v40 }
 0xac6   :  { %v2780_v58 = vpop.xlane.xlu0 %2779  ;;  %v2768_v23 = vpop.xlane.xlu1 %2767 }
 0xac7   :  { %v2792_v54 = vpop.xlane.xlu2 %2791  ;;  %v5736_v37 = vsub.f32 %v5666_v30, %v2780_v58  ;;  %v5757_v51 = vsub.f32 %v5682_v25, %v2768_v23 }
 0xac8   :  { %v5724_v32 = vsub.f32 %v5651_v47, %v2792_v54  ;;  %v5742_v47 = vsub.f32 %v5670_v28, %v2777_v16 }
 0xac9   :  { %v2808_v26 = vmul.f32 %v5736_v37, %v5736_v37  ;;  %v2804_v7 = vmul.f32 %v5757_v51, %v5757_v51 }
 0xaca   :  { %v2812_v15 = vmul.f32 %v5724_v32, %v5724_v32  ;;  %v2807_v39 = vmul.f32 %v5742_v47, %v5742_v47 }
 0xacc   :  { %2819 = vmatpush.msra.mxu2 %v2812_v15 }
 0xace   :  { %2820 = vmatpush.msra.mxu2 %v2811_v57  ;;  %v2771_v35 = vpop.xlane.xlu0 %2770 }
 0xacf   :  { %v2783_v62 = vpop.xlane.xlu2 %2782 }
 0xad0   :  { %v5739_v2 = vsub.f32 %v5662_v10, %v2783_v62  ;;  %2821 = vmatpush.msra.mxu2 %v2810_v4  ;;  %v5751_v10 = vsub.f32 %v5678_v53, %v2771_v35 }
 0xad2   :  { %v2809_v0 = vmul.f32 %v5739_v2, %v5739_v2  ;;  %v2805_v24 = vmul.f32 %v5751_v10, %v5751_v10 }
 0xad4   :  { %2822 = vmatpush.msra.mxu2 %v2809_v0 }
 0xad6   :  { %2823 = vmatpush.msra.mxu2 %v2808_v26 }
 0xad7   :  { %v2774_v3 = vpop.xlane.xlu2 %2773 }
 0xad8   :  { %v5754_v30 = vsub.f32 %v5674_v13, %v2774_v3  ;;  %2824 = vmatpush.msra.mxu2 %v2807_v39 }
 0xada   :  { %v2806_v28 = vmul.f32 %v5754_v30, %v5754_v30 }
 0xadc   :  { %2825 = vmatpush.msra.mxu2 %v2806_v28 }
 0xade   :  { %2826 = vmatpush.msra.mxu2 %v2805_v24 }
 0xadf   :  { %v2765_v53 = vpop.xlane.xlu2 %2764 }
 0xae0   :  { %v5766_v59 = vsub.f32 %v5686_v6, %v2765_v53  ;;  %2827 = vmatpush.msra.mxu2 %v2804_v7 }
 0xae2   :  { %v2803_v13 = vmul.f32 %v5766_v59, %v5766_v59 }
 0xae4   :  { %2828 = vmatpush.msra.mxu2 %v2803_v13 }
 0xae5   :  { %3369 = vmatmul.msk.f32.vlgmr.msra.gmra.mxu2 %vm872_vm5, %v5325_v60 }
 0xaed   :  { %3370 = vmatmul.msk.f32.gmra.mxu2 %vm872_vm5, %v5334_v18 }
 0xaf5   :  { %3371 = vmatmul.msk.f32.gmra.mxu2 %vm872_vm5, %v5342_v33 }
 0xafd   :  { %3372 = vmatmul.msk.f32.gmra.mxu2 %vm872_vm5, %v5350_v29 }
 0xb05   :  { %3373 = vmatmul.msk.f32.gmra.mxu2 %vm872_vm5, %v5358_v34 }
 0xb0d   :  { %3374 = vmatmul.msk.f32.gmra.mxu2 %vm872_vm5, %v5366_v45 }
 0xb15   :  { %3375 = vmatmul.msk.f32.gmra.mxu2 %vm872_vm5, %v5374_v9 }
 0xb1d   :  { %3376 = vmatmul.msk.f32.gmra.mxu2 %vm872_vm5, %v5382_v21 }
 0xb25   :  { %3377 = vmatmul.msk.f32.gmra.mxu2 %vm872_vm5, %v5388_v20 }
 0xb2d   :  { %3378 = vmatmul.msk.f32.gmra.mxu2 %vm872_vm5, %v5394_v5 }
 0xb68   :  { %v2830_v60 = vpop.f32.mrf.mxu2 }
 0xb69   :  { %v2860_v8 = vsel %vm175_vm0, %v2830_v60, 0.0 }
 0xb70   :  { %v2833_v18 = vpop.f32.mrf.mxu2 }
 0xb71   :  { %v2863_v5 = vsel %vm175_vm0, %v2833_v18, 0.0 }
 0xb78   :  { %v2836_v33 = vpop.f32.mrf.mxu2 }
 0xb79   :  { %v2866_v14 = vsel %vm175_vm0, %v2836_v33, 0.0 }
 0xb80   :  { %v2839_v29 = vpop.f32.mrf.mxu2 }
 0xb81   :  { %v2869_v41 = vsel %vm175_vm0, %v2839_v29, 0.0 }
 0xb88   :  { %v2842_v34 = vpop.f32.mrf.mxu2 }
 0xb89   :  { %v2872_v21 = vsel %vm175_vm0, %v2842_v34, 0.0 }
 0xb90   :  { %v2845_v25 = vpop.f32.mrf.mxu2 }
 0xb91   :  { %v2875_v44 = vsel %vm175_vm0, %v2845_v25, 0.0 }
 0xb98   :  { %v2848_v6 = vpop.f32.mrf.mxu2 }
 0xb99   :  { %v2878_v11 = vsel %vm175_vm0, %v2848_v6, 0.0 }
 0xba0   :  { %v2851_v45 = vpop.f32.mrf.mxu2 }
 0xba1   :  { %v2881_v63 = vsel %vm175_vm0, %v2851_v45, 0.0 }
 0xba2   :  { %2882 = vadd.xlane.f32.xlu2 %v2881_v63 }
 0xba8   :  { %v2854_v9 = vpop.f32.mrf.mxu2 }
 0xba9   :  { %v2884_v12 = vsel %vm175_vm0, %v2854_v9, 0.0 }
 0xbaa   :  { %2873 = vadd.xlane.f32.xlu2 %v2872_v21  ;;  %2885 = vadd.xlane.f32.xlu1 %v2884_v12 }
 0xbb0   :  { %v2857_v20 = vpop.f32.mrf.mxu2 }
 0xbb1   :  { %v2887_v19 = vsel %vm175_vm0, %v2857_v20, 0.0 }
 0xbb2   :  { %2864 = vadd.xlane.f32.xlu2 %v2863_v5  ;;  %2876 = vadd.xlane.f32.xlu1 %v2875_v44 }
 0xbb3   :  { %2888 = vadd.xlane.f32.xlu0 %v2887_v19 }
 0xbba   :  { %2867 = vadd.xlane.f32.xlu1 %v2866_v14 }
 0xbbb   :  { %2879 = vadd.xlane.f32.xlu0 %v2878_v11 }
 0xbc3   :  { %2870 = vadd.xlane.f32.xlu0 %v2869_v41 }
 0xbcb   :  { %2861 = vadd.xlane.f32.xlu0 %v2860_v8 }
 0xc15   :  { %v2883_v36 = vpop.xlane.xlu2 %2882 }
 0xc16   :  { %v2897_v1 = vadd.f32 1e-05, %v2883_v36 }
 0xc18   :  { %3812 = vrsqrt.f32 %v2897_v1  ;;  %vm2976_vm8 = vweird.f32 %v2897_v1  ;;  %v3007_v7 = vmul.f32 0.5, %v2897_v1 }
 0xc1d   :  { %v2874_v27 = vpop.xlane.xlu2 %2873  ;;  %v2886_v46 = vpop.xlane.xlu1 %2885 }
 0xc1e   :  { %v3813_v38 = vpop.eup %3812  ;;  %v5800_v22 = vadd.f32 1e-05, %v2874_v27  ;;  %v2898_v48 = vadd.f32 1e-05, %v2886_v46 }
 0xc1f   :  { %v2971_v42 = vmul.f32 %v3813_v38, %v2897_v1  ;;  %vm2977_vm7 = vweird.f32 %v3813_v38 }
 0xc20   :  { %3814 = vrsqrt.f32 %v5800_v22  ;;  %vm2978_vm10 = vmor %vm2976_vm8, %vm2977_vm7  ;;  %vm2946_vm1 = vweird.f32 %v5800_v22  ;;  %vm2986_vm11 = vweird.f32 %v2898_v48  ;;  %v3004_v9 = vmul.f32 0.5, %v5800_v22 }
 0xc21   :  { %v2972_v31 = vmul.f32 %v3813_v38, %v2971_v42  ;;  %3816 = vrsqrt.f32 %v2898_v48  ;;  %v3008_v21 = vmul.f32 0.5, %v2898_v48 }
 0xc23   :  { %v2973_v61 = vmul.f32 0.5, %v2972_v31 }
 0xc25   :  { %v2865_v43 = vpop.xlane.xlu2 %2864  ;;  %v2877_v56 = vpop.xlane.xlu1 %2876  ;;  %v2974_v62 = vsub.f32 1.5, %v2973_v61 }
 0xc26   :  { %v5803_v55 = vpop.eup %3814  ;;  %v5805_v54 = vadd.f32 1e-05, %v2865_v43  ;;  %v5807_v15 = vadd.f32 1e-05, %v2877_v56  ;;  %v2889_v58 = vpop.xlane.xlu0 %2888 }
 0xc27   :  { %v3817_v57 = vpop.eup %3816  ;;  %v2941_v16 = vmul.f32 %v5803_v55, %v5800_v22  ;;  %v5811_v4 = vadd.f32 1e-05, %v2889_v58  ;;  %v2975_v39 = vmul.f32 %v3813_v38, %v2974_v62  ;;  %vm2947_vm13 = vweird.f32 %v5803_v55 }
 0xc28   :  { %v2981_v0 = vmul.f32 %v3817_v57, %v2898_v48  ;;  %3818 = vrsqrt.f32 %v5805_v54  ;;  %vm2987_vm9 = vweird.f32 %v3817_v57  ;;  %vm2916_vm14 = vweird.f32 %v5805_v54  ;;  %vm2948_vm4 = vmor %vm2946_vm1, %vm2947_vm13 }
 0xc29   :  { %v2942_v26 = vmul.f32 %v5803_v55, %v2941_v16  ;;  %3820 = vrsqrt.f32 %v5807_v15  ;;  %v5826_v34 = vsel %vm2978_vm10, %v3813_v38, %v2975_v39  ;;  %vm2988_vm12 = vmor %vm2986_vm11, %vm2987_vm9  ;;  %v5839_v41 = vmul.f32 0.5, %v5805_v54 }
 0xc2a   :  { %v2982_v35 = vmul.f32 %v3817_v57, %v2981_v0  ;;  %3822 = vrsqrt.f32 %v5811_v4  ;;  %v3017_v19 = vmul.f32 %v3007_v7, %v5826_v34  ;;  %vm2956_vm15 = vweird.f32 %v5807_v15 }
 0xc2b   :  { %v2943_v3 = vmul.f32 0.5, %v2942_v26  ;;  %v3005_v46 = vmul.f32 0.5, %v5807_v15  ;;  %vm2996_vm3 = vweird.f32 %v5811_v4 }
 0xc2c   :  { %v2983_v23 = vmul.f32 0.5, %v2982_v35  ;;  %v3027_v58 = vmul.f32 %v3017_v19, %v5826_v34 }
 0xc2d   :  { %v2868_v28 = vpop.xlane.xlu1 %2867  ;;  %v2944_v63 = vsub.f32 1.5, %v2943_v3 }
 0xc2e   :  { %v5817_v24 = vpop.eup %3818  ;;  %v2984_v53 = vsub.f32 1.5, %v2983_v23  ;;  %v5819_v13 = vadd.f32 1e-05, %v2868_v28  ;;  %v2880_v60 = vpop.xlane.xlu0 %2879 }
 0xc2f   :  { %v3821_v18 = vpop.eup %3820  ;;  %v2911_v33 = vmul.f32 %v5817_v24, %v5805_v54  ;;  %v5824_v29 = vadd.f32 1e-05, %v2880_v60  ;;  %v2945_v1 = vmul.f32 %v5803_v55, %v2944_v63  ;;  %vm2917_vm6 = vweird.f32 %v5817_v24 }
 0xc30   :  { %v2985_v25 = vmul.f32 %v3817_v57, %v2984_v53  ;;  %v2951_v6 = vmul.f32 %v3821_v18, %v5807_v15  ;;  %3824 = vrsqrt.f32 %v5819_v13  ;;  %v3823_v45 = vpop.eup %3822  ;;  %vm2957_vm2 = vweird.f32 %v3821_v18  ;;  %vm2918_vm1 = vmor %vm2916_vm14, %vm2917_vm6 }
 0xc31   :  { %v2912_v12 = vmul.f32 %v5817_v24, %v2911_v33  ;;  %v2991_v44 = vmul.f32 %v3823_v45, %v5811_v4  ;;  %3826 = vrsqrt.f32 %v5824_v29  ;;  %vm2997_vm7 = vweird.f32 %v3823_v45  ;;  %vm2958_vm8 = vmor %vm2956_vm15, %vm2957_vm2 }
 0xc32   :  { %v2989_v20 = vsel %vm2988_vm12, %v3817_v57, %v2985_v25  ;;  %v2952_v5 = vmul.f32 %v3821_v18, %v2951_v6  ;;  %v5855_v0 = vsel %vm2948_vm4, %v5803_v55, %v2945_v1  ;;  %vm2998_vm9 = vmor %vm2996_vm3, %vm2997_vm7  ;;  %v3009_v55 = vmul.f32 0.5, %v5811_v4 }
 0xc33   :  { %v3018_v14 = vmul.f32 %v3008_v21, %v2989_v20  ;;  %v2913_v11 = vmul.f32 0.5, %v2912_v12  ;;  %v2992_v36 = vmul.f32 %v3823_v45, %v2991_v44  ;;  %v3037_v53 = vsub.f32 1.5, %v3027_v58 }
 0xc34   :  { %v2953_v8 = vmul.f32 0.5, %v2952_v5  ;;  %vm2926_vm10 = vweird.f32 %v5819_v13  ;;  %v3002_v60 = vmul.f32 0.5, %v5819_v13  ;;  %v3014_v33 = vmul.f32 %v3004_v9, %v5855_v0 }
 0xc35   :  { %v2914_v27 = vsub.f32 1.5, %v2913_v11  ;;  %v2993_v42 = vmul.f32 0.5, %v2992_v36  ;;  %v3028_v61 = vmul.f32 %v3018_v14, %v2989_v20  ;;  %vm2966_vm12 = vweird.f32 %v5824_v29 }
 0xc36   :  { %v3825_v38 = vpop.eup %3824  ;;  %v2954_v48 = vsub.f32 1.5, %v2953_v8  ;;  %v2871_v31 = vpop.xlane.xlu0 %2870  ;;  %v3047_v14 = vmul.f32 %v3037_v53, %v5826_v34  ;;  %v3088_v53 = vld [vmem:[%s5998_s12 + $0x40] sm:$0xff] }
 0xc37   :  { %v2921_v43 = vmul.f32 %v3825_v38, %v5819_v13  ;;  %v5846_v56 = vadd.f32 1e-05, %v2871_v31  ;;  %v2994_v16 = vsub.f32 1.5, %v2993_v42  ;;  %v3827_v62 = vpop.eup %3826  ;;  %v2915_v26 = vmul.f32 %v5817_v24, %v2914_v27 }
 0xc38   :  { %v2955_v57 = vmul.f32 %v3821_v18, %v2954_v48  ;;  %v2961_v23 = vmul.f32 %v3827_v62, %v5824_v29  ;;  %v3038_v3 = vsub.f32 1.5, %v3028_v61  ;;  %vm2927_vm11 = vweird.f32 %v3825_v38  ;;  %v3069_v61 = vld [vmem:[%s5997_s11 + $0x48] sm:$0xff] }
 0xc39   :  { %v2922_v35 = vmul.f32 %v3825_v38, %v2921_v43  ;;  %3828 = vrsqrt.f32 %v5846_v56  ;;  %v2995_v39 = vmul.f32 %v3823_v45, %v2994_v16  ;;  %v5877_v4 = vsel %vm2918_vm1, %v5817_v24, %v2915_v26  ;;  %vm2928_vm13 = vmor %vm2926_vm10, %vm2927_vm11 }
 0xc3a   :  { %v5862_v22 = vsel %vm2958_vm8, %v3821_v18, %v2955_v57  ;;  %v2962_v18 = vmul.f32 %v3827_v62, %v2961_v23  ;;  %v3048_v21 = vmul.f32 %v3038_v3, %v2989_v20  ;;  %vm2967_vm14 = vweird.f32 %v3827_v62 }
 0xc3b   :  { %v3015_v28 = vmul.f32 %v3005_v46, %v5862_v22  ;;  %v2923_v7 = vmul.f32 0.5, %v2922_v35  ;;  %v2999_v15 = vsel %vm2998_vm9, %v3823_v45, %v2995_v39  ;;  %v3024_v20 = vmul.f32 %v3014_v33, %v5855_v0  ;;  %vm2968_vm15 = vmor %vm2966_vm12, %vm2967_vm14  ;;  %v3089_v35 = vld [vmem:[%s5998_s12 + $0x48] sm:$0xff] }
 0xc3c   :  { %v3019_v25 = vmul.f32 %v3009_v55, %v2999_v15  ;;  %v2963_v63 = vmul.f32 0.5, %v2962_v18  ;;  %v3011_v36 = vmul.f32 %v5839_v41, %v5877_v4  ;;  %v3006_v13 = vmul.f32 0.5, %v5824_v29  ;;  %v3068_v41 = vld [vmem:[%s5997_s11 + $0x40] sm:$0xff]  ;;  %v3087_v18 = vld [vmem:[%s5998_s12 + $0x38] sm:$0xff] }
 0xc3d   :  { %v2924_v6 = vsub.f32 1.5, %v2923_v7  ;;  %v3025_v19 = vmul.f32 %v3015_v28, %v5862_v22  ;;  %v3058_v34 = vmul.f32 %v3048_v21, %v5721_v40  ;;  %v3057_v43 = vmul.f32 %v3047_v14, %v5727_v49  ;;  %v3067_v40 = vld [vmem:[%s5997_s11 + $0x38] sm:$0xff] }
 0xc3e   :  { %v2862_v45 = vpop.xlane.xlu0 %2861  ;;  %v3029_v5 = vmul.f32 %v3019_v25, %v2999_v15  ;;  %v2964_v54 = vsub.f32 1.5, %v2963_v63  ;;  %v3034_v16 = vsub.f32 1.5, %v3024_v20  ;;  %vm2936_vm2 = vweird.f32 %v5846_v56 }
 0xc3f   :  { %v3829_v12 = vpop.eup %3828  ;;  %v2925_v44 = vmul.f32 %v3825_v38, %v2924_v6  ;;  %v5880_v9 = vadd.f32 1e-05, %v2862_v45  ;;  %v3035_v42 = vsub.f32 1.5, %v3025_v19  ;;  %v3078_v23 = vmul.f32 %v3068_v41, %v3058_v34  ;;  %v3063_v41 = vld [vmem:[%s5997_s11 + $0x18] sm:$0xff] }
 0xc40   :  { %v2931_v24 = vmul.f32 %v3829_v12, %v5846_v56  ;;  %v3039_v11 = vsub.f32 1.5, %v3029_v5  ;;  %v2965_v27 = vmul.f32 %v3827_v62, %v2964_v54  ;;  %vm2937_vm3 = vweird.f32 %v3829_v12 }
 0xc41   :  { %v2929_v8 = vsel %vm2928_vm13, %v3825_v38, %v2925_v44  ;;  %3830 = vrsqrt.f32 %v5880_v9  ;;  %v3003_v55 = vmul.f32 0.5, %v5846_v56  ;;  %vm2938_vm4 = vmor %vm2936_vm2, %vm2937_vm3  ;;  %v3044_v25 = vmul.f32 %v3034_v16, %v5855_v0  ;;  %v3065_v0 = vld [vmem:[%s5997_s11 + $0x28] sm:$0xff] }
 0xc42   :  { %v3012_v1 = vmul.f32 %v3002_v60, %v2929_v8  ;;  %v2932_v46 = vmul.f32 %v3829_v12, %v2931_v24  ;;  %v3049_v48 = vmul.f32 %v3039_v11, %v2999_v15  ;;  %v2969_v38 = vsel %vm2968_vm15, %v3827_v62, %v2965_v27  ;;  %v3066_v24 = vld [vmem:[%s5997_s11 + $0x30] sm:$0xff] }
 0xc43   :  { %v3016_v57 = vmul.f32 %v3006_v13, %v2969_v38  ;;  %v3021_v62 = vmul.f32 %v3011_v36, %v5877_v4  ;;  %v3077_v15 = vmul.f32 %v3067_v40, %v3057_v43  ;;  %v3098_v21 = vadd.f32 %v3088_v53, %v3078_v23  ;;  %v3061_v40 = vld [vmem:[%s5997_s11 + $0x8] sm:$0xff]  ;;  %v3080_v53 = vld [vmem:[%s5998_s12] sm:$0xff] }
 0xc44   :  { %v2933_v31 = vmul.f32 0.5, %v2932_v46  ;;  %v3022_v58 = vmul.f32 %v3012_v1, %v2929_v8  ;;  %v3059_v29 = vmul.f32 %v3049_v48, %v5724_v32  ;;  %v3045_v32 = vmul.f32 %v3035_v42, %v5862_v22  ;;  %v3064_v1 = vld [vmem:[%s5997_s11 + $0x20] sm:$0xff]  ;;  %v3081_v23 = vld [vmem:[%s5998_s12 + $0x8] sm:$0xff] }
 0xc45   :  { %v3026_v3 = vmul.f32 %v3016_v57, %v2969_v38  ;;  %v3031_v56 = vsub.f32 1.5, %v3021_v62  ;;  %v3097_v54 = vadd.f32 %v3087_v18, %v3077_v15  ;;  %v3054_v14 = vmul.f32 %v3044_v25, %v5742_v47  ;;  %v6107_v15 = vld [vmem:[#allocation9_spill] sm:$0xff] }
 0xc46   :  { %v2934_v26 = vsub.f32 1.5, %v2933_v31  ;;  %v3079_v39 = vmul.f32 %v3069_v61, %v3059_v29  ;;  %v3032_v22 = vsub.f32 1.5, %v3022_v58  ;;  %v3055_v44 = vmul.f32 %v3045_v32, %v5736_v37  ;;  %v3086_v37 = vld [vmem:[%s5998_s12 + $0x30] sm:$0xff]  ;;  %v3083_v29 = vld [vmem:[%s5998_s12 + $0x18] sm:$0xff] }
 0xc47   :  { %v3831_v49 = vpop.eup %3830  ;;  %v3036_v33 = vsub.f32 1.5, %v3026_v3  ;;  %vm2906_vm7 = vweird.f32 %v5880_v9  ;;  %v3000_v47 = vmul.f32 0.5, %v5880_v9  ;;  %v3074_v42 = vmul.f32 %v3064_v1, %v3054_v14 }
 0xc48   :  { %v2935_v28 = vmul.f32 %v3829_v12, %v2934_v26  ;;  %v2901_v7 = vmul.f32 %v3831_v49, %v5880_v9  ;;  %v3099_v60 = vadd.f32 %v3089_v35, %v3079_v39  ;;  %v3042_v20 = vmul.f32 %v3032_v22, %v2929_v8  ;;  %v3085_v8 = vld [vmem:[%s5998_s12 + $0x28] sm:$0xff]  ;;  %v3062_v9 = vld [vmem:[%s5997_s11 + $0x10] sm:$0xff] }
 0xc49   :  { %v3046_v5 = vmul.f32 %v3036_v33, %v2969_v38  ;;  %vm2907_vm6 = vweird.f32 %v3831_v49  ;;  %v3075_v46 = vmul.f32 %v3065_v0, %v3055_v44  ;;  %vm163_vm9 = vcmp.eq.s32.totalorder %v6085_v50, %v6107_v15 }
 0xc4a   :  { %v2939_v6 = vsel %vm2938_vm4, %v3829_v12, %v2935_v28  ;;  %v2902_v63 = vmul.f32 %v3831_v49, %v2901_v7  ;;  %3112 = vmatpush.msra.mxu3 %v3099_v60  ;;  %vm2908_vm8 = vmor %vm2906_vm7, %vm2907_vm6  ;;  %v3052_v31 = vmul.f32 %v3042_v20, %v5751_v10  ;;  %v3060_v28 = vld [vmem:[%s5997_s11] sm:$0xff]  ;;  %v165_v33 = vsel %vm163_vm9, 0.2, %v3880_v52  ;;  %s3881_s11 = smov [#allocation2]  }
 0xc4b   :  { %v3013_v45 = vmul.f32 %v3003_v55, %v2939_v6  ;;  %v3056_v12 = vmul.f32 %v3046_v5, %v5739_v2  ;;  %v3041_v2 = vmul.f32 %v3031_v56, %v5877_v4  ;;  %v3084_v4 = vld [vmem:[%s5998_s12 + $0x20] sm:$0xff]  ;;  %v3095_v58 = vadd.f32 %v3085_v8, %v3075_v46 }
 0xc4c   :  { %v2903_v19 = vmul.f32 0.5, %v2902_v63  ;;  %3113 = vmatpush.msra.mxu3 %v3098_v21  ;;  %v3094_v62 = vadd.f32 %v3084_v4, %v3074_v42  ;;  %v3072_v35 = vmul.f32 %v3062_v9, %v3052_v31  ;;  %vm164_vm10 = vcmp.eq.s32.totalorder %v6089_v17, %v6107_v15 }
 0xc4d   :  { %v3023_v11 = vmul.f32 %v3013_v45, %v2939_v6  ;;  %v3076_v27 = vmul.f32 %v3066_v24, %v3056_v12  ;;  %v3051_v10 = vmul.f32 %v3041_v2, %v5757_v51 }
 0xc4e   :  { %v2904_v36 = vsub.f32 1.5, %v2903_v19  ;;  %3114 = vmatpush.msra.mxu3 %v3097_v54 }
 0xc4f   :  { %v3033_v13 = vsub.f32 1.5, %v3023_v11  ;;  %v3096_v34 = vadd.f32 %v3086_v37, %v3076_v27  ;;  %v3071_v51 = vmul.f32 %v3061_v40, %v3051_v10 }
 0xc50   :  { %v2905_v48 = vmul.f32 %v3831_v49, %v2904_v36 }
 0xc51   :  { %v3043_v38 = vmul.f32 %v3033_v13, %v2939_v6  ;;  %3115 = vmatpush.msra.mxu3 %v3096_v34  ;;  %v3091_v55 = vadd.f32 %v3081_v23, %v3071_v51 }
 0xc52   :  { %v2909_v61 = vsel %vm2908_vm8, %v3831_v49, %v2905_v48  ;;  %v3082_v49 = vld [vmem:[%s5998_s12 + $0x10] sm:$0xff]  ;;  %s3135_s12 = sshll.u32 %s3881_s11, 4  ;;  %s3136_s12 = int_to_ptr.vmem [resolvable:$true] %s3135_s12 }
 0xc53   :  { %v3010_v43 = vmul.f32 %v3000_v47, %v2909_v61  ;;  %v3053_v57 = vmul.f32 %v3043_v38, %v5754_v30  ;;  %3116 = vmatpush.msra.mxu3 %v3095_v58  ;;  %v3092_v3 = vadd.f32 %v3082_v49, %v3072_v35 }
 0xc55   :  { %v3020_v16 = vmul.f32 %v3010_v43, %v2909_v61  ;;  %v3073_v26 = vmul.f32 %v3063_v41, %v3053_v57  ;;  %3117 = vmatpush.msra.mxu3 %v3094_v62 }
 0xc57   :  { %v3093_v30 = vadd.f32 %v3083_v29, %v3073_v26  ;;  %v3030_v39 = vsub.f32 1.5, %v3020_v16 }
 0xc59   :  { %3118 = vmatpush.msra.mxu3 %v3093_v30  ;;  %v3040_v32 = vmul.f32 %v3030_v39, %v2909_v61 }
 0xc5b   :  { %3119 = vmatpush.msra.mxu3 %v3092_v3  ;;  %v3050_v7 = vmul.f32 %v3040_v32, %v5766_v59  ;;  %v166_v59 = vsel %vm164_vm10, 0.2, %v3880_v52 }
 0xc5d   :  { %3120 = vmatpush.msra.mxu3 %v3091_v55  ;;  %v3070_v60 = vmul.f32 %v3060_v28, %v3050_v7 }
 0xc5f   :  { %v3090_v18 = vadd.f32 %v3080_v53, %v3070_v60 }
 0xc61   :  { %3121 = vmatpush.msra.mxu3 %v3090_v18 }
 0xc62   :  { %3379 = vmatmul.msk.f32.vlgmr.msra.gmra.mxu3 %vm872_vm5, %v165_v33 }
 0xc6a   :  { %3380 = vmatmul.msk.f32.gmra.mxu3 %vm872_vm5, %v166_v59 }
 0xce5   :  { %v3123_v25 = vpop.f32.mrf.mxu3 }
 0xce6   :  { %3129 = vst.msk [vmem:[#allocation2] sm:$0xff] %vm175_vm0, %v3123_v25 }
 0xced   :  { %v3126_v50 = vpop.f32.mrf.mxu3 }
 0xcee   :  { %3130 = vst.msk [vmem:[#allocation2 + $0x8] sm:$0xff] %vm175_vm0, %v3126_v50 }
 0xcef   :  { %3143 = dma.vmem_to_hbm [thread:$0]  %s3136_s12, 256, %s3138_s7, [#allocation3], %s3882_s24, %s3882_s24, %s3883_s25  }
 0xcf0   :  { %3866 = dma.done.wait [#allocation3], 256  }
 0xcf1   :  { %3867 = vsyncadd [#allocation3], 4294967040 }
 0xcf2   :  { %3148 = vsyncpa [#allocation3], 1 }

</bundles_post_ra>
